<compile_context>
chip_gen: v7x
topology: tpu7x:2x2x1
jax: 0.10.0
libtpu: 0.0.40
codegen_flags: <defaults>
</compile_context>

<pallas_src>
import jax
import jax.numpy as jnp
from jax import lax
from jax.experimental import pallas as pl
from jax.experimental.pallas import tpu as pltpu

LANE = 128  # TPU vreg lane width


def _round_up(x, m):
    return (x + m - 1) // m * m


def _conv_bn_relu_kernel(x_ref, w_ref, b_ref, o_ref, acc_ref):
    """Grid = (N, D, kd).  One padded input depth-slice -> one output depth-slice.

    x_ref  : (1, 1, H+2, W+2, Cin_p)  bf16  padded input slice at depth d + kd
    w_ref  : (3, 3, 3*Cin_p, Cout_p)  bf16  BN-folded weight, kw folded into K
    b_ref  : (1, Cout_p)              f32   BN bias
    o_ref  : (1, 1, H, W, Cout_p)     f32   output depth-slice d
    acc_ref: (H*W, Cout_p)            f32   accumulator across the kd axis
    """
    kd = pl.program_id(2)

    @pl.when(kd == 0)
    def _init():
        acc_ref[...] = jnp.zeros_like(acc_ref)

    _, _, H, W, Cout_p = o_ref.shape
    Cin_p = x_ref.shape[-1]
    rows = H * W

    wk = w_ref[kd]                       # (3, 3*Cin_p, Cout_p), dynamic kd index
    for kh in range(3):                  # 3 taps; kw is folded into K below
        # Fold the 3 kw taps into the contraction dim -> (rows, 3*Cin_p).
        # Each concat piece is 128-lane aligned (Cin_p % 128 == 0), so this is a
        # cheap lane-wise placement, and every tap is copied exactly once.
        xs = jnp.concatenate(
            [x_ref[0, 0, kh:kh + H, kw:kw + W, :] for kw in range(3)],
            axis=-1,
        ).reshape(rows, 3 * Cin_p)
        acc_ref[...] += jnp.dot(xs, wk[kh],
                                preferred_element_type=jnp.float32)

    @pl.when(kd == pl.num_programs(2) - 1)
    def _finalize():
        y = jnp.maximum(acc_ref[...] + b_ref[...], 0.0)       # BN bias + ReLU
        o_ref[...] = y.reshape(1, 1, H, W, Cout_p).astype(o_ref.dtype)


def conv_bn_relu_3d(x_ncdhw, weight_oikkk, gamma, beta, running_mean,
                    running_var, eps=1e-5, compute_dtype=jnp.bfloat16):
    """Forward pass of ConvBnReLU3D (eval-mode BN).

    x_ncdhw      : (N, Cin, D, H, W)  float32 (PyTorch layout)
    weight_oikkk : (Cout, Cin, 3, 3, 3)
    gamma/beta/running_mean/running_var : (Cout,)
    returns      : (N, Cout, D, H, W)  float32
    """
    N, Cin, D, H, W = x_ncdhw.shape
    Cout = weight_oikkk.shape[0]
    Cin_p = _round_up(Cin, LANE)
    Cout_p = _round_up(Cout, LANE)
    Dp, Hp, Wp = D + 2, H + 2, W + 2

    # --- BN folding (eval mode) ---
    scale = gamma / jnp.sqrt(running_var + eps)               # (Cout,)
    bias = beta - running_mean * scale                        # (Cout,)

    # --- weights: (Cout,Cin,3,3,3) -> (3,3,3,Cin,Cout)*scale, zero-pad channels
    #     to the lane width, fold kw into the contraction -> (3, 3, 3*Cin_p, Cout_p)
    w = jnp.transpose(weight_oikkk, (2, 3, 4, 1, 0))
    w = w * scale[None, None, None, None, :]
    w = jnp.pad(w, ((0, 0), (0, 0), (0, 0),
                    (0, Cin_p - Cin), (0, Cout_p - Cout)))
    w = w.reshape(3, 3, 3 * Cin_p, Cout_p).astype(compute_dtype)
    bias_p = jnp.pad(bias, (0, Cout_p - Cout)).reshape(1, Cout_p)
    bias_p = bias_p.astype(jnp.float32)

    # --- activations: NCDHW -> NDHWC; one fused pad for the spatial halo (+1 on
    #     D/H/W) and the channel lanes; bf16 cast.
    # TODO(synk): if the surrounding model keeps channels-last activations, the
    #             boundary transposes here and at the exit can be deleted.
    x = jnp.transpose(x_ncdhw, (0, 2, 3, 4, 1))               # NDHWC
    xp = jnp.pad(x, ((0, 0), (1, 1), (1, 1), (1, 1),
                     (0, Cin_p - Cin))).astype(compute_dtype)

    out_ndhwc = pl.pallas_call(
        _conv_bn_relu_kernel,
        out_shape=jax.ShapeDtypeStruct((N, D, H, W, Cout_p), jnp.float32),
        grid_spec=pltpu.PrefetchScalarGridSpec(
            num_scalar_prefetch=0,
            grid=(N, D, 3),
            in_specs=[
                # one padded input depth-slice at depth d + kd
                pl.BlockSpec((1, 1, Hp, Wp, Cin_p),
                             lambda n, d, kd: (n, d + kd, 0, 0, 0)),
                # whole folded weight, VMEM-resident (constant block index)
                pl.BlockSpec((3, 3, 3 * Cin_p, Cout_p),
                             lambda n, d, kd: (0, 0, 0, 0)),
                pl.BlockSpec((1, Cout_p), lambda n, d, kd: (0, 0)),
            ],
            out_specs=pl.BlockSpec((1, 1, H, W, Cout_p),
                                   lambda n, d, kd: (n, d, 0, 0, 0)),
            scratch_shapes=[pltpu.VMEM((H * W, Cout_p), jnp.float32)],
        ),
        compiler_params=pltpu.CompilerParams(
            dimension_semantics=("parallel", "parallel", "arbitrary"),
            vmem_limit_bytes=32 * 1024 * 1024,
        ),
    )(xp, w, bias_p)

    out = out_ndhwc[..., :Cout]                               # drop channel pad
    return jnp.transpose(out, (0, 4, 1, 2, 3))                # back to NCDHW


def _reference(x_ncdhw, weight_oikkk, gamma, beta, running_mean, running_var,
               eps=1e-5, compute_dtype=jnp.bfloat16):
    """Pure-JAX reference (lax.conv) with matching bf16 inputs / f32 accumulation."""
    scale = gamma / jnp.sqrt(running_var + eps)
    bias = beta - running_mean * scale
    w = jnp.transpose(weight_oikkk, (2, 3, 4, 1, 0))
    w = (w * scale[None, None, None, None, :]).astype(compute_dtype)
    x = jnp.transpose(x_ncdhw, (0, 2, 3, 4, 1)).astype(compute_dtype)
    y = lax.conv_general_dilated(
        x, w, window_strides=(1, 1, 1), padding="SAME",
        dimension_numbers=("NDHWC", "DHWIO", "NDHWC"),
        preferred_element_type=jnp.float32)
    y = jnp.maximum(y + bias, 0.0)
    return jnp.transpose(y, (0, 4, 1, 2, 3))


if __name__ == "__main__":
    key = jax.random.PRNGKey(0)
    k_x, k_w, k_g, k_b, k_m, k_v = jax.random.split(key, 6)

    # Small shapes: N=2, Cin=4, Cout=8, D=8, H=16, W=16
    N, Cin, Cout, D, H, W = 2, 4, 8, 8, 16, 16

    x = jax.random.normal(k_x, (N, Cin, D, H, W), dtype=jnp.float32)
    weight = jax.random.normal(k_w, (Cout, Cin, 3, 3, 3),
                               dtype=jnp.float32) * 0.1
    gamma = 1.0 + 0.1 * jax.random.normal(k_g, (Cout,), dtype=jnp.float32)
    beta = 0.1 * jax.random.normal(k_b, (Cout,), dtype=jnp.float32)
    running_mean = 0.1 * jax.random.normal(k_m, (Cout,), dtype=jnp.float32)
    running_var = jnp.abs(1.0 + 0.1 * jax.random.normal(k_v, (Cout,),
                                                        dtype=jnp.float32))

    out = conv_bn_relu_3d(x, weight, gamma, beta, running_mean, running_var)
    out = jax.block_until_ready(out)

    ref = _reference(x, weight, gamma, beta, running_mean, running_var)
    assert out.shape == (N, Cout, D, H, W)
    assert jnp.allclose(out, ref, atol=2e-2, rtol=2e-2), (
        float(jnp.max(jnp.abs(out - ref))))

    print("KERNEL_OK")
</pallas_src>

<mosaic_0001>
module attributes {stable_mosaic.version = 11 : i64} {
  func.func @_conv_bn_relu_kernel(%arg0: i32, %arg1: i32, %arg2: i32, %arg3: memref<1x1x18x18x128xbf16, #tpu.memory_space<vmem>>, %arg4: memref<3x3x384x128xbf16, #tpu.memory_space<vmem>>, %arg5: memref<1x128xf32, #tpu.memory_space<vmem>>, %arg6: memref<1x1x16x16x128xf32, #tpu.memory_space<vmem>>, %arg7: memref<256x128xf32, #tpu.memory_space<vmem>>) attributes {dimension_semantics = [#tpu.dimension_semantics<parallel>, #tpu.dimension_semantics<parallel>, #tpu.dimension_semantics<arbitrary>], iteration_bounds = array<i64: 2, 8, 3>, scalar_prefetch = 0 : i64, scratch_operands = 1 : i64, tpu.core_type = #tpu.core_type<tc>, window_params = [{transform_indices = @transform_0, window_bounds = array<i64: 1, 1, 18, 18, 128>}, {pipeline_mode = #tpu.pipeline_mode<synchronous>, transform_indices = @transform_1, window_bounds = array<i64: 3, 3, 384, 128>}, {pipeline_mode = #tpu.pipeline_mode<synchronous>, transform_indices = @transform_2, window_bounds = array<i64: 1, 128>}, {transform_indices = @transform_3, window_bounds = array<i64: 1, 1, 16, 16, 128>}]} {
    %c0_i32 = arith.constant 0 : i32
    %0 = arith.cmpi eq, %arg2, %c0_i32 : i32
    %1 = arith.extui %0 : i1 to i32
    %c0_i32_0 = arith.constant 0 : i32
    %2 = arith.cmpi ne, %1, %c0_i32_0 : i32
    scf.if %2 {
      %cst_61 = arith.constant 0.000000e+00 : f32
      %51 = vector.broadcast %cst_61 : f32 to vector<256x128xf32>
      %c0_62 = arith.constant 0 : index
      %c0_63 = arith.constant 0 : index
      %52 = vector.load %arg7[%c0_62, %c0_63] : memref<256x128xf32, #tpu.memory_space<vmem>>, vector<256x128xf32>
      tpu.vector_store %arg7[%c0_62, %c0_63], %51 {strides = array<i32>} : memref<256x128xf32, #tpu.memory_space<vmem>>, vector<256x128xf32>,
    } else {
    }
    %3 = arith.index_cast %arg2 : i32 to index
    %c0 = arith.constant 0 : index
    %c0_1 = arith.constant 0 : index
    %c0_2 = arith.constant 0 : index
    %4 = vector.load %arg4[%3, %c0, %c0_1, %c0_2] : memref<3x3x384x128xbf16, #tpu.memory_space<vmem>>, vector<1x3x384x128xbf16>
    %5 = vector.shape_cast %4 : vector<1x3x384x128xbf16> to vector<3x384x128xbf16>
    %c0_3 = arith.constant 0 : index
    %c0_4 = arith.constant 0 : index
    %c0_5 = arith.constant 0 : index
    %c0_6 = arith.constant 0 : index
    %c0_7 = arith.constant 0 : index
    %6 = vector.load %arg3[%c0_3, %c0_4, %c0_5, %c0_6, %c0_7] : memref<1x1x18x18x128xbf16, #tpu.memory_space<vmem>>, vector<1x1x16x16x128xbf16>
    %7 = vector.shape_cast %6 : vector<1x1x16x16x128xbf16> to vector<16x16x128xbf16>
    %c0_8 = arith.constant 0 : index
    %c0_9 = arith.constant 0 : index
    %c0_10 = arith.constant 0 : index
    %c1 = arith.constant 1 : index
    %c0_11 = arith.constant 0 : index
    %8 = vector.load %arg3[%c0_8, %c0_9, %c0_10, %c1, %c0_11] : memref<1x1x18x18x128xbf16, #tpu.memory_space<vmem>>, vector<1x1x16x16x128xbf16>
    %9 = vector.shape_cast %8 : vector<1x1x16x16x128xbf16> to vector<16x16x128xbf16>
    %c0_12 = arith.constant 0 : index
    %c0_13 = arith.constant 0 : index
    %c0_14 = arith.constant 0 : index
    %c2 = arith.constant 2 : index
    %c0_15 = arith.constant 0 : index
    %10 = vector.load %arg3[%c0_12, %c0_13, %c0_14, %c2, %c0_15] : memref<1x1x18x18x128xbf16, #tpu.memory_space<vmem>>, vector<1x1x16x16x128xbf16>
    %11 = vector.shape_cast %10 : vector<1x1x16x16x128xbf16> to vector<16x16x128xbf16>
    %12 = tpu.concatenate %7, %9, %11 in 2 : vector<16x16x128xbf16>, vector<16x16x128xbf16>, vector<16x16x128xbf16> -> vector<16x16x384xbf16>
    %13 = vector.shape_cast %12 : vector<16x16x384xbf16> to vector<256x384xbf16>
    %c0_16 = arith.constant 0 : index
    %c0_17 = arith.constant 0 : index
    %14 = vector.load %arg7[%c0_16, %c0_17] : memref<256x128xf32, #tpu.memory_space<vmem>>, vector<256x128xf32>
    %15 = vector.extract_strided_slice %5 {offsets = [0, 0, 0], sizes = [1, 384, 128], strides = [1, 1, 1]} : vector<3x384x128xbf16> to vector<1x384x128xbf16>
    %16 = vector.shape_cast %15 : vector<1x384x128xbf16> to vector<384x128xbf16>
    %cst = arith.constant dense<0.000000e+00> : vector<256x128xf32>
    %17 = tpu.matmul %13, %16, %cst {dimension_numbers = #tpu.dot_dimension_numbers<[1], [0], [0], [1], [0, 0, 1, 1], [], []>} : vector<256x384xbf16>, vector<384x128xbf16>, vector<256x128xf32> -> vector<256x128xf32>
    %18 = arith.addf %14, %17 : vector<256x128xf32>
    %c0_18 = arith.constant 0 : index
    %c0_19 = arith.constant 0 : index
    %19 = vector.load %arg7[%c0_18, %c0_19] : memref<256x128xf32, #tpu.memory_space<vmem>>, vector<256x128xf32>
    tpu.vector_store %arg7[%c0_18, %c0_19], %18 {strides = array<i32>} : memref<256x128xf32, #tpu.memory_space<vmem>>, vector<256x128xf32>,
    %c0_20 = arith.constant 0 : index
    %c0_21 = arith.constant 0 : index
    %c1_22 = arith.constant 1 : index
    %c0_23 = arith.constant 0 : index
    %c0_24 = arith.constant 0 : index
    %20 = vector.load %arg3[%c0_20, %c0_21, %c1_22, %c0_23, %c0_24] : memref<1x1x18x18x128xbf16, #tpu.memory_space<vmem>>, vector<1x1x16x16x128xbf16>
    %21 = vector.shape_cast %20 : vector<1x1x16x16x128xbf16> to vector<16x16x128xbf16>
    %c0_25 = arith.constant 0 : index
    %c0_26 = arith.constant 0 : index
    %c1_27 = arith.constant 1 : index
    %c1_28 = arith.constant 1 : index
    %c0_29 = arith.constant 0 : index
    %22 = vector.load %arg3[%c0_25, %c0_26, %c1_27, %c1_28, %c0_29] : memref<1x1x18x18x128xbf16, #tpu.memory_space<vmem>>, vector<1x1x16x16x128xbf16>
    %23 = vector.shape_cast %22 : vector<1x1x16x16x128xbf16> to vector<16x16x128xbf16>
    %c0_30 = arith.constant 0 : index
    %c0_31 = arith.constant 0 : index
    %c1_32 = arith.constant 1 : index
    %c2_33 = arith.constant 2 : index
    %c0_34 = arith.constant 0 : index
    %24 = vector.load %arg3[%c0_30, %c0_31, %c1_32, %c2_33, %c0_34] : memref<1x1x18x18x128xbf16, #tpu.memory_space<vmem>>, vector<1x1x16x16x128xbf16>
    %25 = vector.shape_cast %24 : vector<1x1x16x16x128xbf16> to vector<16x16x128xbf16>
    %26 = tpu.concatenate %21, %23, %25 in 2 : vector<16x16x128xbf16>, vector<16x16x128xbf16>, vector<16x16x128xbf16> -> vector<16x16x384xbf16>
    %27 = vector.shape_cast %26 : vector<16x16x384xbf16> to vector<256x384xbf16>
    %c0_35 = arith.constant 0 : index
    %c0_36 = arith.constant 0 : index
    %28 = vector.load %arg7[%c0_35, %c0_36] : memref<256x128xf32, #tpu.memory_space<vmem>>, vector<256x128xf32>
    %29 = vector.extract_strided_slice %5 {offsets = [1, 0, 0], sizes = [1, 384, 128], strides = [1, 1, 1]} : vector<3x384x128xbf16> to vector<1x384x128xbf16>
    %30 = vector.shape_cast %29 : vector<1x384x128xbf16> to vector<384x128xbf16>
    %cst_37 = arith.constant dense<0.000000e+00> : vector<256x128xf32>
    %31 = tpu.matmul %27, %30, %cst_37 {dimension_numbers = #tpu.dot_dimension_numbers<[1], [0], [0], [1], [0, 0, 1, 1], [], []>} : vector<256x384xbf16>, vector<384x128xbf16>, vector<256x128xf32> -> vector<256x128xf32>
    %32 = arith.addf %28, %31 : vector<256x128xf32>
    %c0_38 = arith.constant 0 : index
    %c0_39 = arith.constant 0 : index
    %33 = vector.load %arg7[%c0_38, %c0_39] : memref<256x128xf32, #tpu.memory_space<vmem>>, vector<256x128xf32>
    tpu.vector_store %arg7[%c0_38, %c0_39], %32 {strides = array<i32>} : memref<256x128xf32, #tpu.memory_space<vmem>>, vector<256x128xf32>,
    %c0_40 = arith.constant 0 : index
    %c0_41 = arith.constant 0 : index
    %c2_42 = arith.constant 2 : index
    %c0_43 = arith.constant 0 : index
    %c0_44 = arith.constant 0 : index
    %34 = vector.load %arg3[%c0_40, %c0_41, %c2_42, %c0_43, %c0_44] : memref<1x1x18x18x128xbf16, #tpu.memory_space<vmem>>, vector<1x1x16x16x128xbf16>
    %35 = vector.shape_cast %34 : vector<1x1x16x16x128xbf16> to vector<16x16x128xbf16>
    %c0_45 = arith.constant 0 : index
    %c0_46 = arith.constant 0 : index
    %c2_47 = arith.constant 2 : index
    %c1_48 = arith.constant 1 : index
    %c0_49 = arith.constant 0 : index
    %36 = vector.load %arg3[%c0_45, %c0_46, %c2_47, %c1_48, %c0_49] : memref<1x1x18x18x128xbf16, #tpu.memory_space<vmem>>, vector<1x1x16x16x128xbf16>
    %37 = vector.shape_cast %36 : vector<1x1x16x16x128xbf16> to vector<16x16x128xbf16>
    %c0_50 = arith.constant 0 : index
    %c0_51 = arith.constant 0 : index
    %c2_52 = arith.constant 2 : index
    %c2_53 = arith.constant 2 : index
    %c0_54 = arith.constant 0 : index
    %38 = vector.load %arg3[%c0_50, %c0_51, %c2_52, %c2_53, %c0_54] : memref<1x1x18x18x128xbf16, #tpu.memory_space<vmem>>, vector<1x1x16x16x128xbf16>
    %39 = vector.shape_cast %38 : vector<1x1x16x16x128xbf16> to vector<16x16x128xbf16>
    %40 = tpu.concatenate %35, %37, %39 in 2 : vector<16x16x128xbf16>, vector<16x16x128xbf16>, vector<16x16x128xbf16> -> vector<16x16x384xbf16>
    %41 = vector.shape_cast %40 : vector<16x16x384xbf16> to vector<256x384xbf16>
    %c0_55 = arith.constant 0 : index
    %c0_56 = arith.constant 0 : index
    %42 = vector.load %arg7[%c0_55, %c0_56] : memref<256x128xf32, #tpu.memory_space<vmem>>, vector<256x128xf32>
    %43 = vector.extract_strided_slice %5 {offsets = [2, 0, 0], sizes = [1, 384, 128], strides = [1, 1, 1]} : vector<3x384x128xbf16> to vector<1x384x128xbf16>
    %44 = vector.shape_cast %43 : vector<1x384x128xbf16> to vector<384x128xbf16>
    %cst_57 = arith.constant dense<0.000000e+00> : vector<256x128xf32>
    %45 = tpu.matmul %41, %44, %cst_57 {dimension_numbers = #tpu.dot_dimension_numbers<[1], [0], [0], [1], [0, 0, 1, 1], [], []>} : vector<256x384xbf16>, vector<384x128xbf16>, vector<256x128xf32> -> vector<256x128xf32>
    %46 = arith.addf %42, %45 : vector<256x128xf32>
    %c0_58 = arith.constant 0 : index
    %c0_59 = arith.constant 0 : index
    %47 = vector.load %arg7[%c0_58, %c0_59] : memref<256x128xf32, #tpu.memory_space<vmem>>, vector<256x128xf32>
    tpu.vector_store %arg7[%c0_58, %c0_59], %46 {strides = array<i32>} : memref<256x128xf32, #tpu.memory_space<vmem>>, vector<256x128xf32>,
    %c2_i32 = arith.constant 2 : i32
    %48 = arith.cmpi eq, %arg2, %c2_i32 : i32
    %49 = arith.extui %48 : i1 to i32
    %c0_i32_60 = arith.constant 0 : i32
    %50 = arith.cmpi ne, %49, %c0_i32_60 : i32
    scf.if %50 {
      %c0_61 = arith.constant 0 : index
      %c0_62 = arith.constant 0 : index
      %51 = vector.load %arg7[%c0_61, %c0_62] : memref<256x128xf32, #tpu.memory_space<vmem>>, vector<256x128xf32>
      %c0_63 = arith.constant 0 : index
      %c0_64 = arith.constant 0 : index
      %52 = vector.load %arg5[%c0_63, %c0_64] : memref<1x128xf32, #tpu.memory_space<vmem>>, vector<1x128xf32>
      %53 = vector.broadcast %52 : vector<1x128xf32> to vector<256x128xf32>
      %54 = arith.addf %51, %53 : vector<256x128xf32>
      %cst_65 = arith.constant 0.000000e+00 : f32
      %55 = vector.broadcast %cst_65 : f32 to vector<256x128xf32>
      %56 = arith.maximumf %54, %55 : vector<256x128xf32>
      %57 = vector.shape_cast %56 : vector<256x128xf32> to vector<1x1x16x16x128xf32>
      %c0_66 = arith.constant 0 : index
      %c0_67 = arith.constant 0 : index
      %c0_68 = arith.constant 0 : index
      %c0_69 = arith.constant 0 : index
      %c0_70 = arith.constant 0 : index
      %58 = vector.load %arg6[%c0_66, %c0_67, %c0_68, %c0_69, %c0_70] : memref<1x1x16x16x128xf32, #tpu.memory_space<vmem>>, vector<1x1x16x16x128xf32>
      tpu.vector_store %arg6[%c0_66, %c0_67, %c0_68, %c0_69, %c0_70], %57 {strides = array<i32>} : memref<1x1x16x16x128xf32, #tpu.memory_space<vmem>>, vector<1x1x16x16x128xf32>,
    } else {
    }
    return
  }
  func.func @transform_0(%arg0: i32, %arg1: i32, %arg2: i32) -> (i32, i32, i32, i32, i32) {
    %0 = arith.addi %arg1, %arg2 : i32
    %c0_i32 = arith.constant 0 : i32
    %c0_i32_0 = arith.constant 0 : i32
    %c0_i32_1 = arith.constant 0 : i32
    %c0_i32_2 = arith.constant 0 : i32
    return %arg0, %0, %c0_i32, %c0_i32_0, %c0_i32_1 : i32, i32, i32, i32, i32
  }
  func.func @transform_1(%arg0: i32, %arg1: i32, %arg2: i32) -> (i32, i32, i32, i32) {
    %c0_i32 = arith.constant 0 : i32
    %c0_i32_0 = arith.constant 0 : i32
    %c0_i32_1 = arith.constant 0 : i32
    %c0_i32_2 = arith.constant 0 : i32
    %c0_i32_3 = arith.constant 0 : i32
    return %c0_i32, %c0_i32_0, %c0_i32_1, %c0_i32_2 : i32, i32, i32, i32
  }
  func.func @transform_2(%arg0: i32, %arg1: i32, %arg2: i32) -> (i32, i32) {
    %c0_i32 = arith.constant 0 : i32
    %c0_i32_0 = arith.constant 0 : i32
    %c0_i32_1 = arith.constant 0 : i32
    return %c0_i32, %c0_i32_0 : i32, i32
  }
  func.func @transform_3(%arg0: i32, %arg1: i32, %arg2: i32) -> (i32, i32, i32, i32, i32) {
    %c0_i32 = arith.constant 0 : i32
    %c0_i32_0 = arith.constant 0 : i32
    %c0_i32_1 = arith.constant 0 : i32
    %c0_i32_2 = arith.constant 0 : i32
    return %arg0, %arg1, %c0_i32, %c0_i32_0, %c0_i32_1 : i32, i32, i32, i32, i32
  }
}

</mosaic_0001>

<bundles_post_ra>
// kernel: tpu_custom_call.1
= control target key start
LH: loop header
LB: loop body
LE: loop exit
PB: predicated region body
PF: predicated region fallthrough
CT: control target
= control target key end

     0   :  { %8 = vsyncpa [#allocation4], 0  ;;  %s7224_s0 = inlined_call_operand.vmem [shape: bf16[2,10,18,18,128], index: 0, kind: input, shape index: {}]   ;;  %s7225_s1 = inlined_call_operand.vmem [shape: bf16[3,3,384,128], index: 1, kind: input, shape index: {}]   ;;  %s7226_s2 = inlined_call_operand.vmem [shape: f32[1,128], index: 2, kind: input, shape index: {}]   ;;  %s7227_s3 = inlined_call_operand.hbm [shape: f32[2,8,16,16,128], index: 3, kind: output, shape index: {}]  }
   0x1   :  { %10 = vsyncpa [#allocation4 + $0x1], 0  ;;  %s5691_s12 = smov 0   ;;  %s5693_s13 = smov 0  }
   0x2   :  { %s5695_s14 = smov 0   ;;  %s5697_s15 = smov 0  }
   0x3   :  { %s5699_s16 = smov 0   ;;  %s5701_s17 = smov 0  }
   0x4   :  { %s5703_s18 = smov 0   ;;  %s5705_s19 = smov 0  }
   0x5   :  { %s5707_s20 = smov 0   ;;  %s5709_s21 = smov 0  }
   0x6 LB: > { %s3917_s22 = sadd.s32 4294967295, %s5665_s21   ;;  %s3918_s23 = sadd.s32 4294967294, %s5665_s21   ;;  %s5665_s21 = sphi %s5709_s21, %s16_s21   ;;  %s5661_s20 = sphi %s5707_s20, %s7251_s20   ;;  %s5657_s19 = sphi %s5705_s19, %s7250_s19   ;;  %s5653_s18 = sphi %s5703_s18, %s7249_s18   ;;  %s5649_s17 = sphi %s5701_s17, %s7248_s17   ;;  %s5645_s16 = sphi %s5699_s16, %s7247_s16   ;;  %s5641_s15 = sphi %s5697_s15, %s7246_s15   ;;  %s5637_s14 = sphi %s5695_s14, %s7245_s14   ;;  %s5633_s13 = sphi %s5693_s13, %s7244_s13   ;;  %s5629_s12 = sphi %s5691_s12, %s7243_s12  }
   0x7   : > { %s28_s24 = sadd.s32 1, %s5653_s18  ;;  %s31_s25 = sadd.s32 1, %s5657_s19 }
   0x8   : > { %p29_p0 = scmp.ge.s32.totalorder %s28_s24, 3  ;;  %s35_s26 = sadd.s32 1, %s5661_s20 }
   0x9   : > { %p126_p1 = scmp.ne.s32.totalorder %s5637_s14, %s5633_s13  ;;  %p127_p2 = scmp.eq.s32.totalorder %s3917_s22, 47 }
   0xa   : > { %s7253_s24 = smov (%p29_p0, %s28_s24), 0  ;;  %s7255_s25 = smov (!%p29_p0, %s31_s25), %s5657_s19 }
   0xb   : > { %p132_p3 = scmp.ne.s32.totalorder %s5633_s13, %s5629_s12  ;;  %p33_p4 = scmp.ge.s32.totalorder %s7255_s25, 8 }
   0xc   : > { %p133_p5 = scmp.eq.s32.totalorder %s3918_s23, 47  ;;  %p5753_p6 = por %p127_p2, %p126_p1 }
   0xd   : > { %s7257_s25 = smov (%p33_p4, %s7255_s25), 0  ;;  %s7259_s26 = smov (!%p33_p4, %s35_s26), %s5661_s20 }
   0xe   : > { %p5760_p7 = por %p133_p5, %p132_p3  ;;  %p3921_p8 = scmp.ge.s32.totalorder %s5665_s21, 1 }
   0xf   : > { %p37_p9 = scmp.ge.s32.totalorder %s7259_s26, 2  ;;  %p171_p10 = scmp.lt.s32.totalorder %s5665_s21, 49 }
  0x10   : > { %s112_s29 = ssub.s32 %s5657_s19, %s7257_s25  ;;  %s116_s5 = sadd.s32 1, %s5637_s14 }
  0x11   : > { %s7261_s26 = smov (%p37_p9, %s7259_s26), 0  ;;  %p172_p11 = pnand %p3921_p8, %p171_p10 }
  0x12   : > { %7231 = sst [smem:[#allocation6_spill]] %s7261_s26  ;;  %s111_s30 = ssub.s32 %s5661_s20, %s7261_s26 }
  0x13   : > { %s113_s4 = sor.u32 %s112_s29, %s111_s30  ;;  %175 = sbr.rel (%p172_p11) target bundleno = 629 (0x275), region = 32 }
  0x14   : > { %p114_p12 = scmp.eq.s32.totalorder %s113_s4, 0 }
  0x16   : > { %s5774_s6 = scalar_select %p114_p12, %s5637_s14, %s116_s5  }
  0x1a   : > { %s197_s7 = sand.u32 1, %s5633_s13   ;;  %s200_s8 = sadd.s32 %s5641_s15, %s5645_s16 }
  0x1b   : > { %s3922_s9 = sshll.u32 %s197_s7, 8  ;;  %p201_p13 = scmp.lt.s32.totalorder %s5649_s17, 1 }
  0x1c   : > { %p203_p0 = scmp.lt.s32.totalorder %s200_s8, 9  ;;  %s5788_s26 = scalar_lea.vmem [#allocation3], %s3922_s9 }
  0x1d   : > { %s202_s10 = scalar_select %p201_p13, %s5649_s17, 1 }
  0x1e   : > { %s7263_s8 = smov (!%p203_p0, %s200_s8), 9  ;;  %p3924_p1 = scmp.ne.s32.totalorder %s5641_s15, 0 }
  0x1f   : > { %s5232_s11 = smul.u32 540, %s202_s10  ;;  %v5667_v0 = vmov (!%p3924_p1), 0.0  }
  0x20   : > { %s5231_s22 = smul.u32 54, %s7263_s8  ;;  %216 = vst [vmem:[#allocation2] sm:$0xff] (!%p3924_p1), %v5667_v0  ;;  %217 = vst [vmem:[#allocation2 + $0x8] sm:$0xff] (!%p3924_p1), %v5667_v0 }
  0x21   : > { %215 = sbr.rel (%p3924_p1) target bundleno = 48 (0x30), region = 36  ;;  %218 = vst [vmem:[#allocation2 + $0x10] sm:$0xff] (!%p3924_p1), %v5667_v0  ;;  %219 = vst [vmem:[#allocation2 + $0x18] sm:$0xff] (!%p3924_p1), %v5667_v0 }
  0x22   : > { %s207_s23 = sadd.s32 %s5232_s11, %s5231_s22  ;;  %220 = vst [vmem:[#allocation2 + $0x20] sm:$0xff] (!%p3924_p1), %v5667_v0  ;;  %221 = vst [vmem:[#allocation2 + $0x28] sm:$0xff] (!%p3924_p1), %v5667_v0 }
  0x23   : > { %s3923_s29 = sshll.u32 %s207_s23, 2  ;;  %222 = vst [vmem:[#allocation2 + $0x30] sm:$0xff] (!%p3924_p1), %v5667_v0  ;;  %223 = vst [vmem:[#allocation2 + $0x38] sm:$0xff] (!%p3924_p1), %v5667_v0 }
  0x24   : > { %s5786_s5 = scalar_lea.vmem %s7224_s0, %s3923_s29  ;;  %224 = vst [vmem:[#allocation2 + $0x40] sm:$0xff] (!%p3924_p1), %v5667_v0  ;;  %225 = vst [vmem:[#allocation2 + $0x48] sm:$0xff] (!%p3924_p1), %v5667_v0 }
  0x25   : > { %226 = vst [vmem:[#allocation2 + $0x50] sm:$0xff] (!%p3924_p1), %v5667_v0  ;;  %227 = vst [vmem:[#allocation2 + $0x58] sm:$0xff] (!%p3924_p1), %v5667_v0 }
  0x26   : > { %228 = vst [vmem:[#allocation2 + $0x60] sm:$0xff] (!%p3924_p1), %v5667_v0  ;;  %229 = vst [vmem:[#allocation2 + $0x68] sm:$0xff] (!%p3924_p1), %v5667_v0 }
  0x27   : > { %230 = vst [vmem:[#allocation2 + $0x70] sm:$0xff] (!%p3924_p1), %v5667_v0  ;;  %231 = vst [vmem:[#allocation2 + $0x78] sm:$0xff] (!%p3924_p1), %v5667_v0 }
  0x28   : > { %232 = vst [vmem:[#allocation2 + $0x80] sm:$0xff] %v5667_v0  ;;  %233 = vst [vmem:[#allocation2 + $0x88] sm:$0xff] %v5667_v0 }
  0x29   : > { %234 = vst [vmem:[#allocation2 + $0x90] sm:$0xff] %v5667_v0  ;;  %235 = vst [vmem:[#allocation2 + $0x98] sm:$0xff] %v5667_v0 }
  0x2a   : > { %236 = vst [vmem:[#allocation2 + $0xa0] sm:$0xff] %v5667_v0  ;;  %237 = vst [vmem:[#allocation2 + $0xa8] sm:$0xff] %v5667_v0 }
  0x2b   : > { %238 = vst [vmem:[#allocation2 + $0xb0] sm:$0xff] %v5667_v0  ;;  %239 = vst [vmem:[#allocation2 + $0xb8] sm:$0xff] %v5667_v0 }
  0x2c   : > { %240 = vst [vmem:[#allocation2 + $0xc0] sm:$0xff] %v5667_v0  ;;  %241 = vst [vmem:[#allocation2 + $0xc8] sm:$0xff] %v5667_v0 }
  0x2d   : > { %242 = vst [vmem:[#allocation2 + $0xd0] sm:$0xff] %v5667_v0  ;;  %243 = vst [vmem:[#allocation2 + $0xd8] sm:$0xff] %v5667_v0 }
  0x2e   : > { %244 = vst [vmem:[#allocation2 + $0xe0] sm:$0xff] %v5667_v0  ;;  %245 = vst [vmem:[#allocation2 + $0xe8] sm:$0xff] %v5667_v0 }
  0x2f   : > { %246 = vst [vmem:[#allocation2 + $0xf0] sm:$0xff] %v5667_v0  ;;  %247 = vst [vmem:[#allocation2 + $0xf8] sm:$0xff] %v5667_v0 }
  0x30 PF: > { %s4278_s8 = smul.u32 576, %s5641_s15  ;;  %v395_v1 = vld [vmem:[%s5786_s5] sm:$0xf]  ;;  %v396_v2 = vld [vmem:[%s5786_s5 + $0x4] sm:$0xf]  ;;  %vm860_vm1 = vcmask 1046528  }
  0x31   : > { %v5794_v3 = vcombine.low %v395_v1, %v396_v2  ;;  %v5348_v4 = vld [vmem:[%s5786_s5 + $0x8] ss:$0 sps:$4 sm:$0x11]   ;;  %vm603_vm0 = vsmask.f32 7424  ;;  %p4270_p2 = scmp.ne.s32.totalorder %s5641_s15, 2 }
  0x32   : > { %s5800_s11 = scalar_lea.vmem %s7225_s1, %s4278_s8  ;;  %v612_v10 = vshll.u32 %v5348_v4, 16  ;;  %v5851_v32 = vld [vmem:[%s5786_s5 + $0x64] sm:$0xf]  ;;  %v451_v35 = vld [vmem:[%s5786_s5 + $0x60] sm:$0xe] }
  0x33   : > { %v5323_v5 = vld [vmem:[%s5800_s11 + $0x40] sm:$0xff]   ;;  %v605_v6 = vshrl.u32 %v5794_v3, 16  ;;  %v607_v8 = vshll.u32 %v5794_v3, 16  ;;  %v5326_v11 = vld [vmem:[%s5800_s11 + $0x48] sm:$0xff]   ;;  %v5329_v17 = vld [vmem:[%s5800_s11 + $0x50] sm:$0xff]   ;;  %v3966_v38 = vcombine.low %v451_v35, %v5851_v32 }
  0x34   : > { %v5805_v7 = vld [vmem:[%s5800_s11 + $0x80] sm:$0xff]   ;;  %4279 = vmatprep.subr.bf16.mxu0 %v5323_v5  ;;  %v5813_v13 = vld [vmem:[%s5800_s11 + $0x88] sm:$0xff]   ;;  %v614_v14 = vrot.slane %v612_v10, 1  ;;  %v5819_v18 = vld [vmem:[%s5800_s11 + $0x90] sm:$0xff]  }
  0x35   : > { %v5325_v9 = vld [vmem:[%s5800_s11] sm:$0xff]   ;;  %4831 = vmatprep.subr.bf16.mxu1 %v5805_v7  ;;  %v609_v12 = vrot.slane %v607_v8, 1  ;;  %v5328_v15 = vld [vmem:[%s5800_s11 + $0x8] sm:$0xff]   ;;  %v5331_v20 = vld [vmem:[%s5800_s11 + $0x10] sm:$0xff]   ;;  %v885_v42 = vrot.slane %v3966_v38, 1 }
  0x36   : > { %4280 = vmatpush3.bf16.msra.mxu0 %v5325_v9  ;;  %4839 = vmatpush3.bf16.msra.mxu1 %v5805_v7  ;;  %v5332_v21 = vld [vmem:[%s5800_s11 + $0x58] sm:$0xff]   ;;  %v5335_v24 = vld [vmem:[%s5800_s11 + $0x60] sm:$0xff]   ;;  %v5338_v27 = vld [vmem:[%s5800_s11 + $0x68] sm:$0xff]  }
  0x37   : > { %4281 = vmatprep.subr.bf16.mxu0 %v5326_v11  ;;  %v610_v16 = vor.u32 %v609_v12, %v605_v6  ;;  %4832 = vmatprep.subr.bf16.mxu1 %v5813_v13  ;;  %v5827_v22 = vld [vmem:[%s5800_s11 + $0x98] sm:$0xff]   ;;  %v5834_v25 = vld [vmem:[%s5800_s11 + $0xa0] sm:$0xff]   ;;  %v5841_v28 = vld [vmem:[%s5800_s11 + $0xa8] sm:$0xff]  }
  0x38   : > { %v5334_v23 = vld [vmem:[%s5800_s11 + $0x18] sm:$0xff]   ;;  %v5337_v26 = vld [vmem:[%s5800_s11 + $0x20] sm:$0xff]   ;;  %v5340_v29 = vld [vmem:[%s5800_s11 + $0x28] sm:$0xff]  }
  0x39   : > { %v615_v19 = vsel %vm603_vm0, %v610_v16, %v614_v14  ;;  %v5341_v30 = vld [vmem:[%s5800_s11 + $0x70] sm:$0xff]   ;;  %v5344_v34 = vld [vmem:[%s5800_s11 + $0x78] sm:$0xff]   ;;  %v5862_v37 = vld [vmem:[%s5786_s5 + $0x68] ss:$0 sps:$4 sm:$0x11]  }
  0x3a   : > { %4282 = vmatpush3.bf16.msra.mxu0 %v5328_v15  ;;  %4840 = vmatpush3.bf16.msra.mxu1 %v5813_v13  ;;  %v5848_v31 = vld [vmem:[%s5800_s11 + $0xb0] sm:$0xff]   ;;  %v5859_v36 = vld [vmem:[%s5800_s11 + $0xb8] sm:$0xff]   ;;  %v452_v41 = vld [vmem:[%s5786_s5 + $0x6c] sm:$0xe]  ;;  %v886_v43 = vrot.slane %v5862_v37, 1 }
  0x3b   : > { %4283 = vmatprep.subr.bf16.mxu0 %v5329_v17  ;;  %4833 = vmatprep.subr.bf16.mxu1 %v5819_v18  ;;  %v5343_v33 = vld [vmem:[%s5800_s11 + $0x30] sm:$0xff]   ;;  %v5346_v40 = vld [vmem:[%s5800_s11 + $0x38] sm:$0xff]   ;;  %v5355_v46 = vld [vmem:[%s5800_s11 + $0x100] sm:$0xff]  }
  0x3c   : > { %1133 = vmatprep.mubr.bf16.mxu0 %v615_v19  ;;  %v5866_v39 = vld [vmem:[%s5786_s5 + $0x70] sm:$0xf]  ;;  %v5872_v44 = vld [vmem:[%s5786_s5 + $0x74] ss:$0 sps:$4 sm:$0x11]   ;;  %v887_v47 = vsel %vm860_vm1, %v885_v42, %v886_v43  ;;  %v5356_v53 = vld [vmem:[%s5800_s11 + $0xc0] sm:$0xff]  }
  0x3d   : > { %v3967_v45 = vcombine.low %v452_v41, %v5866_v39  ;;  %v889_v49 = vrot.slane %v5872_v44, 1  ;;  %4719 = vmatprep.mubr.bf16.mxu1 %v887_v47  ;;  %v397_v50 = vld [vmem:[%s5786_s5 + $0xc] sm:$0xf]  ;;  %v398_v51 = vld [vmem:[%s5786_s5 + $0x10] sm:$0xf]  ;;  %v5369_v14 = vld [vmem:[%s5800_s11 + $0x118] sm:$0xff]  }
  0x3e   : > { %4284 = vmatpush3.bf16.msra.mxu0 %v5331_v20  ;;  %4841 = vmatpush3.bf16.msra.mxu1 %v5819_v18  ;;  %v3927_v54 = vcombine.low %v397_v50, %v398_v51  ;;  %v5360_v55 = vld [vmem:[%s5786_s5 + $0x14] ss:$0 sps:$4 sm:$0x11]   ;;  %v5357_v56 = vld [vmem:[%s5800_s11 + $0x108] sm:$0xff]   ;;  %v5889_v57 = vld [vmem:[%s5786_s5 + $0x7c] sm:$0xf] }
  0x3f   : > { %4285 = vmatprep.subr.bf16.mxu0 %v5332_v21  ;;  %4834 = vmatprep.subr.bf16.mxu1 %v5827_v22  ;;  %v888_v48 = vrot.slane %v3967_v45, 1  ;;  %v624_v60 = vshll.u32 %v5360_v55, 16  ;;  %v453_v61 = vld [vmem:[%s5786_s5 + $0x78] sm:$0xe]  ;;  %v5358_v62 = vld [vmem:[%s5800_s11 + $0xc8] sm:$0xff]   ;;  %v5367_v1 = vld [vmem:[%s5800_s11 + $0x110] sm:$0xff]  }
  0x40   : > { %v617_v58 = vshrl.u32 %v3927_v54, 16  ;;  %v619_v59 = vshll.u32 %v3927_v54, 16  ;;  %v5895_v63 = vld [vmem:[%s5786_s5 + $0x80] ss:$0 sps:$4 sm:$0x11]   ;;  %v3968_v0 = vcombine.low %v453_v61, %v5889_v57  ;;  %v5368_v11 = vld [vmem:[%s5800_s11 + $0xd0] sm:$0xff]  }
  0x41   : > { %v890_v52 = vsel %vm860_vm1, %v888_v48, %v889_v49  ;;  %v626_v4 = vrot.slane %v624_v60, 1  ;;  %v5901_v5 = vld [vmem:[%s5786_s5 + $0x88] sm:$0xf]  ;;  %v454_v8 = vld [vmem:[%s5786_s5 + $0x84] sm:$0xe] }
  0x42   : > { %4286 = vmatpush3.bf16.msra.mxu0 %v5334_v23  ;;  %4842 = vmatpush3.bf16.msra.mxu1 %v5827_v22  ;;  %v621_v2 = vrot.slane %v619_v59, 1  ;;  %v891_v6 = vrot.slane %v3968_v0, 1  ;;  %v5907_v10 = vld [vmem:[%s5786_s5 + $0x8c] ss:$0 sps:$4 sm:$0x11]   ;;  %v5379_v38 = vld [vmem:[%s5800_s11 + $0x120] sm:$0xff]  }
  0x43   : > { %4287 = vmatprep.subr.bf16.mxu0 %v5335_v24  ;;  %4835 = vmatprep.subr.bf16.mxu1 %v5834_v25  ;;  %v895_v17 = vrot.slane %v5907_v10, 1  ;;  %v399_v19 = vld [vmem:[%s5786_s5 + $0x18] sm:$0xf]  ;;  %v400_v20 = vld [vmem:[%s5786_s5 + $0x1c] sm:$0xf]  ;;  %v5380_v45 = vld [vmem:[%s5800_s11 + $0xe0] sm:$0xff]  }
  0x44   : > { %v622_v9 = vor.u32 %v621_v2, %v617_v58  ;;  %v3928_v23 = vcombine.low %v399_v19, %v400_v20  ;;  %v5372_v24 = vld [vmem:[%s5786_s5 + $0x20] ss:$0 sps:$4 sm:$0x11]   ;;  %v5927_v35 = vld [vmem:[%s5786_s5 + $0x98] ss:$0 sps:$4 sm:$0x11]  }
  0x45   : > { %v5933_v43 = vld [vmem:[%s5786_s5 + $0xa0] sm:$0xf]  ;;  %v898_v47 = vrot.slane %v5927_v35, 1  ;;  %v456_v48 = vld [vmem:[%s5786_s5 + $0x9c] sm:$0xe]  ;;  %v5382_v61 = vld [vmem:[%s5800_s11 + $0xe8] sm:$0xff]  }
  0x46   : > { %4288 = vmatpush3.bf16.msra.mxu0 %v5337_v26  ;;  %4843 = vmatpush3.bf16.msra.mxu1 %v5834_v25  ;;  %v627_v15 = vsel %vm603_vm0, %v622_v9, %v626_v4  ;;  %v5921_v26 = vld [vmem:[%s5786_s5 + $0x94] sm:$0xf]  ;;  %v5941_v50 = vld [vmem:[%s5786_s5 + $0xa4] ss:$0 sps:$4 sm:$0x11]   ;;  %v3971_v51 = vcombine.low %v456_v48, %v5933_v43 }
  0x47   : > { %4289 = vmatprep.subr.bf16.mxu0 %v5338_v27  ;;  %4836 = vmatprep.subr.bf16.mxu1 %v5841_v28  ;;  %v5370_v27 = vld [vmem:[%s5800_s11 + $0xd8] sm:$0xff]   ;;  %v901_v55 = vrot.slane %v5941_v50, 1  ;;  %v401_v58 = vld [vmem:[%s5786_s5 + $0x24] sm:$0xf]  ;;  %v402_v59 = vld [vmem:[%s5786_s5 + $0x28] sm:$0xf] }
  0x48   : > { %v5384_v0 = vld [vmem:[%s5786_s5 + $0x2c] ss:$0 sps:$4 sm:$0x11]   ;;  %v458_v19 = vld [vmem:[%s5786_s5 + $0xb4] sm:$0xe] }
  0x49   : > { %v648_v4 = vshll.u32 %v5384_v0, 16  ;;  %v4001_v0 = vld [vmem:[%s5786_s5 + $0x1c] sm:$0xf] }
  0x4a   : > { %4290 = vmatpush3.bf16.msra.mxu0 %v5340_v29  ;;  %4844 = vmatpush3.bf16.msra.mxu1 %v5841_v28  ;;  %v629_v29 = vshrl.u32 %v3928_v23, 16 }
  0x4b   : > { %4291 = vmatprep.subr.bf16.mxu0 %v5341_v30  ;;  %4837 = vmatprep.subr.bf16.mxu1 %v5848_v31  ;;  %v631_v30 = vshll.u32 %v3928_v23, 16 }
  0x4d   : > { %v633_v41 = vrot.slane %v631_v30, 1 }
  0x4e   : > { %4292 = vmatpush3.bf16.msra.mxu0 %v5343_v33  ;;  %4845 = vmatpush3.bf16.msra.mxu1 %v5848_v31  ;;  %v636_v33 = vshll.u32 %v5372_v24, 16  ;;  %v5394_v24 = vld [vmem:[%s5800_s11 + $0xf8] sm:$0xff]  }
  0x4f   : > { %4293 = vmatprep.subr.bf16.mxu0 %v5344_v34  ;;  %4838 = vmatprep.subr.bf16.mxu1 %v5859_v36  ;;  %v455_v34 = vld [vmem:[%s5786_s5 + $0x90] sm:$0xe]  ;;  %v634_v49 = vor.u32 %v633_v41, %v629_v29  ;;  %v5998_v41 = vld [vmem:[%s5800_s11 + $0x140] sm:$0xff]  }
  0x50   : > { %v638_v42 = vrot.slane %v636_v33, 1 }
  0x52   : > { %4294 = vmatpush3.bf16.msra.mxu0 %v5346_v40  ;;  %4846 = vmatpush3.bf16.msra.mxu1 %v5859_v36  ;;  %v411_v40 = vld [vmem:[%s5786_s5 + $0x60] sm:$0xf] }
  0x53   : > { %4687 = vmatprep.subr.bf16.mxu0 %v5805_v7  ;;  %4415 = vmatprep.subr.bf16.mxu1 %v5355_v46 }
  0x55   : > { %1134 = vmatmul.mubr.bf16.vlgmr.msra.gmra.mrb[0].mxu0 %v5794_v3  ;;  %4720 = vmatmul.mubr.bf16.vlgmr.msra.gmra.mrb[0].mxu1 %v890_v52  ;;  %v892_v3 = vrot.slane %v5895_v63, 1  ;;  %v5381_v52 = vld [vmem:[%s5800_s11 + $0x128] sm:$0xff]  }
  0x56   : > { %4688 = vmatpush3.bf16.msra.mxu0 %v5805_v7  ;;  %4416 = vmatpush3.bf16.msra.mxu1 %v5356_v53  ;;  %v3969_v7 = vcombine.low %v454_v8, %v5901_v5  ;;  %v5966_v8 = vld [vmem:[%s5786_s5 + $0xb0] ss:$0 sps:$4 sm:$0x11]  }
  0x57   : > { %4417 = vmatprep.subr.bf16.mxu1 %v5357_v56  ;;  %4689 = vmatprep.subr.bf16.mxu0 %v5813_v13  ;;  %v893_v12 = vsel %vm860_vm1, %v891_v6, %v892_v3  ;;  %v5950_v56 = vcombine.low %v411_v40, %v5851_v32  ;;  %v5391_v32 = vld [vmem:[%s5800_s11 + $0x130] sm:$0xff]   ;;  %v457_v6 = vld [vmem:[%s5786_s5 + $0xa8] sm:$0xe]  ;;  %v5995_v40 = vld [vmem:[%s5786_s5 + $0x38] ss:$0 sps:$4 sm:$0x11]  }
  0x58   : > { %4723 = vmatprep.mubr.bf16.mxu1 %v893_v12  ;;  %v894_v16 = vrot.slane %v3969_v7, 1  ;;  %1141 = vmatprep.mubr.bf16.mxu0 %v627_v15  ;;  %v5392_v7 = vld [vmem:[%s5800_s11 + $0xf0] sm:$0xff]   ;;  %v650_v15 = vrot.slane %v648_v4, 1  ;;  %v660_v48 = vshll.u32 %v5995_v40, 16 }
  0x59   : > { %v701_v3 = vshrl.u32 %v5950_v56, 16  ;;  %v703_v12 = vshll.u32 %v5950_v56, 16  ;;  %v5402_v4 = vld [vmem:[%s5786_s5 + $0x20] ss:$0 sps:$4 sm:$0x11]  }
  0x5a   : > { %4418 = vmatpush3.bf16.msra.mxu1 %v5358_v62  ;;  %v896_v21 = vsel %vm860_vm1, %v894_v16, %v895_v17  ;;  %4690 = vmatpush3.bf16.msra.mxu0 %v5813_v13  ;;  %v3970_v13 = vcombine.low %v455_v34, %v5921_v26  ;;  %v3929_v62 = vcombine.low %v401_v58, %v402_v59  ;;  %v5974_v16 = vld [vmem:[%s5786_s5 + $0xb8] sm:$0xf]  ;;  %v403_v34 = vld [vmem:[%s5786_s5 + $0x30] sm:$0xf] }
  0x5b   : > { %4419 = vmatprep.subr.bf16.mxu1 %v5367_v1  ;;  %4691 = vmatprep.subr.bf16.mxu0 %v5819_v18  ;;  %v4000_v59 = vld [vmem:[%s5786_s5 + $0x18] sm:$0xf] }
  0x5c   : > { %v897_v46 = vrot.slane %v3970_v13, 1  ;;  %v641_v1 = vshrl.u32 %v3929_v62, 16  ;;  %v643_v2 = vshll.u32 %v3929_v62, 16  ;;  %v5990_v13 = vld [vmem:[%s5786_s5 + $0x34] sm:$0xf] }
  0x5d   : > { %1142 = vmatmul.mubr.bf16.gmra.mrb[4].mxu0 %v3927_v54  ;;  %4724 = vmatmul.mubr.bf16.gmra.mrb[4].mxu1 %v896_v21  ;;  %v900_v54 = vrot.slane %v3971_v51, 1  ;;  %v5979_v21 = vld [vmem:[%s5786_s5 + $0xbc] ss:$0 sps:$4 sm:$0x11]  }
  0x5e   : > { %4420 = vmatpush3.bf16.msra.mxu1 %v5368_v11  ;;  %4692 = vmatpush3.bf16.msra.mxu0 %v5819_v18  ;;  %v899_v53 = vsel %vm860_vm1, %v897_v46, %v898_v47  ;;  %v639_v18 = vsel %vm603_vm0, %v634_v49, %v638_v42  ;;  %v5393_v11 = vld [vmem:[%s5800_s11 + $0x138] sm:$0xff]   ;;  %v907_v33 = vrot.slane %v5979_v21, 1  ;;  %v3998_v42 = vld [vmem:[%s5786_s5 + $0xc] sm:$0xf] }
  0x5f   : > { %4421 = vmatprep.subr.bf16.mxu1 %v5369_v14  ;;  %4693 = vmatprep.subr.bf16.mxu0 %v5827_v22  ;;  %v902_v60 = vsel %vm860_vm1, %v900_v54, %v901_v55  ;;  %v645_v14 = vrot.slane %v643_v2, 1  ;;  %v5398_v51 = vld [vmem:[%s5786_s5 + $0x14] ss:$0 sps:$4 sm:$0x11]   ;;  %v662_v54 = vrot.slane %v660_v48, 1  ;;  %v6021_v2 = vcombine.low %v4000_v59, %v4001_v0 }
  0x60   : > { %4727 = vmatprep.mubr.bf16.mxu1 %v899_v53  ;;  %1149 = vmatprep.mubr.bf16.mxu0 %v639_v18  ;;  %v6008_v53 = vld [vmem:[%s5786_s5 + $0x40] sm:$0xf]  ;;  %v413_v18 = vld [vmem:[%s5786_s5 + $0x6c] sm:$0xf] }
  0x61   : > { %v646_v20 = vor.u32 %v645_v14, %v641_v1 }
  0x62   : > { %4422 = vmatpush3.bf16.msra.mxu1 %v5370_v27  ;;  %4694 = vmatpush3.bf16.msra.mxu0 %v5827_v22  ;;  %v5959_v22 = vld [vmem:[%s5786_s5 + $0xac] sm:$0xf] }
  0x63   : > { %4423 = vmatprep.subr.bf16.mxu1 %v5379_v38  ;;  %4695 = vmatprep.subr.bf16.mxu0 %v5834_v25  ;;  %v3972_v9 = vcombine.low %v457_v6, %v5959_v22  ;;  %v651_v29 = vsel %vm603_vm0, %v646_v20, %v650_v15  ;;  %v3930_v38 = vcombine.low %v403_v34, %v5990_v13 }
  0x65   : > { %1150 = vmatmul.mubr.bf16.gmra.mrb[8].mxu0 %v3928_v23  ;;  %4728 = vmatmul.mubr.bf16.gmra.mrb[8].mxu1 %v902_v60  ;;  %v903_v17 = vrot.slane %v3972_v9, 1  ;;  %v3973_v23 = vcombine.low %v458_v19, %v5974_v16  ;;  %v653_v46 = vshrl.u32 %v3930_v38, 16  ;;  %v655_v47 = vshll.u32 %v3930_v38, 16 }
  0x66   : > { %4424 = vmatpush3.bf16.msra.mxu1 %v5380_v45  ;;  %4696 = vmatpush3.bf16.msra.mxu0 %v5834_v25  ;;  %v904_v25 = vrot.slane %v5966_v8, 1  ;;  %v3999_v45 = vld [vmem:[%s5786_s5 + $0x10] sm:$0xf]  ;;  %v1704_v60 = vshll.u32 %v5398_v51, 16  ;;  %v6032_v19 = vcombine.low %v413_v18, %v5866_v39 }
  0x67   : > { %4425 = vmatprep.subr.bf16.mxu1 %v5381_v52  ;;  %4697 = vmatprep.subr.bf16.mxu0 %v5841_v28  ;;  %v906_v30 = vrot.slane %v3973_v23, 1  ;;  %v4062_v49 = vcombine.low %v3998_v42, %v3999_v45  ;;  %v405_v52 = vld [vmem:[%s5786_s5 + $0x3c] sm:$0xf]  ;;  %v4002_v45 = vld [vmem:[%s5786_s5 + $0x24] sm:$0xf]  ;;  %v5417_v18 = vld [vmem:[%s5800_s11 + $0x150] sm:$0xff]  }
  0x68   : > { %v905_v27 = vsel %vm860_vm1, %v903_v17, %v904_v25  ;;  %1157 = vmatprep.mubr.bf16.mxu0 %v651_v29  ;;  %v1706_v6 = vrot.slane %v1704_v60, 1  ;;  %v1711_v17 = vshll.u32 %v6021_v2, 16  ;;  %v407_v25 = vld [vmem:[%s5786_s5 + $0x48] sm:$0xf] }
  0x69   : > { %4731 = vmatprep.mubr.bf16.mxu1 %v905_v27  ;;  %v1697_v55 = vshrl.u32 %v4062_v49, 16  ;;  %v1699_v58 = vshll.u32 %v4062_v49, 16  ;;  %v6035_v27 = vld [vmem:[%s5786_s5 + $0x4c] sm:$0xf] }
  0x6a   : > { %4426 = vmatpush3.bf16.msra.mxu1 %v5382_v61  ;;  %4698 = vmatpush3.bf16.msra.mxu0 %v5841_v28  ;;  %v908_v28 = vsel %vm860_vm1, %v906_v30, %v907_v33  ;;  %v6014_v61 = vcombine.low %v405_v52, %v6008_v53  ;;  %v5412_v29 = vld [vmem:[%s5800_s11 + $0x148] sm:$0xff]   ;;  %v1713_v33 = vrot.slane %v1711_v17, 1  ;;  %v6040_v34 = vcombine.low %v407_v25, %v6035_v27 }
  0x6b   : > { %4427 = vmatprep.subr.bf16.mxu1 %v5391_v32  ;;  %4699 = vmatprep.subr.bf16.mxu0 %v5848_v31  ;;  %v1701_v1 = vrot.slane %v1699_v58, 1  ;;  %v409_v58 = vld [vmem:[%s5786_s5 + $0x54] sm:$0xf] }
  0x6c   : > { %v665_v9 = vshrl.u32 %v6014_v61, 16  ;;  %v679_v51 = vshll.u32 %v6040_v34, 16 }
  0x6d   : > { %1158 = vmatmul.mubr.bf16.gmra.mrb[12].mxu0 %v3929_v62  ;;  %4732 = vmatmul.mubr.bf16.gmra.mrb[12].mxu1 %v908_v28  ;;  %v6017_v62 = vld [vmem:[%s5786_s5 + $0x44] ss:$0 sps:$4 sm:$0x11]   ;;  %v1702_v15 = vor.u32 %v1701_v1, %v1697_v55  ;;  %v6043_v28 = vld [vmem:[%s5786_s5 + $0x50] ss:$0 sps:$4 sm:$0x11]  }
  0x6e   : > { %4428 = vmatpush3.bf16.msra.mxu1 %v5392_v7  ;;  %4700 = vmatpush3.bf16.msra.mxu0 %v5848_v31  ;;  %v657_v31 = vrot.slane %v655_v47, 1  ;;  %v667_v7 = vshll.u32 %v6014_v61, 16  ;;  %v713_v47 = vshrl.u32 %v6032_v19, 16  ;;  %v684_v52 = vshll.u32 %v6043_v28, 16 }
  0x6f   : > { %4429 = vmatprep.subr.bf16.mxu1 %v5393_v11  ;;  %4701 = vmatprep.subr.bf16.mxu0 %v5859_v36  ;;  %v672_v11 = vshll.u32 %v6017_v62, 16  ;;  %v1707_v30 = vsel %vm603_vm0, %v1702_v15, %v1706_v6  ;;  %v5407_v55 = vld [vmem:[%s5786_s5 + $0x2c] ss:$0 sps:$4 sm:$0x11]   ;;  %v681_v60 = vrot.slane %v679_v51, 1 }
  0x70   : > { %v658_v32 = vor.u32 %v657_v31, %v653_v46  ;;  %v669_v20 = vrot.slane %v667_v7, 1  ;;  %2224 = vmatprep.mubr.bf16.mxu1 %v1707_v30  ;;  %v4003_v46 = vld [vmem:[%s5786_s5 + $0x28] sm:$0xf]  ;;  %v686_v0 = vrot.slane %v684_v52, 1  ;;  %v415_v7 = vld [vmem:[%s5786_s5 + $0x78] sm:$0xf] }
  0x71   : > { %v674_v23 = vrot.slane %v672_v11, 1  ;;  %v4005_v15 = vld [vmem:[%s5786_s5 + $0x34] sm:$0xf] }
  0x72   : > { %4430 = vmatpush3.bf16.msra.mxu1 %v5394_v24  ;;  %4702 = vmatpush3.bf16.msra.mxu0 %v5859_v36  ;;  %v663_v14 = vsel %vm603_vm0, %v658_v32, %v662_v54  ;;  %v1709_v36 = vshrl.u32 %v6021_v2, 16  ;;  %v1716_v24 = vshll.u32 %v5402_v4, 16  ;;  %v670_v39 = vor.u32 %v669_v20, %v665_v9  ;;  %v6061_v32 = vld [vmem:[%s5786_s5 + $0x58] sm:$0xf] }
  0x73   : > { %4735 = vmatprep.subr.bf16.mxu1 %v5998_v41  ;;  %1165 = vmatprep.mubr.bf16.mxu0 %v663_v14  ;;  %v6054_v54 = vcombine.low %v4002_v45, %v4003_v46  ;;  %v1728_v4 = vshll.u32 %v5407_v55, 16  ;;  %v6066_v6 = vcombine.low %v409_v58, %v6061_v32  ;;  %v6069_v9 = vld [vmem:[%s5786_s5 + $0x5c] ss:$0 sps:$4 sm:$0x11]   ;;  %v4004_v14 = vld [vmem:[%s5786_s5 + $0x30] sm:$0xf] }
  0x74   : > { %v1718_v42 = vrot.slane %v1716_v24, 1  ;;  %v1714_v48 = vor.u32 %v1713_v33, %v1709_v36  ;;  %v675_v31 = vsel %vm603_vm0, %v670_v39, %v674_v23  ;;  %v417_v23 = vld [vmem:[%s5786_s5 + $0x84] sm:$0xf]  ;;  %v696_v30 = vshll.u32 %v6069_v9, 16  ;;  %v4006_v46 = vld [vmem:[%s5786_s5 + $0x3c] sm:$0xf] }
  0x75   : > { %1166 = vmatmul.mubr.bf16.gmra.mrb[16].mxu0 %v3930_v38  ;;  %2225 = vmatmul.mubr.bf16.vlgmr.msra.gmra.mrb[16].mxu1 %v4062_v49  ;;  %v677_v38 = vshrl.u32 %v6040_v34, 16  ;;  %v715_v49 = vshll.u32 %v6032_v19, 16  ;;  %v1723_v1 = vshll.u32 %v6054_v54, 16  ;;  %v1730_v17 = vrot.slane %v1728_v4, 1  ;;  %v6106_v4 = vld [vmem:[%s5786_s5 + $0x4c] sm:$0xf] }
  0x76   : > { %4736 = vmatpush3.bf16.msra.mxu1 %v5998_v41  ;;  %1173 = vmatprep.mubr.bf16.mxu0 %v675_v31  ;;  %v1719_v59 = vsel %vm603_vm0, %v1714_v48, %v1718_v42  ;;  %v1721_v41 = vshrl.u32 %v6054_v54, 16  ;;  %v689_v25 = vshrl.u32 %v6066_v6, 16  ;;  %v691_v20 = vshll.u32 %v6066_v6, 16  ;;  %v5411_v39 = vld [vmem:[%s5786_s5 + $0x38] ss:$0 sps:$4 sm:$0x11]  }
  0x77   : > { %4737 = vmatprep.subr.bf16.mxu1 %v5412_v29  ;;  %2232 = vmatprep.mubr.bf16.mxu1 %v1719_v59  ;;  %v682_v11 = vor.u32 %v681_v60, %v677_v38  ;;  %v1725_v36 = vrot.slane %v1723_v1, 1  ;;  %v6080_v33 = vcombine.low %v4004_v14, %v4005_v15  ;;  %v6085_v48 = vld [vmem:[%s5786_s5 + $0x40] sm:$0xf]  ;;  %v1740_v52 = vshll.u32 %v5411_v39, 16  ;;  %v5422_v60 = vld [vmem:[%s5800_s11 + $0x158] sm:$0xff]  }
  0x78   : > { %v693_v45 = vrot.slane %v691_v20, 1  ;;  %v6091_v31 = vcombine.low %v415_v7, %v5889_v57  ;;  %v6095_v59 = vcombine.low %v4006_v46, %v6085_v48  ;;  %v720_v57 = vshll.u32 %v5872_v44, 16  ;;  %v5427_v15 = vld [vmem:[%s5800_s11 + $0x160] sm:$0xff]   ;;  %v419_v20 = vld [vmem:[%s5786_s5 + $0x90] sm:$0xf] }
  0x79   : > { %v687_v24 = vsel %vm603_vm0, %v682_v11, %v686_v0  ;;  %v1726_v42 = vor.u32 %v1725_v36, %v1721_v41  ;;  %v1733_v38 = vshrl.u32 %v6080_v33, 16  ;;  %v1735_v51 = vshll.u32 %v6080_v33, 16 }
  0x7a   : > { %4738 = vmatpush3.bf16.msra.mxu1 %v5412_v29  ;;  %v717_v29 = vrot.slane %v715_v49, 1  ;;  %v694_v58 = vor.u32 %v693_v45, %v689_v25  ;;  %v6098_v49 = vld [vmem:[%s5786_s5 + $0x44] ss:$0 sps:$4 sm:$0x11]   ;;  %v1742_v41 = vrot.slane %v1740_v52, 1  ;;  %v6109_v7 = vcombine.low %v417_v23, %v5901_v5 }
  0x7b   : > { %4739 = vmatprep.subr.bf16.mxu1 %v5417_v18  ;;  %v1731_v55 = vsel %vm603_vm0, %v1726_v42, %v1730_v17  ;;  %v1737_v0 = vrot.slane %v1735_v51, 1  ;;  %v705_v11 = vrot.slane %v703_v12, 1  ;;  %v1747_v14 = vshll.u32 %v6095_v59, 16  ;;  %v421_v42 = vld [vmem:[%s5786_s5 + $0x9c] sm:$0xf] }
  0x7c   : > { %v718_v1 = vor.u32 %v717_v29, %v713_v47  ;;  %v722_v44 = vrot.slane %v720_v57, 1  ;;  %v725_v17 = vshrl.u32 %v6091_v31, 16  ;;  %v1745_v25 = vshrl.u32 %v6095_v59, 16 }
  0x7d   : > { %1174 = vmatmul.mubr.bf16.gmra.mrb[20].mxu0 %v6014_v61  ;;  %2233 = vmatmul.mubr.bf16.gmra.mrb[20].mxu1 %v6021_v2  ;;  %v698_v61 = vrot.slane %v696_v30, 1  ;;  %v4008_v2 = vld [vmem:[%s5786_s5 + $0x48] sm:$0xf]  ;;  %v1738_v47 = vor.u32 %v1737_v0, %v1733_v38  ;;  %v727_v12 = vshll.u32 %v6091_v31, 16  ;;  %v1752_v30 = vshll.u32 %v6098_v49, 16 }
  0x7e   : > { %1181 = vmatprep.mubr.bf16.mxu0 %v687_v24  ;;  %4740 = vmatpush3.bf16.msra.mxu1 %v5417_v18  ;;  %v708_v18 = vshll.u32 %v5862_v37, 16  ;;  %v6120_v5 = vcombine.low %v4008_v2, %v6106_v4  ;;  %v732_v37 = vshll.u32 %v5895_v63, 16  ;;  %v1749_v24 = vrot.slane %v1747_v14, 1  ;;  %v5432_v63 = vld [vmem:[%s5800_s11 + $0x168] sm:$0xff]   ;;  %v6148_v0 = vld [vmem:[%s5786_s5 + $0x58] sm:$0xf] }
  0x7f   : > { %2240 = vmatprep.mubr.bf16.mxu1 %v1731_v55  ;;  %4741 = vmatprep.subr.bf16.mxu1 %v5422_v60  ;;  %v699_v36 = vsel %vm603_vm0, %v694_v58, %v698_v61  ;;  %v1743_v23 = vsel %vm603_vm0, %v1738_v47, %v1742_v41  ;;  %v6129_v39 = vsel %vm603_vm0, %v718_v1, %v722_v44  ;;  %v729_v45 = vrot.slane %v727_v12, 1  ;;  %v6137_v61 = vld [vmem:[%s5786_s5 + $0x50] ss:$0 sps:$4 sm:$0x11]   ;;  %v4010_v55 = vld [vmem:[%s5786_s5 + $0x54] sm:$0xf] }
  0x80   : > { %v734_v46 = vrot.slane %v732_v37, 1  ;;  %v710_v29 = vrot.slane %v708_v18, 1  ;;  %v739_v38 = vshll.u32 %v6109_v7, 16  ;;  %v1759_v51 = vshll.u32 %v6120_v5, 16  ;;  %v5437_v41 = vld [vmem:[%s5800_s11 + $0x1c0] sm:$0xff]  }
  0x81   : > { %v730_v52 = vor.u32 %v729_v45, %v725_v17  ;;  %v737_v58 = vshrl.u32 %v6109_v7, 16  ;;  %v744_v2 = vshll.u32 %v5907_v10, 16  ;;  %v6155_v18 = vcombine.low %v421_v42, %v5933_v43  ;;  %4551 = vmatprep.subr.bf16.mxu0 %v5437_v41  ;;  %v423_v44 = vld [vmem:[%s5786_s5 + $0xa8] sm:$0xf] }
  0x82   : > { %4742 = vmatpush3.bf16.msra.mxu1 %v5422_v60  ;;  %v1754_v60 = vrot.slane %v1752_v30, 1  ;;  %v741_v57 = vrot.slane %v739_v38, 1  ;;  %v1761_v14 = vrot.slane %v1759_v51, 1  ;;  %v756_v12 = vshll.u32 %v5927_v35, 16 }
  0x83   : > { %4743 = vmatprep.subr.bf16.mxu1 %v5427_v15  ;;  %v6152_v1 = vsel %vm603_vm0, %v730_v52, %v734_v46  ;;  %v6170_v37 = vld [vmem:[%s5786_s5 + $0x5c] ss:$0 sps:$4 sm:$0x11]   ;;  %v6179_v42 = vcombine.low %v423_v44, %v5959_v22  ;;  %v6183_v46 = vld [vmem:[%s5786_s5 + $0x64] sm:$0xf]  ;;  %v761_v35 = vshrl.u32 %v6155_v18, 16 }
  0x84   : > { %v742_v47 = vor.u32 %v741_v57, %v737_v58  ;;  %v758_v30 = vrot.slane %v756_v12, 1  ;;  %v792_v44 = vshll.u32 %v5979_v21, 16  ;;  %v6219_v12 = vld [vmem:[%s5786_s5 + $0x70] sm:$0xf] }
  0x85   : > { %1182 = vmatmul.mubr.bf16.gmra.mrb[24].mxu0 %v6040_v34  ;;  %2241 = vmatmul.mubr.bf16.gmra.mrb[24].mxu1 %v6054_v54  ;;  %v706_v34 = vor.u32 %v705_v11, %v701_v3  ;;  %v6145_v54 = vcombine.low %v419_v20, %v5921_v26  ;;  %v1750_v3 = vor.u32 %v1749_v24, %v1745_v25  ;;  %v746_v11 = vrot.slane %v744_v2, 1  ;;  %v4012_v24 = vld [vmem:[%s5786_s5 + $0x60] sm:$0xf] }
  0x86   : > { %1189 = vmatprep.mubr.bf16.mxu0 %v699_v36  ;;  %2248 = vmatprep.mubr.bf16.mxu1 %v1743_v23  ;;  %v1757_v26 = vshrl.u32 %v6120_v5, 16  ;;  %v6161_v36 = vcombine.low %v4010_v55, %v6148_v0  ;;  %v425_v23 = vld [vmem:[%s5786_s5 + $0xb4] sm:$0xf]  ;;  %v775_v57 = vshll.u32 %v6179_v42, 16 }
  0x87   : > { %4744 = vmatpush3.bf16.msra.mxu1 %v5427_v15  ;;  %v711_v10 = vsel %vm603_vm0, %v706_v34, %v710_v29  ;;  %v1764_v15 = vshll.u32 %v6137_v61, 16  ;;  %v1755_v43 = vsel %vm603_vm0, %v1750_v3, %v1754_v60  ;;  %v749_v17 = vshrl.u32 %v6145_v54, 16 }
  0x88   : > { %4745 = vmatprep.subr.bf16.mxu1 %v5432_v63  ;;  %v751_v25 = vshll.u32 %v6145_v54, 16  ;;  %v6173_v20 = vsel %vm603_vm0, %v742_v47, %v746_v11  ;;  %v1771_v45 = vshll.u32 %v6161_v36, 16  ;;  %v1762_v34 = vor.u32 %v1761_v14, %v1757_v26 }
  0x89   : > { %v1766_v29 = vrot.slane %v1764_v15, 1  ;;  %v6189_v52 = vcombine.low %v425_v23, %v5974_v16  ;;  %v1769_v22 = vshrl.u32 %v6161_v36, 16  ;;  %v1776_v3 = vshll.u32 %v6170_v37, 16  ;;  %v6211_v15 = vld [vmem:[%s5786_s5 + $0x68] ss:$0 sps:$4 sm:$0x11]  }
  0x8a   : > { %v1773_v2 = vrot.slane %v1771_v45, 1  ;;  %v6197_v60 = vcombine.low %v4012_v24, %v6183_v46  ;;  %v773_v16 = vshrl.u32 %v6179_v42, 16  ;;  %v780_v11 = vshll.u32 %v5966_v8, 16 }
  0x8b   : > { %4746 = vmatpush3.bf16.msra.mxu1 %v5432_v63  ;;  %v763_v63 = vshll.u32 %v6155_v18, 16  ;;  %v777_v14 = vrot.slane %v775_v57, 1  ;;  %v785_v47 = vshrl.u32 %v6189_v52, 16  ;;  %v787_v8 = vshll.u32 %v6189_v52, 16 }
  0x8c   : > { %v794_v24 = vrot.slane %v792_v44, 1 }
  0x8d   : > { %1190 = vmatmul.mubr.bf16.gmra.mrb[28].mxu0 %v6066_v6  ;;  %2249 = vmatmul.mubr.bf16.gmra.mrb[28].mxu1 %v6080_v33  ;;  %v753_v6 = vrot.slane %v751_v25, 1  ;;  %v768_v33 = vshll.u32 %v5941_v50, 16  ;;  %v765_v51 = vrot.slane %v763_v63, 1  ;;  %v1767_v50 = vsel %vm603_vm0, %v1762_v34, %v1766_v29  ;;  %v4014_v25 = vld [vmem:[%s5786_s5 + $0x6c] sm:$0xf] }
  0x8e   : > { %1197 = vmatprep.mubr.bf16.mxu0 %v711_v10  ;;  %2256 = vmatprep.mubr.bf16.mxu1 %v1755_v43  ;;  %v5447_v10 = vld [vmem:[%s5800_s11 + $0x170] sm:$0xff]   ;;  %v1778_v43 = vrot.slane %v1776_v3, 1  ;;  %v789_v23 = vrot.slane %v787_v8, 1  ;;  %v1788_v63 = vshll.u32 %v6211_v15, 16  ;;  %v6229_v34 = vcombine.low %v4014_v25, %v6219_v12 }
  0x8f   : > { %v754_v38 = vor.u32 %v753_v6, %v749_v17  ;;  %v770_v58 = vrot.slane %v768_v33, 1  ;;  %v766_v41 = vor.u32 %v765_v51, %v761_v35  ;;  %4747 = vmatprep.subr.bf16.mxu1 %v5447_v10  ;;  %v1783_v17 = vshll.u32 %v6197_v60, 16  ;;  %v6233_v29 = vld [vmem:[%s5786_s5 + $0x74] ss:$0 sps:$4 sm:$0x11]  }
  0x90   : > { %4748 = vmatpush3.bf16.msra.mxu1 %v5447_v10  ;;  %v790_v21 = vor.u32 %v789_v23, %v785_v47  ;;  %v4016_v33 = vld [vmem:[%s5786_s5 + $0x78] sm:$0xf]  ;;  %v1793_v3 = vshrl.u32 %v6229_v34, 16  ;;  %v877_v25 = vrot.slane %v6017_v62, 1  ;;  %v4020_v23 = vld [vmem:[%s5786_s5 + $0x90] sm:$0xf] }
  0x91   : > { %v6193_v55 = vsel %vm603_vm0, %v754_v38, %v758_v30  ;;  %v6207_v26 = vsel %vm603_vm0, %v766_v41, %v770_v58  ;;  %v1781_v30 = vshrl.u32 %v6197_v60, 16  ;;  %v1785_v35 = vrot.slane %v1783_v17, 1 }
  0x92   : > { %v6236_v38 = vsel %vm603_vm0, %v790_v21, %v794_v24  ;;  %v1795_v58 = vshll.u32 %v6229_v34, 16 }
  0x93   : > { %v1786_v51 = vor.u32 %v1785_v35, %v1781_v30  ;;  %v449_v30 = vld [vmem:[%s5786_s5 + $0x48] sm:$0xe]  ;;  %v450_v35 = vld [vmem:[%s5786_s5 + $0x54] sm:$0xe] }
  0x94   : > { %v1797_v41 = vrot.slane %v1795_v58, 1 }
  0x95   : > { %1198 = vmatmul.mubr.bf16.gmra.mrb[32].mxu0 %v5950_v56  ;;  %2257 = vmatmul.mubr.bf16.gmra.mrb[32].mxu1 %v6095_v59  ;;  %v782_v56 = vrot.slane %v780_v11, 1  ;;  %v778_v59 = vor.u32 %v777_v14, %v773_v16  ;;  %v4018_v11 = vld [vmem:[%s5786_s5 + $0x84] sm:$0xf]  ;;  %v447_v14 = vld [vmem:[%s5786_s5 + $0x30] sm:$0xe] }
  0x96   : > { %1205 = vmatprep.mubr.bf16.mxu0 %v6129_v39  ;;  %2264 = vmatprep.mubr.bf16.mxu1 %v1767_v50  ;;  %v1774_v39 = vor.u32 %v1773_v2, %v1769_v22  ;;  %v1790_v22 = vrot.slane %v1788_v63, 1  ;;  %v6252_v50 = vld [vmem:[%s5786_s5 + $0x80] ss:$0 sps:$4 sm:$0x11]   ;;  %v1798_v10 = vor.u32 %v1797_v41, %v1793_v3  ;;  %v3962_v8 = vcombine.low %v447_v14, %v5990_v13 }
  0x97   : > { %v6222_v6 = vsel %vm603_vm0, %v778_v59, %v782_v56  ;;  %v1812_v47 = vshll.u32 %v6252_v50, 16  ;;  %v6275_v13 = vld [vmem:[%s5786_s5 + $0x8c] ss:$0 sps:$4 sm:$0x11]  }
  0x98   : > { %v1779_v45 = vsel %vm603_vm0, %v1774_v39, %v1778_v43  ;;  %v873_v17 = vrot.slane %v3962_v8, 1  ;;  %v1824_v58 = vshll.u32 %v6275_v13, 16 }
  0x9d   : > { %1206 = vmatmul.mubr.bf16.gmra.mrb[36].mxu0 %v6032_v19  ;;  %2265 = vmatmul.mubr.bf16.gmra.mrb[36].mxu1 %v6120_v5  ;;  %v6241_v19 = vld [vmem:[%s5786_s5 + $0x7c] sm:$0xf]  ;;  %v1791_v5 = vsel %vm603_vm0, %v1786_v51, %v1790_v22  ;;  %v883_v51 = vrot.slane %v6069_v9, 1 }
  0x9e   : > { %1213 = vmatprep.mubr.bf16.mxu0 %v6152_v1  ;;  %2272 = vmatprep.mubr.bf16.mxu1 %v1779_v45  ;;  %v1800_v1 = vshll.u32 %v6233_v29, 16  ;;  %v6246_v2 = vcombine.low %v4016_v33, %v6241_v19  ;;  %v3964_v45 = vcombine.low %v449_v30, %v6035_v27  ;;  %v3965_v33 = vcombine.low %v450_v35, %v6061_v32  ;;  %v5464_v27 = vld [vmem:[%s5800_s11 + $0x178] sm:$0xff]   ;;  %v5540_v30 = vld [vmem:[%s5786_s5 + $0x8] ss:$0 sps:$4 sm:$0x11]  }
  0x9f   : > { %4749 = vmatprep.subr.bf16.mxu1 %v5464_v27 }
  0xa0   : > { %v1802_v16 = vrot.slane %v1800_v1, 1  ;;  %v1807_v57 = vshll.u32 %v6246_v2, 16  ;;  %v1805_v56 = vshrl.u32 %v6246_v2, 16  ;;  %v879_v63 = vrot.slane %v3964_v45, 1  ;;  %4750 = vmatpush3.bf16.msra.mxu1 %v5464_v27  ;;  %v4051_v45 = vld [vmem:[%s5786_s5 + $0x48] sm:$0xe] }
  0xa1   : > { %v882_v9 = vrot.slane %v3965_v33, 1  ;;  %v4099_v35 = vcombine.low %v4051_v45, %v6106_v4  ;;  %v444_v33 = vld [vmem:[%s5786_s5 + $0xc] sm:$0xe] }
  0xa2   : > { %v1803_v39 = vsel %vm603_vm0, %v1798_v10, %v1802_v16  ;;  %v1809_v43 = vrot.slane %v1807_v57, 1  ;;  %v1826_v57 = vrot.slane %v1824_v58, 1  ;;  %v443_v10 = vld [vmem:[%s5786_s5] sm:$0xe]  ;;  %v4052_v58 = vld [vmem:[%s5786_s5 + $0x54] sm:$0xe] }
  0xa3   : > { %v6310_v3 = vsel %vm860_vm1, %v882_v9, %v883_v51  ;;  %v1967_v4 = vrot.slane %v4099_v35, 1  ;;  %v1971_v9 = vrot.slane %v6170_v37, 1  ;;  %v446_v35 = vld [vmem:[%s5786_s5 + $0x24] sm:$0xe] }
  0xa4   : > { %v1810_v21 = vor.u32 %v1809_v43, %v1805_v56  ;;  %v6335_v43 = vld [vmem:[%s5800_s11 + $0x200] sm:$0xff]  }
  0xa5   : > { %1214 = vmatmul.mubr.bf16.gmra.mrb[40].mxu0 %v6091_v31  ;;  %2273 = vmatmul.mubr.bf16.gmra.mrb[40].mxu1 %v6161_v36  ;;  %v6259_v31 = vld [vmem:[%s5786_s5 + $0x88] sm:$0xf]  ;;  %v448_v36 = vld [vmem:[%s5786_s5 + $0x3c] sm:$0xe] }
  0xa6   : > { %1221 = vmatprep.mubr.bf16.mxu0 %v6173_v20  ;;  %2280 = vmatprep.mubr.bf16.mxu1 %v1791_v5  ;;  %v874_v20 = vrot.slane %v5995_v40, 1  ;;  %v6267_v44 = vcombine.low %v4018_v11, %v6259_v31  ;;  %v3963_v40 = vcombine.low %v448_v36, %v6008_v53  ;;  %v880_v53 = vrot.slane %v6043_v28, 1  ;;  %v4022_v11 = vld [vmem:[%s5786_s5 + $0x9c] sm:$0xf] }
  0xa7   : > { %4783 = vmatprep.subr.bf16.mxu1 %v6335_v43 }
  0xa8   : > { %v6280_v59 = vsel %vm860_vm1, %v873_v17, %v874_v20  ;;  %v876_v24 = vrot.slane %v3963_v40, 1  ;;  %v1819_v62 = vshll.u32 %v6267_v44, 16  ;;  %v1817_v22 = vshrl.u32 %v6267_v44, 16  ;;  %v5539_v20 = vld [vmem:[%s5786_s5 + $0x4] sm:$0xf] }
  0xa9   : > { %v6305_v32 = vsel %vm860_vm1, %v879_v63, %v880_v53  ;;  %v3958_v36 = vcombine.low %v443_v10, %v5539_v20  ;;  %v4050_v17 = vld [vmem:[%s5786_s5 + $0x3c] sm:$0xe]  ;;  %v4024_v40 = vld [vmem:[%s5786_s5 + $0xa8] sm:$0xf] }
  0xaa   : > { %v1821_v5 = vrot.slane %v1819_v62, 1 }
  0xac   : > { %v1822_v16 = vor.u32 %v1821_v5, %v1817_v22  ;;  %v1968_v22 = vrot.slane %v6137_v61, 1  ;;  %v4100_v5 = vcombine.low %v4052_v58, %v6148_v0  ;;  %v5541_v61 = vld [vmem:[%s5786_s5 + $0x10] sm:$0xf]  ;;  %v4053_v0 = vld [vmem:[%s5786_s5 + $0x60] sm:$0xe] }
  0xad   : > { %1222 = vmatmul.mubr.bf16.gmra.mrb[44].mxu0 %v6109_v7  ;;  %2281 = vmatmul.mubr.bf16.gmra.mrb[44].mxu1 %v6197_v60  ;;  %v1814_v7 = vrot.slane %v1812_v47, 1  ;;  %v6291_v60 = vsel %vm860_vm1, %v876_v24, %v877_v25  ;;  %v861_v24 = vrot.slane %v3958_v36, 1  ;;  %v5543_v36 = vld [vmem:[%s5786_s5 + $0x1c] sm:$0xf] }
  0xae   : > { %1229 = vmatprep.mubr.bf16.mxu0 %v6193_v55  ;;  %2288 = vmatprep.mubr.bf16.mxu1 %v1803_v39  ;;  %v6286_v55 = vld [vmem:[%s5786_s5 + $0x94] sm:$0xf]  ;;  %v1827_v47 = vsel %vm603_vm0, %v1822_v16, %v1826_v57  ;;  %v6332_v39 = vld [vmem:[%s5786_s5 + $0xa4] ss:$0 sps:$4 sm:$0x11]   ;;  %v3959_v57 = vcombine.low %v444_v33, %v5541_v61  ;;  %v6374_v10 = vsel %vm860_vm1, %v1967_v4, %v1968_v22  ;;  %v1980_v33 = vrot.slane %v6252_v50, 1 }
  0xaf   : > { %v6299_v1 = vcombine.low %v4020_v23, %v6286_v55  ;;  %v1815_v28 = vsel %vm603_vm0, %v1810_v21, %v1814_v7  ;;  %v4098_v7 = vcombine.low %v4050_v17, %v6085_v48  ;;  %v6342_v23 = vld [vmem:[%s5786_s5 + $0xac] sm:$0xf]  ;;  %v862_v21 = vrot.slane %v5540_v30, 1  ;;  %v4026_v16 = vld [vmem:[%s5786_s5 + $0xb4] sm:$0xf] }
  0xb0   : > { %v1848_v48 = vshll.u32 %v6332_v39, 16  ;;  %v6407_v58 = vld [vmem:[%s5786_s5 + $0xbc] ss:$0 sps:$4 sm:$0x11]   ;;  %v4056_v4 = vld [vmem:[%s5786_s5 + $0x84] sm:$0xe] }
  0xb1   : > { %v1831_v41 = vshll.u32 %v6299_v1, 16  ;;  %v1964_v62 = vrot.slane %v4098_v7, 1  ;;  %v863_v37 = vsel %vm860_vm1, %v861_v24, %v862_v21  ;;  %v5544_v24 = vld [vmem:[%s5786_s5 + $0x20] ss:$0 sps:$4 sm:$0x11]  }
  0xb2   : > { %v1850_v20 = vrot.slane %v1848_v48, 1  ;;  %v4055_v48 = vld [vmem:[%s5786_s5 + $0x78] sm:$0xe]  ;;  %v4057_v61 = vld [vmem:[%s5786_s5 + $0x90] sm:$0xe] }
  0xb3   : > { %v1833_v14 = vrot.slane %v1831_v41, 1  ;;  %v445_v41 = vld [vmem:[%s5786_s5 + $0x18] sm:$0xe] }
  0xb4   : > { %v3960_v17 = vcombine.low %v445_v41, %v5543_v36  ;;  %v4028_v41 = vld [vmem:[%s5786_s5 + $0xc0] sm:$0xf] }
  0xb5   : > { %1230 = vmatmul.mubr.bf16.gmra.mrb[48].mxu0 %v6145_v54  ;;  %2289 = vmatmul.mubr.bf16.gmra.mrb[48].mxu1 %v6229_v34  ;;  %v6313_v54 = vld [vmem:[%s5786_s5 + $0x98] ss:$0 sps:$4 sm:$0x11]   ;;  %v1829_v34 = vshrl.u32 %v6299_v1, 16 }
  0xb6   : > { %1237 = vmatprep.mubr.bf16.mxu0 %v6207_v26  ;;  %2296 = vmatprep.mubr.bf16.mxu1 %v1815_v28  ;;  %v6318_v26 = vld [vmem:[%s5786_s5 + $0xa0] sm:$0xf]  ;;  %v1836_v56 = vshll.u32 %v6313_v54, 16  ;;  %v6363_v28 = vld [vmem:[%s5786_s5 + $0xb0] ss:$0 sps:$4 sm:$0x11]  }
  0xb7   : > { %v6326_v8 = vcombine.low %v4022_v11, %v6318_v26 }
  0xb8   : > { %v1838_v25 = vrot.slane %v1836_v56, 1  ;;  %v1974_v56 = vrot.slane %v6211_v15, 1  ;;  %v868_v15 = vrot.slane %v5544_v24, 1  ;;  %v1992_v24 = vrot.slane %v6363_v28, 1 }
  0xb9   : > { %v1841_v53 = vshrl.u32 %v6326_v8, 16 }
  0xbd   : > { %1238 = vmatmul.mubr.bf16.gmra.mrb[52].mxu0 %v6155_v18  ;;  %2297 = vmatmul.mubr.bf16.gmra.mrb[52].mxu1 %v6246_v2  ;;  %v1834_v18 = vor.u32 %v1833_v14, %v1829_v34  ;;  %v1965_v2 = vrot.slane %v6098_v49, 1  ;;  %v6354_v49 = vcombine.low %v4024_v40, %v6342_v23  ;;  %v1970_v34 = vrot.slane %v4100_v5, 1  ;;  %v6380_v14 = vld [vmem:[%s5786_s5 + $0xb8] sm:$0xf] }
  0xbe   : > { %1245 = vmatprep.mubr.bf16.mxu0 %v6222_v6  ;;  %2304 = vmatprep.mubr.bf16.mxu1 %v1827_v47  ;;  %v1843_v6 = vshll.u32 %v6326_v8, 16  ;;  %v1860_v40 = vshll.u32 %v6363_v28, 16  ;;  %v6395_v21 = vcombine.low %v4026_v16, %v6380_v14  ;;  %v6419_v16 = vld [vmem:[%s5786_s5 + $0xc4] sm:$0xf] }
  0xbf   : > { %v1839_v63 = vsel %vm603_vm0, %v1834_v18, %v1838_v25  ;;  %v6357_v51 = vsel %vm860_vm1, %v1964_v62, %v1965_v2  ;;  %v6386_v18 = vsel %vm860_vm1, %v1970_v34, %v1971_v9  ;;  %v4054_v25 = vld [vmem:[%s5786_s5 + $0x6c] sm:$0xe]  ;;  %v1977_v2 = vrot.slane %v6233_v29, 1 }
  0xc0   : > { %v1845_v27 = vrot.slane %v1843_v6, 1  ;;  %v4102_v6 = vcombine.low %v4054_v25, %v6219_v12  ;;  %v1853_v30 = vshrl.u32 %v6354_v49, 16  ;;  %v867_v29 = vrot.slane %v3960_v17, 1 }
  0xc1   : > { %v1862_v22 = vrot.slane %v1860_v40, 1  ;;  %v1983_v9 = vrot.slane %v6275_v13, 1  ;;  %v1986_v34 = vrot.slane %v6313_v54, 1  ;;  %v5438_v13 = vld [vmem:[%s5800_s11 + $0x180] sm:$0xff]   ;;  %v1872_v25 = vshll.u32 %v6407_v58, 16 }
  0xc2   : > { %v1846_v47 = vor.u32 %v1845_v27, %v1841_v53  ;;  %v1976_v53 = vrot.slane %v4102_v6, 1  ;;  %v6442_v40 = vcombine.low %v4028_v41, %v6419_v16  ;;  %v4059_v6 = vld [vmem:[%s5786_s5 + $0xa8] sm:$0xe] }
  0xc4   : > { %v1851_v12 = vsel %vm603_vm0, %v1846_v47, %v1850_v20  ;;  %v6410_v27 = vsel %vm860_vm1, %v1976_v53, %v1977_v2  ;;  %v5439_v47 = vld [vmem:[%s5800_s11 + $0x1c8] sm:$0xff]   ;;  %v4060_v53 = vld [vmem:[%s5786_s5 + $0xb4] sm:$0xe] }
  0xc5   : > { %1246 = vmatmul.mubr.bf16.gmra.mrb[56].mxu0 %v6179_v42  ;;  %2305 = vmatmul.mubr.bf16.gmra.mrb[56].mxu1 %v6267_v44  ;;  %v5542_v42 = vld [vmem:[%s5786_s5 + $0x14] ss:$0 sps:$4 sm:$0x11]   ;;  %v4101_v44 = vcombine.low %v4053_v0, %v6183_v46  ;;  %v864_v46 = vrot.slane %v3959_v57, 1  ;;  %v869_v0 = vsel %vm860_vm1, %v867_v29, %v868_v15  ;;  %v5440_v2 = vld [vmem:[%s5800_s11 + $0x188] sm:$0xff]   ;;  %v4108_v28 = vcombine.low %v4060_v53, %v6380_v14 }
  0xc6   : > { %1253 = vmatprep.mubr.bf16.mxu0 %v6236_v38  ;;  %v865_v11 = vrot.slane %v5542_v42, 1  ;;  %2312 = vmatprep.mubr.bf16.mxu1 %v1839_v63  ;;  %v1855_v38 = vshll.u32 %v6354_v49, 16  ;;  %v4103_v63 = vcombine.low %v4055_v48, %v6241_v19  ;;  %v4104_v19 = vcombine.low %v4056_v4, %v6259_v31  ;;  %v5445_v48 = vld [vmem:[%s5800_s11 + $0x1d0] sm:$0xff]   ;;  %v4135_v29 = vld [vmem:[%s5786_s5 + $0x1c] sm:$0xf] }
  0xc7   : > { %v1973_v7 = vrot.slane %v4101_v44, 1  ;;  %v4105_v42 = vcombine.low %v4057_v61, %v6286_v55  ;;  %v1865_v44 = vshrl.u32 %v6395_v21, 16  ;;  %v4061_v4 = vld [vmem:[%s5786_s5 + $0xc0] sm:$0xe]  ;;  %v5446_v14 = vld [vmem:[%s5800_s11 + $0x190] sm:$0xff]   ;;  %v5448_v61 = vld [vmem:[%s5800_s11 + $0x1d8] sm:$0xff]  }
  0xc8   : > { %v1857_v62 = vrot.slane %v1855_v38, 1  ;;  %v1979_v5 = vrot.slane %v4103_v63, 1  ;;  %v866_v31 = vsel %vm860_vm1, %v864_v46, %v865_v11  ;;  %v1989_v11 = vrot.slane %v6332_v39, 1 }
  0xc9   : > { %v6398_v45 = vsel %vm860_vm1, %v1973_v7, %v1974_v56  ;;  %v4058_v56 = vld [vmem:[%s5786_s5 + $0x9c] sm:$0xe]  ;;  %v1985_v55 = vrot.slane %v4105_v42, 1  ;;  %v5460_v7 = vld [vmem:[%s5786_s5 + $0xc8] ss:$0 sps:$4 sm:$0x11]   ;;  %v4107_v46 = vcombine.low %v4059_v6, %v6342_v23 }
  0xca   : > { %v1858_v50 = vor.u32 %v1857_v62, %v1853_v30  ;;  %v6423_v57 = vsel %vm860_vm1, %v1979_v5, %v1980_v33  ;;  %v4106_v54 = vcombine.low %v4058_v56, %v6318_v26  ;;  %v5546_v30 = vld [vmem:[%s5786_s5 + $0x2c] ss:$0 sps:$4 sm:$0x11]   ;;  %v1874_v33 = vrot.slane %v1872_v25, 1  ;;  %v4137_v25 = vld [vmem:[%s5786_s5 + $0x28] sm:$0xf] }
  0xcb   : > { %v6448_v26 = vsel %vm860_vm1, %v1985_v55, %v1986_v34  ;;  %v871_v62 = vrot.slane %v5546_v30, 1  ;;  %v1991_v23 = vrot.slane %v4107_v46, 1  ;;  %v1994_v5 = vrot.slane %v4108_v28, 1  ;;  %v6490_v55 = vld [vmem:[%s5786_s5 + $0x2c] ss:$0 sps:$4 sm:$0x11]  }
  0xcc   : > { %v1863_v36 = vsel %vm603_vm0, %v1858_v50, %v1862_v22  ;;  %v1988_v39 = vrot.slane %v4106_v54, 1  ;;  %v1995_v22 = vrot.slane %v6407_v58, 1  ;;  %v1884_v50 = vshll.u32 %v5460_v7, 16 }
  0xcd   : > { %1254 = vmatmul.mubr.bf16.gmra.mrb[60].mxu0 %v6189_v52  ;;  %2313 = vmatmul.mubr.bf16.gmra.mrb[60].mxu1 %v6299_v1  ;;  %v1867_v52 = vshll.u32 %v6395_v21, 16  ;;  %v1982_v1 = vrot.slane %v4104_v19, 1  ;;  %v4109_v19 = vcombine.low %v4061_v4, %v6419_v16  ;;  %v1998_v58 = vrot.slane %v5460_v7, 1 }
  0xce   : > { %4703 = vmatprep.mubr.bf16.mxu0 %v863_v37  ;;  %2320 = vmatprep.mubr.bf16.mxu1 %v1851_v12  ;;  %v5545_v37 = vld [vmem:[%s5786_s5 + $0x28] sm:$0xf]  ;;  %v4134_v12 = vld [vmem:[%s5786_s5 + $0x18] sm:$0xf]  ;;  %v1877_v16 = vshrl.u32 %v6442_v40, 16 }
  0xcf   : > { %v3961_v38 = vcombine.low %v446_v35, %v5545_v37  ;;  %v6435_v20 = vsel %vm860_vm1, %v1982_v1, %v1983_v9  ;;  %v1869_v17 = vrot.slane %v1867_v52, 1  ;;  %v6459_v35 = vsel %vm860_vm1, %v1988_v39, %v1989_v11  ;;  %v5449_v37 = vld [vmem:[%s5800_s11 + $0x198] sm:$0xff]   ;;  %v5455_v39 = vld [vmem:[%s5800_s11 + $0x1a0] sm:$0xff]  }
  0xd0   : > { %v6466_v52 = vsel %vm860_vm1, %v1991_v23, %v1992_v24  ;;  %v6471_v41 = vcombine.low %v4134_v12, %v4135_v29  ;;  %v6475_v1 = vsel %vm860_vm1, %v1994_v5, %v1995_v22  ;;  %v1997_v42 = vrot.slane %v4109_v19, 1  ;;  %v6518_v5 = vld [vmem:[%s5786_s5 + $0x34] sm:$0xf] }
  0xd1   : > { %v870_v15 = vrot.slane %v3961_v38, 1  ;;  %v1870_v63 = vor.u32 %v1869_v17, %v1865_v44  ;;  %v5454_v38 = vld [vmem:[%s5800_s11 + $0x1e0] sm:$0xff]   ;;  %v1886_v44 = vrot.slane %v1884_v50, 1  ;;  %v5463_v50 = vld [vmem:[%s5800_s11 + $0x1b0] sm:$0xff]  }
  0xd2   : > { %v2790_v56 = vshll.u32 %v6471_v41, 16  ;;  %v4136_v17 = vld [vmem:[%s5786_s5 + $0x24] sm:$0xf]  ;;  %v2788_v46 = vshrl.u32 %v6471_v41, 16 }
  0xd3   : > { %v872_v9 = vsel %vm860_vm1, %v870_v15, %v871_v62  ;;  %v1875_v34 = vsel %vm603_vm0, %v1870_v63, %v1874_v33  ;;  %v5456_v15 = vld [vmem:[%s5800_s11 + $0x1e8] sm:$0xff]   ;;  %v6500_v62 = vcombine.low %v4136_v17, %v4137_v25  ;;  %v5551_v17 = vld [vmem:[%s5786_s5 + $0x20] ss:$0 sps:$4 sm:$0x11]  }
  0xd4   : > { %v2792_v30 = vrot.slane %v2790_v56, 1  ;;  %v5457_v63 = vld [vmem:[%s5800_s11 + $0x1a8] sm:$0xff]  }
  0xd5   : > { %4704 = vmatmul.mubr.bf16.vlgmr.msra.gmra.mrb[64].mxu0 %v866_v31  ;;  %2321 = vmatmul.mubr.bf16.gmra.mrb[64].mxu1 %v6326_v8  ;;  %v1879_v8 = vshll.u32 %v6442_v40, 16  ;;  %v2802_v4 = vshll.u32 %v6500_v62, 16 }
  0xd6   : > { %4552 = vmatpush3.bf16.msra.mxu0 %v5438_v13  ;;  %4707 = vmatprep.mubr.bf16.mxu0 %v869_v0  ;;  %v5469_v13 = vld [vmem:[%s5786_s5 + $0x20] ss:$0 sps:$4 sm:$0x11]   ;;  %v6481_v0 = vsel %vm860_vm1, %v1997_v42, %v1998_v58  ;;  %v2793_v33 = vor.u32 %v2792_v30, %v2788_v46  ;;  %v2800_v58 = vshrl.u32 %v6500_v62, 16 }
  0xd7   : > { %4553 = vmatprep.subr.bf16.mxu0 %v5439_v47  ;;  %2328 = vmatprep.mubr.bf16.mxu1 %v1863_v36  ;;  %v1881_v31 = vrot.slane %v1879_v8, 1  ;;  %v4182_v47 = vld [vmem:[%s5786_s5 + $0x18] sm:$0xe]  ;;  %v3044_v11 = vrot.slane %v5469_v13, 1  ;;  %v4183_v36 = vld [vmem:[%s5786_s5 + $0x24] sm:$0xe] }
  0xd8   : > { %v4230_v54 = vcombine.low %v4182_v47, %v4135_v29  ;;  %v4231_v6 = vcombine.low %v4183_v36, %v4137_v25  ;;  %v2795_v24 = vshll.u32 %v5469_v13, 16  ;;  %v5547_v29 = vld [vmem:[%s5786_s5 + $0x10] sm:$0xf]  ;;  %v5549_v13 = vld [vmem:[%s5786_s5 + $0x1c] sm:$0xf]  ;;  %v1956_v25 = vrot.slane %v5551_v17, 1 }
  0xd9   : > { %v4138_v8 = vld [vmem:[%s5786_s5 + $0x30] sm:$0xf]  ;;  %v5466_v47 = vld [vmem:[%s5800_s11 + $0x1b8] sm:$0xff]  }
  0xda   : > { %4554 = vmatpush3.bf16.msra.mxu0 %v5440_v2  ;;  %v3043_v7 = vrot.slane %v4230_v54, 1  ;;  %v3047_v2 = vrot.slane %v6490_v55, 1  ;;  %v2797_v22 = vrot.slane %v2795_v24, 1 }
  0xdb   : > { %4555 = vmatprep.subr.bf16.mxu0 %v5445_v48  ;;  %v3046_v48 = vrot.slane %v4231_v6, 1 }
  0xdc   : > { %v6503_v53 = vsel %vm860_vm1, %v3043_v7, %v3044_v11  ;;  %v2798_v42 = vsel %vm603_vm0, %v2793_v33, %v2797_v22  ;;  %v6544_v7 = vld [vmem:[%s5786_s5 + $0x40] sm:$0xf]  ;;  %v6560_v22 = vld [vmem:[%s5786_s5 + $0x44] ss:$0 sps:$4 sm:$0x11]  }
  0xdd   : > { %4708 = vmatmul.mubr.bf16.gmra.mrb[68].mxu0 %v872_v9  ;;  %2329 = vmatmul.mubr.bf16.gmra.mrb[68].mxu1 %v6354_v49  ;;  %v4046_v49 = vld [vmem:[%s5786_s5 + $0xc] sm:$0xe]  ;;  %v6509_v28 = vsel %vm860_vm1, %v3046_v48, %v3047_v2  ;;  %v5548_v9 = vld [vmem:[%s5786_s5 + $0x14] ss:$0 sps:$4 sm:$0x11]  }
  0xde   : > { %4556 = vmatpush3.bf16.msra.mxu0 %v5446_v14  ;;  %4711 = vmatprep.mubr.bf16.mxu0 %v6280_v59  ;;  %v1882_v59 = vor.u32 %v1881_v31, %v1877_v16  ;;  %v4094_v23 = vcombine.low %v4046_v49, %v5547_v29  ;;  %v1953_v14 = vrot.slane %v5548_v9, 1  ;;  %v2804_v16 = vrot.slane %v2802_v4, 1  ;;  %v5552_v2 = vld [vmem:[%s5786_s5 + $0x2c] ss:$0 sps:$4 sm:$0x11]  }
  0xdf   : > { %4557 = vmatprep.subr.bf16.mxu0 %v5448_v61  ;;  %2336 = vmatprep.mubr.bf16.mxu1 %v1875_v34  ;;  %v5465_v61 = vld [vmem:[%s5800_s11 + $0x1f8] sm:$0xff]   ;;  %v2807_v34 = vshll.u32 %v6490_v55, 16  ;;  %v6529_v31 = vcombine.low %v4138_v8, %v6518_v5  ;;  %v4049_v49 = vld [vmem:[%s5786_s5 + $0x30] sm:$0xe] }
  0xe0   : > { %v1887_v12 = vsel %vm603_vm0, %v1882_v59, %v1886_v44  ;;  %v1952_v19 = vrot.slane %v4094_v23, 1  ;;  %v5550_v44 = vld [vmem:[%s5786_s5 + $0x28] sm:$0xf]  ;;  %v6537_v55 = vld [vmem:[%s5786_s5 + $0x38] ss:$0 sps:$4 sm:$0x11]   ;;  %v2805_v54 = vor.u32 %v2804_v16, %v2800_v58 }
  0xe1   : > { %v2809_v11 = vrot.slane %v2807_v34, 1  ;;  %v4140_v59 = vld [vmem:[%s5786_s5 + $0x3c] sm:$0xf]  ;;  %v2812_v24 = vshrl.u32 %v6529_v31, 16 }
  0xe2   : > { %4558 = vmatpush3.bf16.msra.mxu0 %v5449_v37  ;;  %v6552_v30 = vcombine.low %v4140_v59, %v6544_v7  ;;  %v5490_v16 = vld [vmem:[%s5800_s11 + $0x218] sm:$0xff]  }
  0xe3   : > { %4559 = vmatprep.subr.bf16.mxu0 %v5454_v38  ;;  %v1954_v38 = vsel %vm860_vm1, %v1952_v19, %v1953_v14  ;;  %v2810_v46 = vsel %vm603_vm0, %v2805_v54, %v2809_v11  ;;  %v5554_v19 = vld [vmem:[%s5786_s5 + $0x38] ss:$0 sps:$4 sm:$0x11]   ;;  %v6567_v14 = vld [vmem:[%s5786_s5 + $0x4c] sm:$0xf] }
  0xe4   : > { %v2826_v4 = vshll.u32 %v6552_v30, 16  ;;  %v1962_v9 = vrot.slane %v5554_v19, 1  ;;  %v6597_v59 = vld [vmem:[%s5786_s5 + $0x5c] ss:$0 sps:$4 sm:$0x11]  }
  0xe5   : > { %4712 = vmatmul.mubr.bf16.gmra.mrb[72].mxu0 %v6291_v60  ;;  %2337 = vmatmul.mubr.bf16.gmra.mrb[72].mxu1 %v6395_v21  ;;  %v5462_v60 = vld [vmem:[%s5800_s11 + $0x1f0] sm:$0xff]   ;;  %v4048_v21 = vld [vmem:[%s5786_s5 + $0x24] sm:$0xe] }
  0xe6   : > { %4560 = vmatpush3.bf16.msra.mxu0 %v5455_v39  ;;  %4715 = vmatprep.mubr.bf16.mxu0 %v6305_v32  ;;  %v4047_v32 = vld [vmem:[%s5786_s5 + $0x18] sm:$0xe]  ;;  %v4096_v56 = vcombine.low %v4048_v21, %v5550_v44  ;;  %v1959_v39 = vrot.slane %v5552_v2, 1  ;;  %v2828_v58 = vrot.slane %v2826_v4, 1  ;;  %v4144_v44 = vld [vmem:[%s5786_s5 + $0x54] sm:$0xf] }
  0xe7   : > { %4561 = vmatprep.subr.bf16.mxu0 %v5456_v15  ;;  %2344 = vmatprep.mubr.bf16.mxu1 %v1887_v12  ;;  %v4095_v37 = vcombine.low %v4047_v32, %v5549_v13  ;;  %v5553_v12 = vld [vmem:[%s5786_s5 + $0x34] sm:$0xf]  ;;  %v4146_v2 = vld [vmem:[%s5786_s5 + $0x60] sm:$0xf] }
  0xe8   : > { %v1958_v6 = vrot.slane %v4096_v56, 1  ;;  %v4097_v29 = vcombine.low %v4049_v49, %v5553_v12  ;;  %v5485_v32 = vld [vmem:[%s5800_s11 + $0x210] sm:$0xff]   ;;  %v6586_v56 = vld [vmem:[%s5786_s5 + $0x58] sm:$0xf] }
  0xe9   : > { %v1955_v36 = vrot.slane %v4095_v37, 1  ;;  %v6580_v37 = vld [vmem:[%s5786_s5 + $0x50] ss:$0 sps:$4 sm:$0x11]  }
  0xea   : > { %4562 = vmatpush3.bf16.msra.mxu0 %v5457_v63  ;;  %v1960_v23 = vsel %vm860_vm1, %v1958_v6, %v1959_v39  ;;  %v5480_v63 = vld [vmem:[%s5800_s11 + $0x208] sm:$0xff]   ;;  %v1961_v8 = vrot.slane %v4097_v29, 1  ;;  %v6602_v39 = vld [vmem:[%s5786_s5 + $0x64] sm:$0xf] }
  0xeb   : > { %4563 = vmatprep.subr.bf16.mxu0 %v5462_v60  ;;  %v1957_v48 = vsel %vm860_vm1, %v1955_v36, %v1956_v25  ;;  %v4203_v36 = vcombine.low %v4144_v44, %v6586_v56 }
  0xed   : > { %4716 = vmatmul.mubr.bf16.gmra.mrb[76].mxu0 %v6310_v3  ;;  %2345 = vmatmul.mubr.bf16.gmra.mrb[76].mxu1 %v6442_v40  ;;  %v2814_v3 = vshll.u32 %v6529_v31, 16  ;;  %v2819_v40 = vshll.u32 %v6537_v55, 16  ;;  %v2850_v6 = vshll.u32 %v4203_v36, 16  ;;  %v2848_v49 = vshrl.u32 %v4203_v36, 16 }
  0xee   : > { %4564 = vmatpush3.bf16.msra.mxu0 %v5463_v50  ;;  %3315 = vmatprep.mubr.bf16.mxu0 %v2798_v42  ;;  %v2824_v50 = vshrl.u32 %v6552_v30, 16 }
  0xef   : > { %4565 = vmatprep.subr.bf16.mxu0 %v5465_v61  ;;  %4751 = vmatprep.mubr.bf16.mxu1 %v1954_v38  ;;  %v2816_v15 = vrot.slane %v2814_v3, 1  ;;  %v2821_v60 = vrot.slane %v2819_v40, 1  ;;  %v2831_v61 = vshll.u32 %v6560_v22, 16  ;;  %v2843_v3 = vshll.u32 %v6580_v37, 16 }
  0xf0   : > { %v2829_v34 = vor.u32 %v2828_v58, %v2824_v50  ;;  %v2852_v40 = vrot.slane %v2850_v6, 1  ;;  %v6659_v6 = vld [vmem:[%s5786_s5 + $0x8c] ss:$0 sps:$4 sm:$0x11]  }
  0xf1   : > { %v2817_v33 = vor.u32 %v2816_v15, %v2812_v24  ;;  %v2833_v13 = vrot.slane %v2831_v61, 1  ;;  %v2845_v25 = vrot.slane %v2843_v3, 1  ;;  %v4204_v24 = vcombine.low %v4146_v2, %v6602_v39  ;;  %v6611_v15 = vld [vmem:[%s5786_s5 + $0x68] ss:$0 sps:$4 sm:$0x11]  }
  0xf2   : > { %4566 = vmatpush3.bf16.msra.mxu0 %v5466_v47 }
  0xf3   : > { %v2822_v21 = vsel %vm603_vm0, %v2817_v33, %v2821_v60  ;;  %v2834_v54 = vsel %vm603_vm0, %v2829_v34, %v2833_v13  ;;  %v2862_v29 = vshll.u32 %v4204_v24, 16  ;;  %v2860_v33 = vshrl.u32 %v4204_v24, 16  ;;  %v4152_v34 = vld [vmem:[%s5786_s5 + $0x84] sm:$0xf]  ;;  %v6645_v13 = vld [vmem:[%s5786_s5 + $0x88] sm:$0xf] }
  0xf5   : > { %3316 = vmatmul.mubr.bf16.vlgmr.msra.gmra.mrb[80].mxu0 %v6471_v41  ;;  %4752 = vmatmul.mubr.bf16.vlgmr.msra.gmra.mrb[80].mxu1 %v1957_v48  ;;  %v4142_v41 = vld [vmem:[%s5786_s5 + $0x48] sm:$0xf]  ;;  %v2853_v48 = vor.u32 %v2852_v40, %v2848_v49  ;;  %v2864_v4 = vrot.slane %v2862_v29, 1  ;;  %v6665_v49 = vld [vmem:[%s5786_s5 + $0x94] sm:$0xf] }
  0xf6   : > { %3323 = vmatprep.mubr.bf16.mxu0 %v2810_v46  ;;  %4755 = vmatprep.mubr.bf16.mxu1 %v1960_v23  ;;  %v6574_v42 = vcombine.low %v4142_v41, %v6567_v14  ;;  %v2855_v46 = vshll.u32 %v6597_v59, 16  ;;  %v4148_v23 = vld [vmem:[%s5786_s5 + $0x6c] sm:$0xf]  ;;  %v4150_v41 = vld [vmem:[%s5786_s5 + $0x78] sm:$0xf] }
  0xf7   : > { %4784 = vmatpush3.bf16.msra.mxu1 %v6335_v43  ;;  %v1963_v43 = vsel %vm860_vm1, %v1961_v8, %v1962_v9  ;;  %v6624_v8 = vld [vmem:[%s5786_s5 + $0x74] ss:$0 sps:$4 sm:$0x11]   ;;  %v4184_v40 = vld [vmem:[%s5786_s5 + $0x30] sm:$0xe] }
  0xf8   : > { %4785 = vmatprep.subr.bf16.mxu1 %v5480_v63  ;;  %v2838_v38 = vshll.u32 %v6574_v42, 16  ;;  %v2836_v47 = vshrl.u32 %v6574_v42, 16  ;;  %v2857_v12 = vrot.slane %v2855_v46, 1  ;;  %v2879_v58 = vshll.u32 %v6624_v8, 16 }
  0xfa   : > { %v2840_v11 = vrot.slane %v2838_v38, 1  ;;  %v2858_v60 = vsel %vm603_vm0, %v2853_v48, %v2857_v12 }
  0xfb   : > { %4786 = vmatpush3.bf16.msra.mxu1 %v5480_v63  ;;  %v6616_v63 = vld [vmem:[%s5786_s5 + $0x70] sm:$0xf] }
  0xfc   : > { %4787 = vmatprep.subr.bf16.mxu1 %v5485_v32  ;;  %v2841_v17 = vor.u32 %v2840_v11, %v2836_v47 }
  0xfd   : > { %3324 = vmatmul.mubr.bf16.gmra.mrb[84].mxu0 %v6500_v62  ;;  %4756 = vmatmul.mubr.bf16.gmra.mrb[84].mxu1 %v1963_v43  ;;  %v5495_v62 = vld [vmem:[%s5800_s11 + $0x220] sm:$0xff]   ;;  %v2881_v43 = vrot.slane %v2879_v58, 1 }
  0xfe   : > { %3331 = vmatprep.mubr.bf16.mxu0 %v2822_v21  ;;  %4759 = vmatprep.mubr.bf16.mxu1 %v6357_v51  ;;  %v5500_v51 = vld [vmem:[%s5800_s11 + $0x228] sm:$0xff]  }
  0xff   : > { %4788 = vmatpush3.bf16.msra.mxu1 %v5485_v32  ;;  %v6630_v32 = vld [vmem:[%s5786_s5 + $0x7c] sm:$0xf] }
 0x100   : > { %4789 = vmatprep.subr.bf16.mxu1 %v5490_v16 }
 0x103   : > { %4790 = vmatpush3.bf16.msra.mxu1 %v5490_v16 }
 0x104   : > { %4791 = vmatprep.subr.bf16.mxu1 %v5495_v62 }
 0x105   : > { %3332 = vmatmul.mubr.bf16.gmra.mrb[88].mxu0 %v6529_v31  ;;  %4760 = vmatmul.mubr.bf16.gmra.mrb[88].mxu1 %v6374_v10  ;;  %v5505_v31 = vld [vmem:[%s5800_s11 + $0x230] sm:$0xff]   ;;  %v2846_v10 = vsel %vm603_vm0, %v2841_v17, %v2845_v25 }
 0x106   : > { %3339 = vmatprep.mubr.bf16.mxu0 %v2834_v54  ;;  %4763 = vmatprep.mubr.bf16.mxu1 %v6386_v18  ;;  %v5506_v18 = vld [vmem:[%s5800_s11 + $0x238] sm:$0xff]  }
 0x107   : > { %4792 = vmatpush3.bf16.msra.mxu1 %v5495_v62 }
 0x108   : > { %4793 = vmatprep.subr.bf16.mxu1 %v5500_v51 }
 0x10b   : > { %4794 = vmatpush3.bf16.msra.mxu1 %v5500_v51 }
 0x10c   : > { %4795 = vmatprep.subr.bf16.mxu1 %v5505_v31 }
 0x10d   : > { %3340 = vmatmul.mubr.bf16.gmra.mrb[92].mxu0 %v6552_v30  ;;  %4764 = vmatmul.mubr.bf16.gmra.mrb[92].mxu1 %v6398_v45  ;;  %v4205_v30 = vcombine.low %v4148_v23, %v6616_v63  ;;  %v2867_v45 = vshll.u32 %v6611_v15, 16  ;;  %v4232_v23 = vcombine.low %v4184_v40, %v6518_v5  ;;  %v3050_v5 = vrot.slane %v6537_v55, 1  ;;  %v4188_v40 = vld [vmem:[%s5786_s5 + $0x60] sm:$0xe] }
 0x10e   : > { %3347 = vmatprep.mubr.bf16.mxu0 %v2846_v10  ;;  %4767 = vmatprep.mubr.bf16.mxu1 %v6410_v27  ;;  %v2865_v27 = vor.u32 %v2864_v4, %v2860_v33 }
 0x10f   : > { %4796 = vmatpush3.bf16.msra.mxu1 %v5505_v31  ;;  %v2874_v19 = vshll.u32 %v4205_v30, 16  ;;  %v2869_v9 = vrot.slane %v2867_v45, 1  ;;  %v2872_v50 = vshrl.u32 %v4205_v30, 16  ;;  %v4154_v31 = vld [vmem:[%s5786_s5 + $0x90] sm:$0xf] }
 0x110   : > { %4797 = vmatprep.subr.bf16.mxu1 %v5506_v18  ;;  %v6672_v48 = vcombine.low %v4154_v31, %v6665_v49  ;;  %v3056_v31 = vrot.slane %v6580_v37, 1 }
 0x111   : > { %v2876_v21 = vrot.slane %v2874_v19, 1  ;;  %v2870_v61 = vsel %vm603_vm0, %v2865_v27, %v2869_v9  ;;  %v6681_v19 = vld [vmem:[%s5786_s5 + $0x98] ss:$0 sps:$4 sm:$0x11]   ;;  %v6687_v9 = vld [vmem:[%s5786_s5 + $0xa0] sm:$0xf] }
 0x112   : > { %v2910_v27 = vshll.u32 %v6672_v48, 16 }
 0x113   : > { %4798 = vmatpush3.bf16.msra.mxu1 %v5506_v18  ;;  %v2903_v18 = vshll.u32 %v6659_v6, 16 }
 0x115   : > { %3348 = vmatmul.mubr.bf16.gmra.mrb[96].mxu0 %v6574_v42  ;;  %4768 = vmatmul.mubr.bf16.gmra.mrb[0].mxu1 %v6423_v57  ;;  %v6635_v42 = vcombine.low %v4150_v41, %v6630_v32  ;;  %v2877_v57 = vor.u32 %v2876_v21, %v2872_v50  ;;  %v2905_v45 = vrot.slane %v2903_v18, 1  ;;  %v3049_v41 = vrot.slane %v4232_v23, 1  ;;  %v4185_v50 = vld [vmem:[%s5786_s5 + $0x3c] sm:$0xe]  ;;  %v4186_v21 = vld [vmem:[%s5786_s5 + $0x48] sm:$0xe] }
 0x116   : > { %3355 = vmatprep.mubr.bf16.mxu0 %v2858_v60  ;;  %4771 = vmatprep.mubr.bf16.mxu1 %v6435_v20  ;;  %v6639_v20 = vld [vmem:[%s5786_s5 + $0x80] ss:$0 sps:$4 sm:$0x11]  }
 0x117   : > { %v2886_v16 = vshll.u32 %v6635_v42, 16  ;;  %v2882_v38 = vsel %vm603_vm0, %v2877_v57, %v2881_v43  ;;  %v2884_v62 = vshrl.u32 %v6635_v42, 16  ;;  %v2891_v54 = vshll.u32 %v6639_v20, 16 }
 0x118   : > { %v2915_v57 = vshll.u32 %v6681_v19, 16  ;;  %v3051_v55 = vsel %vm860_vm1, %v3049_v41, %v3050_v5 }
 0x119   : > { %v2888_v47 = vrot.slane %v2886_v16, 1  ;;  %v2893_v25 = vrot.slane %v2891_v54, 1  ;;  %v4233_v16 = vcombine.low %v4185_v50, %v6544_v7  ;;  %v4160_v50 = vld [vmem:[%s5786_s5 + $0xb4] sm:$0xf] }
 0x11b   : > { %v2889_v17 = vor.u32 %v2888_v47, %v2884_v62  ;;  %v6705_v47 = vld [vmem:[%s5786_s5 + $0xa4] ss:$0 sps:$4 sm:$0x11]  }
 0x11d   : > { %3356 = vmatmul.mubr.bf16.gmra.mrb[100].mxu0 %v4203_v36  ;;  %4772 = vmatmul.mubr.bf16.gmra.mrb[4].mxu1 %v6448_v26  ;;  %v6651_v26 = vcombine.low %v4152_v34, %v6645_v13 }
 0x11e   : > { %3363 = vmatprep.mubr.bf16.mxu0 %v2870_v61  ;;  %4775 = vmatprep.mubr.bf16.mxu1 %v6459_v35  ;;  %v2912_v61 = vrot.slane %v2910_v27, 1 }
 0x11f   : > { %v2898_v2 = vshll.u32 %v6651_v26, 16  ;;  %v2896_v10 = vshrl.u32 %v6651_v26, 16 }
 0x125   : > { %3364 = vmatmul.mubr.bf16.gmra.mrb[104].mxu0 %v4204_v24  ;;  %4776 = vmatmul.mubr.bf16.gmra.mrb[8].mxu1 %v6466_v52  ;;  %v2894_v52 = vsel %vm603_vm0, %v2889_v17, %v2893_v25  ;;  %v2900_v24 = vrot.slane %v2898_v2, 1  ;;  %v4158_v17 = vld [vmem:[%s5786_s5 + $0xa8] sm:$0xf]  ;;  %v6714_v25 = vld [vmem:[%s5786_s5 + $0xac] sm:$0xf] }
 0x126   : > { %3371 = vmatprep.mubr.bf16.mxu0 %v2882_v38  ;;  %4779 = vmatprep.mubr.bf16.mxu1 %v6475_v1  ;;  %v4234_v38 = vcombine.low %v4186_v21, %v6567_v14  ;;  %v3053_v14 = vrot.slane %v6560_v22, 1  ;;  %v6723_v18 = vcombine.low %v4158_v17, %v6714_v25 }
 0x127   : > { %v2901_v4 = vor.u32 %v2900_v24, %v2896_v10  ;;  %v4187_v10 = vld [vmem:[%s5786_s5 + $0x54] sm:$0xe] }
 0x128   : > { %v4295_v44 = vpop.f32.mrb[0].mxu0  ;;  %v3055_v2 = vrot.slane %v4234_v38, 1 }
 0x129   : > { %v4296_v11 = vpop.f32.mrb[1].mxu0  ;;  %v2906_v58 = vsel %vm603_vm0, %v2901_v4, %v2905_v45  ;;  %v3059_v45 = vrot.slane %v6597_v59, 1 }
 0x12a   : > { %v6653_v35 = vadd.f32 %v4296_v11, %v4295_v44  ;;  %v4298_v3 = vpop.f32.mrb[2].mxu0  ;;  %v3057_v37 = vsel %vm860_vm1, %v3055_v2, %v3056_v31  ;;  %v3065_v31 = vrot.slane %v6624_v8, 1 }
 0x12b   : > { %v4299_v36 = vpop.f32.mrb[3].mxu0 }
 0x12c   : > { %v6656_v51 = vadd.f32 %v4299_v36, %v4298_v3  ;;  %v3052_v36 = vrot.slane %v4233_v16, 1  ;;  %v4190_v16 = vld [vmem:[%s5786_s5 + $0x78] sm:$0xe] }
 0x12d   : > { %3372 = vmatmul.mubr.bf16.gmra.mrb[108].mxu0 %v4205_v30  ;;  %4780 = vmatmul.mubr.bf16.gmra.mrb[12].mxu1 %v6481_v0  ;;  %v4156_v30 = vld [vmem:[%s5786_s5 + $0x9c] sm:$0xf]  ;;  %v2908_v0 = vshrl.u32 %v6672_v48, 16 }
 0x12e   : > { %3379 = vmatprep.mubr.bf16.mxu0 %v2894_v52  ;;  %4799 = vmatprep.mubr.bf16.mxu1 %v6503_v53  ;;  %v6696_v43 = vcombine.low %v4156_v30, %v6687_v9  ;;  %v3054_v22 = vsel %vm860_vm1, %v3052_v36, %v3053_v14  ;;  %v4191_v14 = vld [vmem:[%s5786_s5 + $0x84] sm:$0xe] }
 0x12f   : > { %v2913_v54 = vor.u32 %v2912_v61, %v2908_v0  ;;  %v6740_v0 = vld [vmem:[%s5786_s5 + $0xb8] sm:$0xf]  ;;  %v3062_v61 = vrot.slane %v6611_v15, 1 }
 0x130   : > { %v4301_v46 = vpop.f32.mrb[4].mxu0  ;;  %v2922_v11 = vshll.u32 %v6696_v43, 16  ;;  %v2920_v52 = vshrl.u32 %v6696_v43, 16 }
 0x131   : > { %v4302_v12 = vpop.f32.mrb[5].mxu0 }
 0x132   : > { %v6674_v1 = vadd.f32 %v4302_v12, %v4301_v46  ;;  %v4304_v29 = vpop.f32.mrb[6].mxu0  ;;  %v2924_v24 = vrot.slane %v2922_v11, 1  ;;  %v4235_v12 = vcombine.low %v4187_v10, %v6586_v56  ;;  %v4189_v56 = vld [vmem:[%s5786_s5 + $0x6c] sm:$0xe]  ;;  %v6765_v10 = vld [vmem:[%s5786_s5 + $0xc4] sm:$0xf] }
 0x133   : > { %v4305_v60 = vpop.f32.mrb[7].mxu0 }
 0x134   : > { %v6678_v33 = vadd.f32 %v4305_v60, %v4304_v29  ;;  %v4236_v29 = vcombine.low %v4188_v40, %v6602_v39  ;;  %v6731_v60 = vld [vmem:[%s5786_s5 + $0xb0] ss:$0 sps:$4 sm:$0x11]   ;;  %v2925_v27 = vor.u32 %v2924_v24, %v2920_v52  ;;  %v3058_v39 = vrot.slane %v4235_v12, 1 }
 0x135   : > { %3380 = vmatmul.mubr.bf16.gmra.mrb[112].mxu0 %v6635_v42  ;;  %4800 = vmatmul.mubr.bf16.vlgmr.msra.gmra.mrb[80].mxu1 %v6509_v28  ;;  %v2917_v42 = vrot.slane %v2915_v57, 1  ;;  %v2927_v28 = vshll.u32 %v6705_v47, 16  ;;  %v4237_v57 = vcombine.low %v4189_v56, %v6616_v63  ;;  %v4238_v63 = vcombine.low %v4190_v16, %v6630_v32 }
 0x136   : > { %3387 = vmatprep.mubr.bf16.mxu0 %v2906_v58  ;;  %4803 = vmatprep.mubr.bf16.mxu1 %v3051_v55  ;;  %v3061_v58 = vrot.slane %v4236_v29, 1  ;;  %v2932_v55 = vshrl.u32 %v6723_v18, 16  ;;  %v3068_v40 = vrot.slane %v6639_v20, 1  ;;  %v3071_v16 = vrot.slane %v6659_v6, 1 }
 0x137   : > { %v2918_v46 = vsel %vm603_vm0, %v2913_v54, %v2917_v42  ;;  %v2929_v30 = vrot.slane %v2927_v28, 1  ;;  %v6758_v54 = vld [vmem:[%s5786_s5 + $0xbc] ss:$0 sps:$4 sm:$0x11]   ;;  %v3064_v42 = vrot.slane %v4237_v57, 1  ;;  %v3067_v32 = vrot.slane %v4238_v63, 1 }
 0x138   : > { %v4307_v53 = vpop.f32.mrb[8].mxu0  ;;  %v3063_v15 = vsel %vm860_vm1, %v3061_v58, %v3062_v61  ;;  %v2951_v12 = vshll.u32 %v6758_v54, 16 }
 0x139   : > { %v4308_v34 = vpop.f32.mrb[9].mxu0 }
 0x13a   : > { %v6702_v44 = vadd.f32 %v4308_v34, %v4307_v53  ;;  %v4310_v62 = vpop.f32.mrb[10].mxu0  ;;  %v2939_v53 = vshll.u32 %v6731_v60, 16  ;;  %v2930_v34 = vsel %vm603_vm0, %v2925_v27, %v2929_v30  ;;  %v3066_v30 = vsel %vm860_vm1, %v3064_v42, %v3065_v31 }
 0x13b   : > { %v4311_v7 = vpop.f32.mrb[11].mxu0  ;;  %v2953_v57 = vrot.slane %v2951_v12, 1 }
 0x13c   : > { %v6709_v3 = vadd.f32 %v4311_v7, %v4310_v62  ;;  %v6751_v62 = vcombine.low %v4160_v50, %v6740_v0  ;;  %v3060_v7 = vsel %vm860_vm1, %v3058_v39, %v3059_v45  ;;  %v2941_v36 = vrot.slane %v2939_v53, 1 }
 0x13d   : > { %3388 = vmatmul.mubr.bf16.gmra.mrb[116].mxu0 %v6651_v26  ;;  %4804 = vmatmul.mubr.bf16.gmra.mrb[84].mxu1 %v3054_v22  ;;  %v2934_v26 = vshll.u32 %v6723_v18, 16  ;;  %v4239_v22 = vcombine.low %v4191_v14, %v6645_v13  ;;  %v4194_v14 = vld [vmem:[%s5786_s5 + $0xa8] sm:$0xe] }
 0x13e   : > { %3395 = vmatprep.mubr.bf16.mxu0 %v2918_v46  ;;  %4807 = vmatprep.mubr.bf16.mxu1 %v3057_v37  ;;  %v2946_v17 = vshll.u32 %v6751_v62, 16  ;;  %v4192_v37 = vld [vmem:[%s5786_s5 + $0x90] sm:$0xe] }
 0x13f   : > { %v2936_v38 = vrot.slane %v2934_v26, 1  ;;  %v3069_v26 = vsel %vm860_vm1, %v3067_v32, %v3068_v40  ;;  %v4240_v39 = vcombine.low %v4192_v37, %v6665_v49  ;;  %v3070_v58 = vrot.slane %v4239_v22, 1 }
 0x140   : > { %v4313_v23 = vpop.f32.mrb[12].mxu0  ;;  %v2948_v45 = vrot.slane %v2946_v17, 1  ;;  %v4242_v37 = vcombine.low %v4194_v14, %v6714_v25  ;;  %v3080_v25 = vrot.slane %v6731_v60, 1 }
 0x141   : > { %v4314_v4 = vpop.f32.mrb[13].mxu0  ;;  %v2937_v11 = vor.u32 %v2936_v38, %v2932_v55  ;;  %v6795_v55 = vld [vmem:[%s5786_s5 + $0xd0] sm:$0xf]  ;;  %v3073_v38 = vrot.slane %v4240_v39, 1  ;;  %v3072_v32 = vsel %vm860_vm1, %v3070_v58, %v3071_v16 }
 0x142   : > { %v6736_v41 = vadd.f32 %v4314_v4, %v4313_v23  ;;  %v4316_v5 = vpop.f32.mrb[14].mxu0  ;;  %v2944_v4 = vshrl.u32 %v6751_v62, 16 }
 0x143   : > { %v4317_v21 = vpop.f32.mrb[15].mxu0  ;;  %v2942_v8 = vsel %vm603_vm0, %v2937_v11, %v2941_v36 }
 0x144   : > { %v6743_v59 = vadd.f32 %v4317_v21, %v4316_v5  ;;  %v6789_v21 = vld [vmem:[%s5786_s5 + $0xc8] ss:$0 sps:$4 sm:$0x11]   ;;  %v2949_v61 = vor.u32 %v2948_v45, %v2944_v4  ;;  %v6820_v4 = vld [vmem:[%s5786_s5 + $0xd4] ss:$0 sps:$4 sm:$0x11]  }
 0x145   : > { %3396 = vmatmul.mubr.bf16.gmra.mrb[120].mxu0 %v6672_v48  ;;  %4808 = vmatmul.mubr.bf16.gmra.mrb[88].mxu1 %v3060_v7  ;;  %v4162_v48 = vld [vmem:[%s5786_s5 + $0xc0] sm:$0xf]  ;;  %v3074_v7 = vrot.slane %v6681_v19, 1  ;;  %v2963_v36 = vshll.u32 %v6789_v21, 16 }
 0x146   : > { %3403 = vmatprep.mubr.bf16.mxu0 %v2930_v34  ;;  %4811 = vmatprep.mubr.bf16.mxu1 %v3063_v15  ;;  %v6776_v27 = vcombine.low %v4162_v48, %v6765_v10  ;;  %v4164_v34 = vld [vmem:[%s5786_s5 + $0xcc] sm:$0xf]  ;;  %v4193_v15 = vld [vmem:[%s5786_s5 + $0x9c] sm:$0xe]  ;;  %v2954_v31 = vsel %vm603_vm0, %v2949_v61, %v2953_v57  ;;  %v4196_v57 = vld [vmem:[%s5786_s5 + $0xc0] sm:$0xe] }
 0x147   : > { %v3075_v22 = vsel %vm860_vm1, %v3073_v38, %v3074_v7  ;;  %v2975_v38 = vshll.u32 %v6820_v4, 16  ;;  %v4244_v14 = vcombine.low %v4196_v57, %v6765_v10 }
 0x148   : > { %v4319_v2 = vpop.f32.mrb[16].mxu0  ;;  %v4431_v24 = vpop.f32.mrb[16].mxu1  ;;  %v2958_v53 = vshll.u32 %v6776_v27, 16  ;;  %v2956_v6 = vshrl.u32 %v6776_v27, 16 }
 0x149   : > { %v4320_v28 = vpop.f32.mrb[17].mxu0  ;;  %v4432_v23 = vpop.f32.mrb[17].mxu1 }
 0x14a   : > { %v6768_v46 = vadd.f32 %v4320_v28, %v4319_v2  ;;  %v4322_v52 = vpop.f32.mrb[18].mxu0  ;;  %v6781_v56 = vadd.f32 %v4432_v23, %v4431_v24  ;;  %v4434_v13 = vpop.f32.mrb[18].mxu1  ;;  %v2960_v48 = vrot.slane %v2958_v53, 1  ;;  %v6806_v28 = vcombine.low %v4164_v34, %v6795_v55 }
 0x14b   : > { %v4323_v29 = vpop.f32.mrb[19].mxu0  ;;  %v4435_v5 = vpop.f32.mrb[19].mxu1  ;;  %v4241_v24 = vcombine.low %v4193_v15, %v6687_v9 }
 0x14c   : > { %v6778_v20 = vadd.f32 %v4323_v29, %v4322_v52  ;;  %v6786_v50 = vadd.f32 %v4435_v5, %v4434_v13  ;;  %v2961_v23 = vor.u32 %v2960_v48, %v2956_v6  ;;  %v2970_v45 = vshll.u32 %v6806_v28, 16  ;;  %v4195_v5 = vld [vmem:[%s5786_s5 + $0xb4] sm:$0xe] }
 0x14d   : > { %3404 = vmatmul.mubr.bf16.gmra.mrb[124].mxu0 %v6696_v43  ;;  %4812 = vmatmul.mubr.bf16.gmra.mrb[92].mxu1 %v3066_v30  ;;  %v3077_v30 = vrot.slane %v6705_v47, 1  ;;  %v2968_v34 = vshrl.u32 %v6806_v28, 16 }
 0x14e   : > { %3411 = vmatprep.mubr.bf16.mxu0 %v2942_v8  ;;  %4815 = vmatprep.mubr.bf16.mxu1 %v3069_v26  ;;  %v2965_v8 = vrot.slane %v2963_v36, 1  ;;  %v3079_v26 = vrot.slane %v4242_v37, 1 }
 0x150   : > { %v4325_v43 = vpop.f32.mrb[20].mxu0  ;;  %v4437_v11 = vpop.f32.mrb[20].mxu1  ;;  %v2966_v16 = vsel %vm603_vm0, %v2961_v23, %v2965_v8 }
 0x151   : > { %v4326_v49 = vpop.f32.mrb[21].mxu0  ;;  %v4438_v2 = vpop.f32.mrb[21].mxu1 }
 0x152   : > { %v6799_v63 = vadd.f32 %v4326_v49, %v4325_v43  ;;  %v4328_v42 = vpop.f32.mrb[22].mxu0  ;;  %v6811_v40 = vadd.f32 %v4438_v2, %v4437_v11  ;;  %v4440_v52 = vpop.f32.mrb[22].mxu1  ;;  %v2972_v49 = vrot.slane %v2970_v45, 1  ;;  %v3081_v11 = vsel %vm860_vm1, %v3079_v26, %v3080_v25 }
 0x153   : > { %v4329_v17 = vpop.f32.mrb[23].mxu0  ;;  %v4441_v12 = vpop.f32.mrb[23].mxu1 }
 0x154   : > { %v6808_v19 = vadd.f32 %v4329_v17, %v4328_v42  ;;  %v6817_v29 = vadd.f32 %v4441_v12, %v4440_v52  ;;  %v4243_v42 = vcombine.low %v4195_v5, %v6740_v0  ;;  %v2973_v2 = vor.u32 %v2972_v49, %v2968_v34 }
 0x155   : > { %3412 = vmatmul.mubr.bf16.gmra.mrb[128].mxu0 %v6723_v18  ;;  %4816 = vmatmul.mubr.bf16.gmra.mrb[0].mxu1 %v3072_v32  ;;  %v3076_v18 = vrot.slane %v4241_v24, 1  ;;  %v3083_v32 = vrot.slane %v6758_v54, 1  ;;  %v3085_v52 = vrot.slane %v4244_v14, 1  ;;  %v4197_v24 = vld [vmem:[%s5786_s5 + $0xcc] sm:$0xe] }
 0x156   : > { %3419 = vmatprep.mubr.bf16.mxu0 %v2954_v31  ;;  %4819 = vmatprep.mubr.bf16.mxu1 %v3075_v22  ;;  %v2977_v31 = vrot.slane %v2975_v38, 1  ;;  %v3082_v48 = vrot.slane %v4243_v42, 1 }
 0x157   : > { %v3078_v7 = vsel %vm860_vm1, %v3076_v18, %v3077_v30  ;;  %v4245_v30 = vcombine.low %v4197_v24, %v6795_v55 }
 0x158   : > { %v4331_v9 = vpop.f32.mrb[24].mxu0  ;;  %v4443_v61 = vpop.f32.mrb[24].mxu1  ;;  %v2978_v8 = vsel %vm603_vm0, %v2973_v2, %v2977_v31 }
 0x159   : > { %v4332_v13 = vpop.f32.mrb[25].mxu0  ;;  %v4444_v43 = vpop.f32.mrb[25].mxu1  ;;  %v3088_v5 = vrot.slane %v4245_v30, 1 }
 0x15a   : > { %v6826_v39 = vadd.f32 %v4332_v13, %v4331_v9  ;;  %v4334_v58 = vpop.f32.mrb[26].mxu0  ;;  %v6835_v60 = vadd.f32 %v4444_v43, %v4443_v61  ;;  %v4446_v15 = vpop.f32.mrb[26].mxu1  ;;  %v3084_v9 = vsel %vm860_vm1, %v3082_v48, %v3083_v32 }
 0x15b   : > { %v4335_v53 = vpop.f32.mrb[27].mxu0  ;;  %v4447_v36 = vpop.f32.mrb[27].mxu1 }
 0x15c   : > { %v6832_v47 = vadd.f32 %v4335_v53, %v4334_v58  ;;  %v6841_v17 = vadd.f32 %v4447_v36, %v4446_v15  ;;  %v3089_v58 = vrot.slane %v6820_v4, 1 }
 0x15d   : > { %3420 = vmatmul.mubr.bf16.gmra.mrb[132].mxu0 %v6751_v62  ;;  %4820 = vmatmul.mubr.bf16.gmra.mrb[4].mxu1 %v3078_v7  ;;  %v3086_v62 = vrot.slane %v6789_v21, 1 }
 0x15e   : > { %3427 = vmatprep.mubr.bf16.mxu0 %v2966_v16  ;;  %4823 = vmatprep.mubr.bf16.mxu1 %v3081_v11 }
 0x15f   : > { %v3087_v21 = vsel %vm860_vm1, %v3085_v52, %v3086_v62 }
 0x160   : > { %v4337_v6 = vpop.f32.mrb[28].mxu0  ;;  %v4449_v10 = vpop.f32.mrb[28].mxu1 }
 0x161   : > { %v4338_v0 = vpop.f32.mrb[29].mxu0  ;;  %v4450_v23 = vpop.f32.mrb[29].mxu1 }
 0x162   : > { %v6846_v22 = vadd.f32 %v4338_v0, %v4337_v6  ;;  %v4340_v12 = vpop.f32.mrb[30].mxu0  ;;  %v6852_v18 = vadd.f32 %v4450_v23, %v4449_v10  ;;  %v4452_v54 = vpop.f32.mrb[30].mxu1 }
 0x163   : > { %v4341_v37 = vpop.f32.mrb[31].mxu0  ;;  %v4453_v13 = vpop.f32.mrb[31].mxu1 }
 0x164   : > { %v6849_v45 = vadd.f32 %v4341_v37, %v4340_v12  ;;  %v6857_v26 = vadd.f32 %v4453_v13, %v4452_v54 }
 0x165   : > { %3428 = vmatmul.mubr.bf16.gmra.mrb[136].mxu0 %v6776_v27  ;;  %4824 = vmatmul.mubr.bf16.gmra.mrb[8].mxu1 %v3084_v9  ;;  %v3090_v27 = vsel %vm860_vm1, %v3088_v5, %v3089_v58 }
 0x166   : > { %3435 = vmatprep.mubr.bf16.mxu0 %v2978_v8  ;;  %4827 = vmatprep.mubr.bf16.mxu1 %v3087_v21 }
 0x168   : > { %v4343_v25 = vpop.f32.mrb[32].mxu0  ;;  %v4455_v43 = vpop.f32.mrb[32].mxu1 }
 0x169   : > { %v4344_v61 = vpop.f32.mrb[33].mxu0  ;;  %v4456_v55 = vpop.f32.mrb[33].mxu1 }
 0x16a   : > { %v4345_v57 = vadd.f32 %v4344_v61, %v4343_v25  ;;  %v4346_v53 = vpop.f32.mrb[34].mxu0  ;;  %v6861_v49 = vadd.f32 %v4456_v55, %v4455_v43  ;;  %v4458_v38 = vpop.f32.mrb[34].mxu1 }
 0x16b   : > { %v4347_v16 = vpop.f32.mrb[35].mxu0  ;;  %v4459_v7 = vpop.f32.mrb[35].mxu1 }
 0x16c   : > { %v4348_v34 = vadd.f32 %v4347_v16, %v4346_v53  ;;  %v6864_v15 = vadd.f32 %v4459_v7, %v4458_v38 }
 0x16d   : > { %3436 = vmatmul.mubr.bf16.gmra.mrb[140].mxu0 %v6806_v28  ;;  %4828 = vmatmul.mubr.bf16.gmra.mrb[12].mxu1 %v3090_v27 }
 0x170   : > { %v4349_v42 = vpop.f32.mrb[36].mxu0  ;;  %v4461_v14 = vpop.f32.mrb[36].mxu1 }
 0x171   : > { %v4350_v4 = vpop.f32.mrb[37].mxu0  ;;  %v4462_v31 = vpop.f32.mrb[37].mxu1 }
 0x172   : > { %v4351_v11 = vadd.f32 %v4350_v4, %v4349_v42  ;;  %v4352_v36 = vpop.f32.mrb[38].mxu0  ;;  %v6866_v48 = vadd.f32 %v4462_v31, %v4461_v14  ;;  %v4464_v32 = vpop.f32.mrb[38].mxu1  ;;  %v941_v4 = vld [vmem:[#allocation2 + $0x80] sm:$0xff] }
 0x173   : > { %v4353_v2 = vpop.f32.mrb[39].mxu0  ;;  %v4465_v0 = vpop.f32.mrb[39].mxu1 }
 0x174   : > { %v4354_v6 = vadd.f32 %v4353_v2, %v4352_v36  ;;  %v6868_v52 = vadd.f32 %v4465_v0, %v4464_v32  ;;  %v942_v32 = vld [vmem:[#allocation2 + $0x88] sm:$0xff] }
 0x178   : > { %v4355_v62 = vpop.f32.mrb[40].mxu0  ;;  %v4467_v10 = vpop.f32.mrb[40].mxu1 }
 0x179   : > { %v4356_v28 = vpop.f32.mrb[41].mxu0  ;;  %v4468_v23 = vpop.f32.mrb[41].mxu1 }
 0x17a   : > { %v6870_v24 = vadd.f32 %v4356_v28, %v4355_v62  ;;  %v4358_v12 = vpop.f32.mrb[42].mxu0  ;;  %v6874_v9 = vadd.f32 %v4468_v23, %v4467_v10  ;;  %v4470_v54 = vpop.f32.mrb[42].mxu1  ;;  %v5033_v28 = vadd.f32 %v4345_v57, %v941_v4 }
 0x17b   : > { %v4359_v37 = vpop.f32.mrb[43].mxu0  ;;  %v4471_v30 = vpop.f32.mrb[43].mxu1 }
 0x17c   : > { %v6872_v8 = vadd.f32 %v4359_v37, %v4358_v12  ;;  %v6876_v21 = vadd.f32 %v4471_v30, %v4470_v54  ;;  %v5053_v54 = vadd.f32 %v4348_v34, %v942_v32 }
 0x180   : > { %v4361_v13 = vpop.f32.mrb[44].mxu0  ;;  %v4473_v61 = vpop.f32.mrb[44].mxu1 }
 0x181   : > { %v4362_v25 = vpop.f32.mrb[45].mxu0  ;;  %v4474_v43 = vpop.f32.mrb[45].mxu1 }
 0x182   : > { %v6878_v5 = vadd.f32 %v4362_v25, %v4361_v13  ;;  %v4364_v58 = vpop.f32.mrb[46].mxu0  ;;  %v6882_v55 = vadd.f32 %v4474_v43, %v4473_v61  ;;  %v4476_v27 = vpop.f32.mrb[46].mxu1  ;;  %v943_v61 = vld [vmem:[#allocation2 + $0x90] sm:$0xff] }
 0x183   : > { %v4365_v53 = vpop.f32.mrb[47].mxu0  ;;  %v4477_v38 = vpop.f32.mrb[47].mxu1 }
 0x184   : > { %v6880_v16 = vadd.f32 %v4365_v53, %v4364_v58  ;;  %v6884_v7 = vadd.f32 %v4477_v38, %v4476_v27 }
 0x188   : > { %v4367_v42 = vpop.f32.mrb[48].mxu0  ;;  %v4479_v14 = vpop.f32.mrb[48].mxu1 }
 0x189   : > { %v4368_v36 = vpop.f32.mrb[49].mxu0  ;;  %v4480_v0 = vpop.f32.mrb[49].mxu1 }
 0x18a   : > { %v6886_v2 = vadd.f32 %v4368_v36, %v4367_v42  ;;  %v4370_v31 = vpop.f32.mrb[50].mxu0  ;;  %v4481_v12 = vadd.f32 %v4480_v0, %v4479_v14  ;;  %v4482_v10 = vpop.f32.mrb[50].mxu1  ;;  %v944_v42 = vld [vmem:[#allocation2 + $0x98] sm:$0xff]  ;;  %v5023_v36 = vadd.f32 %v4351_v11, %v943_v61 }
 0x18b   : > { %v4371_v62 = vpop.f32.mrb[51].mxu0  ;;  %v4483_v23 = vpop.f32.mrb[51].mxu1  ;;  %v5043_v32 = vadd.f32 %v4354_v6, %v944_v42 }
 0x18c   : > { %v6888_v37 = vadd.f32 %v4371_v62, %v4370_v31  ;;  %v6890_v30 = vadd.f32 %v5033_v28, %v4481_v12  ;;  %v4484_v13 = vadd.f32 %v4483_v23, %v4482_v10  ;;  %v945_v23 = vld [vmem:[#allocation2 + $0xa0] sm:$0xff] }
 0x18e   : > { %v6892_v25 = vadd.f32 %v5053_v54, %v4484_v13 }
 0x190   : > { %7232 = vst [vmem:[#allocation7_spill] sm:$0xff] %v6892_v25  ;;  %v4373_v58 = vpop.f32.mrb[52].mxu0  ;;  %v4485_v43 = vpop.f32.mrb[52].mxu1  ;;  %v946_v25 = vld [vmem:[#allocation2 + $0xa8] sm:$0xff] }
 0x191   : > { %v4374_v53 = vpop.f32.mrb[53].mxu0  ;;  %v4486_v57 = vpop.f32.mrb[53].mxu1 }
 0x192   : > { %v6894_v27 = vadd.f32 %v4374_v53, %v4373_v58  ;;  %v4376_v38 = vpop.f32.mrb[54].mxu0  ;;  %v4487_v14 = vadd.f32 %v4486_v57, %v4485_v43  ;;  %v4488_v31 = vpop.f32.mrb[54].mxu1  ;;  %v5073_v43 = vadd.f32 %v6870_v24, %v945_v23  ;;  %v948_v24 = vld [vmem:[#allocation2 + $0xb8] sm:$0xff] }
 0x193   : > { %v4377_v4 = vpop.f32.mrb[55].mxu0  ;;  %v4489_v34 = vpop.f32.mrb[55].mxu1 }
 0x194   : > { %v6896_v0 = vadd.f32 %v4377_v4, %v4376_v38  ;;  %v6898_v62 = vadd.f32 %v5023_v36, %v4487_v14  ;;  %v4490_v28 = vadd.f32 %v4489_v34, %v4488_v31  ;;  %v5093_v4 = vadd.f32 %v6872_v8, %v946_v25  ;;  %v927_v25 = vld [vmem:[#allocation2 + $0x10] sm:$0xff] }
 0x196   : > { %7233 = vst [vmem:[#allocation8_spill] sm:$0xff] %v6898_v62  ;;  %v6900_v12 = vadd.f32 %v5043_v32, %v4490_v28  ;;  %v947_v32 = vld [vmem:[#allocation2 + $0xb0] sm:$0xff] }
 0x198   : > { %7234 = vst [vmem:[#allocation9_spill] sm:$0xff] %v6900_v12  ;;  %v4379_v10 = vpop.f32.mrb[56].mxu0  ;;  %v4491_v13 = vpop.f32.mrb[56].mxu1 }
 0x199   : > { %v4380_v54 = vpop.f32.mrb[57].mxu0  ;;  %v4492_v11 = vpop.f32.mrb[57].mxu1 }
 0x19a   : > { %v6902_v58 = vadd.f32 %v4380_v54, %v4379_v10  ;;  %v4382_v53 = vpop.f32.mrb[58].mxu0  ;;  %v4493_v38 = vadd.f32 %v4492_v11, %v4491_v13  ;;  %v4494_v57 = vpop.f32.mrb[58].mxu1 }
 0x19b   : > { %v4383_v61 = vpop.f32.mrb[59].mxu0  ;;  %v4495_v42 = vpop.f32.mrb[59].mxu1 }
 0x19c   : > { %v6905_v6 = vadd.f32 %v4383_v61, %v4382_v53  ;;  %v6908_v36 = vadd.f32 %v5073_v43, %v4493_v38  ;;  %v4496_v14 = vadd.f32 %v4495_v42, %v4494_v57  ;;  %v5063_v53 = vadd.f32 %v6878_v5, %v947_v32  ;;  %v925_v38 = vld [vmem:[#allocation2] sm:$0xff] }
 0x19d   : > { %v5083_v57 = vadd.f32 %v6880_v16, %v948_v24  ;;  %v4858_v5 = vadd.f32 %v6653_v35, %v925_v38  ;;  %v949_v32 = vld [vmem:[#allocation2 + $0xc0] sm:$0xff] }
 0x19e   : > { %7235 = vst [vmem:[#allocation10_spill] sm:$0xff] %v6908_v36  ;;  %v6910_v31 = vadd.f32 %v5093_v4, %v4496_v14  ;;  %v928_v14 = vld [vmem:[#allocation2 + $0x18] sm:$0xff] }
 0x1a0   : > { %7236 = vst [vmem:[#allocation11_spill] sm:$0xff] %v6910_v31  ;;  %v4385_v34 = vpop.f32.mrb[60].mxu0  ;;  %v4497_v10 = vpop.f32.mrb[60].mxu1 }
 0x1a1   : > { %v4386_v28 = vpop.f32.mrb[61].mxu0  ;;  %v4498_v23 = vpop.f32.mrb[61].mxu1 }
 0x1a2   : > { %v6912_v54 = vadd.f32 %v4386_v28, %v4385_v34  ;;  %v4388_v12 = vpop.f32.mrb[62].mxu0  ;;  %v4499_v11 = vadd.f32 %v4498_v23, %v4497_v10  ;;  %v4500_v61 = vpop.f32.mrb[62].mxu1  ;;  %v4847_v34 = vadd.f32 %v6674_v1, %v927_v25  ;;  %v926_v28 = vld [vmem:[#allocation2 + $0x8] sm:$0xff]  ;;  %v4869_v23 = vadd.f32 %v6678_v33, %v928_v14  ;;  %v929_v14 = vld [vmem:[#allocation2 + $0x20] sm:$0xff] }
 0x1a3   : > { %v4389_v13 = vpop.f32.mrb[63].mxu0  ;;  %v4501_v43 = vpop.f32.mrb[63].mxu1  ;;  %v4880_v24 = vadd.f32 %v6656_v51, %v926_v28 }
 0x1a4   : > { %v6915_v8 = vadd.f32 %v4389_v13, %v4388_v12  ;;  %v6918_v42 = vadd.f32 %v5063_v53, %v4499_v11  ;;  %v4502_v4 = vadd.f32 %v4501_v43, %v4500_v61  ;;  %v950_v53 = vld [vmem:[#allocation2 + $0xc8] sm:$0xff]  ;;  %v5113_v43 = vadd.f32 %v6886_v2, %v949_v32 }
 0x1a6   : > { %v6921_v31 = vadd.f32 %v5083_v57, %v4502_v4  ;;  %v931_v57 = vld [vmem:[#allocation2 + $0x30] sm:$0xff] }
 0x1a8   : > { %v4705_v36 = vpop.f32.mrb[64].mxu0  ;;  %v4503_v13 = vpop.f32.mrb[64].mxu1 }
 0x1a9   : > { %v4848_v12 = vadd.f32 %v4847_v34, %v4705_v36  ;;  %v1296_v10 = vpop.f32.mrb[65].mxu0  ;;  %v4504_v1 = vpop.f32.mrb[65].mxu1 }
 0x1aa   : > { %v4859_v62 = vadd.f32 %v4858_v5, %v1296_v10  ;;  %v4706_v16 = vpop.f32.mrb[66].mxu0  ;;  %v4505_v36 = vadd.f32 %v4504_v1, %v4503_v13  ;;  %v4506_v38 = vpop.f32.mrb[66].mxu1  ;;  %v932_v5 = vld [vmem:[#allocation2 + $0x38] sm:$0xff]  ;;  %v951_v10 = vld [vmem:[#allocation2 + $0xd0] sm:$0xff] }
 0x1ab   : > { %v6927_v11 = vadd.f32 %v4848_v12, %v6811_v40  ;;  %v4870_v61 = vadd.f32 %v4869_v23, %v4706_v16  ;;  %v1299_v25 = vpop.f32.mrb[67].mxu0  ;;  %v4507_v51 = vpop.f32.mrb[67].mxu1  ;;  %v5133_v40 = vadd.f32 %v6888_v37, %v950_v53  ;;  %v4913_v37 = vadd.f32 %v6743_v59, %v932_v5  ;;  %v952_v1 = vld [vmem:[#allocation2 + $0xd8] sm:$0xff] }
 0x1ac   : > { %v6931_v35 = vadd.f32 %v4859_v62, %v6781_v56  ;;  %v4881_v33 = vadd.f32 %v4880_v24, %v1299_v25  ;;  %v6937_v34 = vadd.f32 %v5113_v43, %v4505_v36  ;;  %v4508_v2 = vadd.f32 %v4507_v51, %v4506_v38  ;;  %v930_v62 = vld [vmem:[#allocation2 + $0x28] sm:$0xff]  ;;  %v936_v5 = vld [vmem:[#allocation2 + $0x58] sm:$0xff] }
 0x1ad   : > { %v6934_v4 = vadd.f32 %v4870_v61, %v6817_v29  ;;  %v4891_v56 = vadd.f32 %v6736_v41, %v931_v57  ;;  %v4902_v29 = vadd.f32 %v6702_v44, %v929_v14  ;;  %v5103_v36 = vadd.f32 %v6894_v27, %v951_v10  ;;  %v935_v57 = vld [vmem:[#allocation2 + $0x50] sm:$0xff]  ;;  %v933_v14 = vld [vmem:[#allocation2 + $0x40] sm:$0xff] }
 0x1ae   : > { %v6940_v28 = vadd.f32 %v4881_v33, %v6786_v50  ;;  %v6943_v32 = vadd.f32 %v5133_v40, %v4508_v2  ;;  %v4924_v50 = vadd.f32 %v6709_v3, %v930_v62 }
 0x1b0   : > { %v4709_v12 = vpop.f32.mrb[68].mxu0  ;;  %v4509_v16 = vpop.f32.mrb[68].mxu1 }
 0x1b1   : > { %v4892_v23 = vadd.f32 %v4891_v56, %v4709_v12  ;;  %v1312_v13 = vpop.f32.mrb[69].mxu0  ;;  %v4510_v41 = vpop.f32.mrb[69].mxu1  ;;  %v934_v56 = vld [vmem:[#allocation2 + $0x48] sm:$0xff] }
 0x1b2   : > { %v4903_v24 = vadd.f32 %v4902_v29, %v1312_v13  ;;  %v4710_v53 = vpop.f32.mrb[70].mxu0  ;;  %v4511_v38 = vadd.f32 %v4510_v41, %v4509_v16  ;;  %v4512_v33 = vpop.f32.mrb[70].mxu1  ;;  %v953_v29 = vld [vmem:[#allocation2 + $0xe0] sm:$0xff] }
 0x1b3   : > { %v6949_v61 = vadd.f32 %v4892_v23, %v6852_v18  ;;  %v4914_v25 = vadd.f32 %v4913_v37, %v4710_v53  ;;  %v1315_v43 = vpop.f32.mrb[71].mxu0  ;;  %v4513_v3 = vpop.f32.mrb[71].mxu1  ;;  %v5123_v18 = vadd.f32 %v6896_v0, %v952_v1  ;;  %v4957_v0 = vadd.f32 %v6808_v19, %v936_v5  ;;  %v955_v5 = vld [vmem:[#allocation2 + $0xf0] sm:$0xff] }
 0x1b4   : > { %v6953_v44 = vadd.f32 %v4903_v24, %v6835_v60  ;;  %v4925_v59 = vadd.f32 %v4924_v50, %v1315_v43  ;;  %v6959_v40 = vadd.f32 %v5103_v36, %v4511_v38  ;;  %v4514_v27 = vadd.f32 %v4513_v3, %v4512_v33  ;;  %v954_v24 = vld [vmem:[#allocation2 + $0xe8] sm:$0xff]  ;;  %v939_v36 = vld [vmem:[#allocation2 + $0x70] sm:$0xff]  ;;  %v937_v33 = vld [vmem:[#allocation2 + $0x60] sm:$0xff] }
 0x1b5   : > { %v6956_v51 = vadd.f32 %v4914_v25, %v6857_v26  ;;  %v4935_v60 = vadd.f32 %v6799_v63, %v935_v57  ;;  %v4946_v26 = vadd.f32 %v6768_v46, %v933_v14  ;;  %v5153_v41 = vadd.f32 %v6902_v58, %v953_v29  ;;  %v940_v3 = vld [vmem:[#allocation2 + $0x78] sm:$0xff]  ;;  %v938_v14 = vld [vmem:[#allocation2 + $0x68] sm:$0xff] }
 0x1b6   : > { %v6962_v2 = vadd.f32 %v4925_v59, %v6841_v17  ;;  %v6965_v62 = vadd.f32 %v5123_v18, %v4514_v27  ;;  %v4968_v17 = vadd.f32 %v6778_v20, %v934_v56 }
 0x1b8   : > { %v4713_v12 = vpop.f32.mrb[72].mxu0  ;;  %v4515_v13 = vpop.f32.mrb[72].mxu1 }
 0x1b9   : > { %v4936_v10 = vadd.f32 %v4935_v60, %v4713_v12  ;;  %v1328_v23 = vpop.f32.mrb[73].mxu0  ;;  %v4516_v63 = vpop.f32.mrb[73].mxu1 }
 0x1ba   : > { %v4947_v37 = vadd.f32 %v4946_v26, %v1328_v23  ;;  %v4714_v16 = vpop.f32.mrb[74].mxu0  ;;  %v4517_v25 = vadd.f32 %v4516_v63, %v4515_v13  ;;  %v4518_v43 = vpop.f32.mrb[74].mxu1 }
 0x1bb   : > { %v6971_v53 = vadd.f32 %v4936_v10, %v6866_v48  ;;  %v4958_v50 = vadd.f32 %v4957_v0, %v4714_v16  ;;  %v1331_v1 = vpop.f32.mrb[75].mxu0  ;;  %v4519_v20 = vpop.f32.mrb[75].mxu1  ;;  %v5173_v48 = vadd.f32 %v6905_v6, %v954_v24  ;;  %v5001_v6 = vadd.f32 %v6849_v45, %v940_v3  ;;  %v956_v10 = vld [vmem:[#allocation2 + $0xf8] sm:$0xff] }
 0x1bc   : > { %v6975_v46 = vadd.f32 %v4947_v37, %v6861_v49  ;;  %v4969_v19 = vadd.f32 %v4968_v17, %v1331_v1  ;;  %v6981_v59 = vadd.f32 %v5153_v41, %v4517_v25  ;;  %v4520_v58 = vadd.f32 %v4519_v20, %v4518_v43 }
 0x1bd   : > { %v6978_v38 = vadd.f32 %v4958_v50, %v6868_v52  ;;  %v4979_v49 = vadd.f32 %v6846_v22, %v939_v36  ;;  %v4990_v52 = vadd.f32 %v6826_v39, %v937_v33  ;;  %v5143_v37 = vadd.f32 %v6912_v54, %v955_v5 }
 0x1be   : > { %v6984_v57 = vadd.f32 %v4969_v19, %v6864_v15  ;;  %v6987_v18 = vadd.f32 %v5173_v48, %v4520_v58  ;;  %v5012_v15 = vadd.f32 %v6832_v47, %v938_v14  ;;  %v5163_v47 = vadd.f32 %v6915_v8, %v956_v10 }
 0x1c0   : > { %v4717_v27 = vpop.f32.mrb[76].mxu0  ;;  %v4521_v12 = vpop.f32.mrb[76].mxu1 }
 0x1c1   : > { %v4980_v60 = vadd.f32 %v4979_v49, %v4717_v27  ;;  %v1344_v56 = vpop.f32.mrb[77].mxu0  ;;  %v4522_v22 = vpop.f32.mrb[77].mxu1 }
 0x1c2   : > { %v4991_v26 = vadd.f32 %v4990_v52, %v1344_v56  ;;  %v4718_v29 = vpop.f32.mrb[78].mxu0  ;;  %v4523_v16 = vadd.f32 %v4522_v22, %v4521_v12  ;;  %v4524_v17 = vpop.f32.mrb[78].mxu1 }
 0x1c3   : > { %v6993_v23 = vadd.f32 %v4980_v60, %v6882_v55  ;;  %v5002_v0 = vadd.f32 %v5001_v6, %v4718_v29  ;;  %v1347_v13 = vpop.f32.mrb[79].mxu0  ;;  %v4525_v63 = vpop.f32.mrb[79].mxu1 }
 0x1c4   : > { %v6997_v39 = vadd.f32 %v4991_v26, %v6874_v9  ;;  %v5013_v45 = vadd.f32 %v5012_v15, %v1347_v13  ;;  %v7003_v50 = vadd.f32 %v5143_v37, %v4523_v16  ;;  %v4526_v1 = vadd.f32 %v4525_v63, %v4524_v17 }
 0x1c5   : > { %v7000_v24 = vadd.f32 %v5002_v0, %v6884_v7 }
 0x1c6   : > { %v5016_v55 = vadd.f32 %v5013_v45, %v6876_v21  ;;  %v7006_v41 = vadd.f32 %v5163_v47, %v4526_v1 }
 0x1c8   : > { %v4567_v54 = vpop.f32.mrb[80].mxu0 }
 0x1c9   : > { %v4568_v25 = vpop.f32.mrb[81].mxu0 }
 0x1ca   : > { %v4569_v9 = vadd.f32 %v4568_v25, %v4567_v54  ;;  %v4570_v43 = vpop.f32.mrb[82].mxu0 }
 0x1cb   : > { %v4571_v19 = vpop.f32.mrb[83].mxu0 }
 0x1cc   : > { %v7009_v36 = vadd.f32 %v6931_v35, %v4569_v9  ;;  %v4572_v7 = vadd.f32 %v4571_v19, %v4570_v43 }
 0x1ce   : > { %v7012_v20 = vadd.f32 %v6940_v28, %v4572_v7 }
 0x1d0   : > { %v4573_v8 = vpop.f32.mrb[84].mxu0 }
 0x1d1   : > { %v4574_v33 = vpop.f32.mrb[85].mxu0 }
 0x1d2   : > { %v4575_v48 = vadd.f32 %v4574_v33, %v4573_v8  ;;  %v4576_v58 = vpop.f32.mrb[86].mxu0 }
 0x1d3   : > { %v4577_v21 = vpop.f32.mrb[87].mxu0 }
 0x1d4   : > { %v4854_v3 = vadd.f32 %v6927_v11, %v4575_v48  ;;  %v4578_v49 = vadd.f32 %v4577_v21, %v4576_v58 }
 0x1d6   : > { %v4876_v14 = vadd.f32 %v6934_v4, %v4578_v49 }
 0x1d8   : > { %v4579_v27 = vpop.f32.mrb[88].mxu0 }
 0x1d9   : > { %v4580_v52 = vpop.f32.mrb[89].mxu0 }
 0x1da   : > { %v4581_v5 = vadd.f32 %v4580_v52, %v4579_v27  ;;  %v4582_v60 = vpop.f32.mrb[90].mxu0 }
 0x1db   : > { %v4583_v35 = vpop.f32.mrb[91].mxu0 }
 0x1dc   : > { %v7017_v56 = vadd.f32 %v6953_v44, %v4581_v5  ;;  %v4584_v28 = vadd.f32 %v4583_v35, %v4582_v60 }
 0x1de   : > { %v7020_v6 = vadd.f32 %v6962_v2, %v4584_v28 }
 0x1e0   : > { %v4585_v12 = vpop.f32.mrb[92].mxu0 }
 0x1e1   : > { %v4586_v26 = vpop.f32.mrb[93].mxu0 }
 0x1e2   : > { %v4587_v29 = vadd.f32 %v4586_v26, %v4585_v12  ;;  %v4588_v15 = vpop.f32.mrb[94].mxu0 }
 0x1e3   : > { %v4589_v11 = vpop.f32.mrb[95].mxu0 }
 0x1e4   : > { %v4898_v10 = vadd.f32 %v6949_v61, %v4587_v29  ;;  %v4590_v4 = vadd.f32 %v4589_v11, %v4588_v15 }
 0x1e6   : > { %v7024_v22 = vadd.f32 %v6956_v51, %v4590_v4 }
 0x1e8   : > { %v4591_v0 = vpop.f32.mrb[96].mxu0 }
 0x1e9   : > { %v4592_v13 = vpop.f32.mrb[97].mxu0 }
 0x1ea   : > { %v4593_v37 = vadd.f32 %v4592_v13, %v4591_v0  ;;  %v4594_v44 = vpop.f32.mrb[98].mxu0 }
 0x1eb   : > { %v4595_v16 = vpop.f32.mrb[99].mxu0 }
 0x1ec   : > { %v7027_v17 = vadd.f32 %v6975_v46, %v4593_v37  ;;  %v4596_v2 = vadd.f32 %v4595_v16, %v4594_v44 }
 0x1ee   : > { %v7030_v45 = vadd.f32 %v6984_v57, %v4596_v2 }
 0x1f0   : > { %v4597_v63 = vpop.f32.mrb[100].mxu0 }
 0x1f1   : > { %v4598_v47 = vpop.f32.mrb[101].mxu0 }
 0x1f2   : > { %v4599_v1 = vadd.f32 %v4598_v47, %v4597_v63  ;;  %v4600_v61 = vpop.f32.mrb[102].mxu0 }
 0x1f3   : > { %v4601_v54 = vpop.f32.mrb[103].mxu0 }
 0x1f4   : > { %v7033_v51 = vadd.f32 %v6971_v53, %v4599_v1  ;;  %v4602_v25 = vadd.f32 %v4601_v54, %v4600_v61  ;;  %v7238_v61 = vld [vmem:[#allocation8_spill] sm:$0xff] }
 0x1f6   : > { %v7036_v9 = vadd.f32 %v6978_v38, %v4602_v25 }
 0x1f8   : > { %v4603_v43 = vpop.f32.mrb[104].mxu0 }
 0x1f9   : > { %v4604_v19 = vpop.f32.mrb[105].mxu0 }
 0x1fa   : > { %v4605_v46 = vadd.f32 %v4604_v19, %v4603_v43  ;;  %v4606_v7 = vpop.f32.mrb[106].mxu0 }
 0x1fb   : > { %v4607_v8 = vpop.f32.mrb[107].mxu0 }
 0x1fc   : > { %v7039_v57 = vadd.f32 %v6997_v39, %v4605_v46  ;;  %v4608_v33 = vadd.f32 %v4607_v8, %v4606_v7  ;;  %v7239_v46 = vld [vmem:[#allocation9_spill] sm:$0xff] }
 0x1fe   : > { %v7041_v48 = vadd.f32 %v5016_v55, %v4608_v33 }
 0x200   : > { %v4609_v58 = vpop.f32.mrb[108].mxu0 }
 0x201   : > { %v4610_v21 = vpop.f32.mrb[109].mxu0 }
 0x202   : > { %v4611_v49 = vadd.f32 %v4610_v21, %v4609_v58  ;;  %v4612_v53 = vpop.f32.mrb[110].mxu0 }
 0x203   : > { %v4613_v27 = vpop.f32.mrb[111].mxu0 }
 0x204   : > { %v7044_v52 = vadd.f32 %v6993_v23, %v4611_v49  ;;  %v4614_v38 = vadd.f32 %v4613_v27, %v4612_v53 }
 0x206   : > { %v7047_v5 = vadd.f32 %v7000_v24, %v4614_v38  ;;  %v7237_v24 = vld [vmem:[#allocation7_spill] sm:$0xff]  ;;  %v7240_v38 = vld [vmem:[#allocation10_spill] sm:$0xff] }
 0x208   : > { %v4615_v60 = vpop.f32.mrb[112].mxu0  ;;  %v4801_v28 = vpop.f32.mrb[80].mxu1 }
 0x209   : > { %v4616_v35 = vpop.f32.mrb[113].mxu0  ;;  %v4857_v26 = vadd.f32 %v4854_v3, %v4801_v28  ;;  %v3478_v55 = vpop.f32.mrb[81].mxu1 }
 0x20a   : > { %v4617_v39 = vadd.f32 %v4616_v35, %v4615_v60  ;;  %v4618_v12 = vpop.f32.mrb[114].mxu0  ;;  %v4868_v11 = vadd.f32 %v7009_v36, %v3478_v55  ;;  %v4802_v4 = vpop.f32.mrb[82].mxu1 }
 0x20b   : > { %v4619_v29 = vpop.f32.mrb[115].mxu0  ;;  %3639 = vst [vmem:[#allocation2 + $0x10] sm:$0xff] %v4857_v26  ;;  %v4879_v0 = vadd.f32 %v4876_v14, %v4802_v4  ;;  %v3481_v13 = vpop.f32.mrb[83].mxu1 }
 0x20c   : > { %v7050_v15 = vadd.f32 %v6890_v30, %v4617_v39  ;;  %v4620_v23 = vadd.f32 %v4619_v29, %v4618_v12  ;;  %3637 = vst [vmem:[#allocation2] sm:$0xff] %v4868_v11  ;;  %v4890_v44 = vadd.f32 %v7012_v20, %v3481_v13  ;;  %v7241_v12 = vld [vmem:[#allocation11_spill] sm:$0xff] }
 0x20d   : > { %3640 = vst [vmem:[#allocation2 + $0x18] sm:$0xff] %v4879_v0 }
 0x20e   : > { %v7054_v37 = vadd.f32 %v7237_v24, %v4620_v23  ;;  %3638 = vst [vmem:[#allocation2 + $0x8] sm:$0xff] %v4890_v44 }
 0x210   : > { %v4621_v3 = vpop.f32.mrb[116].mxu0  ;;  %v4805_v2 = vpop.f32.mrb[84].mxu1 }
 0x211   : > { %v4622_v16 = vpop.f32.mrb[117].mxu0  ;;  %v4901_v47 = vadd.f32 %v4898_v10, %v4805_v2  ;;  %v3494_v36 = vpop.f32.mrb[85].mxu1 }
 0x212   : > { %v4623_v30 = vadd.f32 %v4622_v16, %v4621_v3  ;;  %v4624_v63 = vpop.f32.mrb[118].mxu0  ;;  %v4912_v14 = vadd.f32 %v7017_v56, %v3494_v36  ;;  %v4806_v25 = vpop.f32.mrb[86].mxu1 }
 0x213   : > { %v4625_v1 = vpop.f32.mrb[119].mxu0  ;;  %3643 = vst [vmem:[#allocation2 + $0x30] sm:$0xff] %v4901_v47  ;;  %v4923_v19 = vadd.f32 %v7024_v22, %v4806_v25  ;;  %v3497_v20 = vpop.f32.mrb[87].mxu1 }
 0x214   : > { %v5029_v54 = vadd.f32 %v7238_v61, %v4623_v30  ;;  %v4626_v43 = vadd.f32 %v4625_v1, %v4624_v63  ;;  %3641 = vst [vmem:[#allocation2 + $0x20] sm:$0xff] %v4912_v14  ;;  %v4934_v8 = vadd.f32 %v7020_v6, %v3497_v20 }
 0x215   : > { %3644 = vst [vmem:[#allocation2 + $0x38] sm:$0xff] %v4923_v19 }
 0x216   : > { %v5049_v7 = vadd.f32 %v7239_v46, %v4626_v43  ;;  %3642 = vst [vmem:[#allocation2 + $0x28] sm:$0xff] %v4934_v8 }
 0x218   : > { %v4627_v10 = vpop.f32.mrb[120].mxu0  ;;  %v4809_v58 = vpop.f32.mrb[88].mxu1 }
 0x219   : > { %v4628_v33 = vpop.f32.mrb[121].mxu0  ;;  %v4945_v56 = vadd.f32 %v7033_v51, %v4809_v58  ;;  %v3510_v53 = vpop.f32.mrb[89].mxu1 }
 0x21a   : > { %v4629_v21 = vadd.f32 %v4628_v33, %v4627_v10  ;;  %v4630_v49 = vpop.f32.mrb[122].mxu0  ;;  %v4956_v22 = vadd.f32 %v7027_v17, %v3510_v53  ;;  %v4810_v35 = vpop.f32.mrb[90].mxu1 }
 0x21b   : > { %v4631_v27 = vpop.f32.mrb[123].mxu0  ;;  %3647 = vst [vmem:[#allocation2 + $0x50] sm:$0xff] %v4945_v56  ;;  %v4967_v6 = vadd.f32 %v7036_v9, %v4810_v35  ;;  %v3513_v39 = vpop.f32.mrb[91].mxu1 }
 0x21c   : > { %v5079_v60 = vadd.f32 %v7240_v38, %v4629_v21  ;;  %v4632_v28 = vadd.f32 %v4631_v27, %v4630_v49  ;;  %3645 = vst [vmem:[#allocation2 + $0x40] sm:$0xff] %v4956_v22  ;;  %v4978_v55 = vadd.f32 %v7030_v45, %v3513_v39 }
 0x21d   : > { %3648 = vst [vmem:[#allocation2 + $0x58] sm:$0xff] %v4967_v6 }
 0x21e   : > { %v5099_v26 = vadd.f32 %v7241_v12, %v4632_v28  ;;  %3646 = vst [vmem:[#allocation2 + $0x48] sm:$0xff] %v4978_v55 }
 0x220   : > { %v4633_v51 = vpop.f32.mrb[124].mxu0  ;;  %v4813_v11 = vpop.f32.mrb[92].mxu1 }
 0x221   : > { %v4634_v29 = vpop.f32.mrb[125].mxu0  ;;  %v4989_v17 = vadd.f32 %v7044_v52, %v4813_v11  ;;  %v3526_v0 = vpop.f32.mrb[93].mxu1 }
 0x222   : > { %v4635_v4 = vadd.f32 %v4634_v29, %v4633_v51  ;;  %v4636_v23 = vpop.f32.mrb[126].mxu0  ;;  %v5000_v9 = vadd.f32 %v7039_v57, %v3526_v0  ;;  %v4814_v44 = vpop.f32.mrb[94].mxu1 }
 0x223   : > { %v4637_v13 = vpop.f32.mrb[127].mxu0  ;;  %3651 = vst [vmem:[#allocation2 + $0x70] sm:$0xff] %v4989_v17  ;;  %v5011_v45 = vadd.f32 %v7047_v5, %v4814_v44  ;;  %v3529_v16 = vpop.f32.mrb[95].mxu1 }
 0x224   : > { %v5069_v24 = vadd.f32 %v6918_v42, %v4635_v4  ;;  %v4638_v3 = vadd.f32 %v4637_v13, %v4636_v23  ;;  %3649 = vst [vmem:[#allocation2 + $0x60] sm:$0xff] %v5000_v9  ;;  %v5022_v30 = vadd.f32 %v7041_v48, %v3529_v16 }
 0x225   : > { %3652 = vst [vmem:[#allocation2 + $0x78] sm:$0xff] %v5011_v45 }
 0x226   : > { %v5089_v2 = vadd.f32 %v6921_v31, %v4638_v3  ;;  %3650 = vst [vmem:[#allocation2 + $0x68] sm:$0xff] %v5022_v30 }
 0x228   : > { %v4639_v52 = vpop.f32.mrb[128].mxu0  ;;  %v4817_v47 = vpop.f32.mrb[0].mxu1 }
 0x229   : > { %v4640_v63 = vpop.f32.mrb[129].mxu0  ;;  %v5032_v1 = vadd.f32 %v5029_v54, %v4817_v47  ;;  %v3542_v57 = vpop.f32.mrb[1].mxu1  ;;  %v3673_v47 = vld [vmem:[#allocation2] sm:$0xff] (!%p4270_p2) }
 0x22a   : > { %v4641_v36 = vadd.f32 %v4640_v63, %v4639_v52  ;;  %v4642_v42 = vpop.f32.mrb[130].mxu0  ;;  %v5042_v5 = vadd.f32 %v7050_v15, %v3542_v57  ;;  %v4818_v25 = vpop.f32.mrb[2].mxu1  ;;  %v3676_v57 = vld [vmem:[#allocation2 + $0x18] sm:$0xff] (!%p4270_p2) }
 0x22b   : > { %v4643_v61 = vpop.f32.mrb[131].mxu0  ;;  %3655 = vst [vmem:[#allocation2 + $0x90] sm:$0xff] %v5032_v1  ;;  %v5052_v31 = vadd.f32 %v5049_v7, %v4818_v25  ;;  %v3545_v19 = vpop.f32.mrb[3].mxu1 }
 0x22c   : > { %v5119_v14 = vadd.f32 %v6937_v34, %v4641_v36  ;;  %v4644_v43 = vadd.f32 %v4643_v61, %v4642_v42  ;;  %3653 = vst [vmem:[#allocation2 + $0x80] sm:$0xff] %v5042_v5  ;;  %v5062_v20 = vadd.f32 %v7054_v37, %v3545_v19  ;;  %v3674_v36 = vld [vmem:[#allocation2 + $0x8] sm:$0xff] (!%p4270_p2)  ;;  %v3677_v61 = vld [vmem:[#allocation2 + $0x20] sm:$0xff] (!%p4270_p2)  ;;  %v3680_v19 = vld [vmem:[#allocation2 + $0x38] sm:$0xff] (!%p4270_p2) }
 0x22d   : > { %3656 = vst [vmem:[#allocation2 + $0x98] sm:$0xff] %v5052_v31  ;;  %v3679_v31 = vld [vmem:[#allocation2 + $0x30] sm:$0xff] (!%p4270_p2) }
 0x22e   : > { %v5139_v48 = vadd.f32 %v6943_v32, %v4644_v43  ;;  %3654 = vst [vmem:[#allocation2 + $0x88] sm:$0xff] %v5062_v20  ;;  %v3678_v43 = vld [vmem:[#allocation2 + $0x28] sm:$0xff] (!%p4270_p2) }
 0x230   : > { %v4645_v46 = vpop.f32.mrb[132].mxu0  ;;  %v4821_v8 = vpop.f32.mrb[4].mxu1 }
 0x231   : > { %v4646_v54 = vpop.f32.mrb[133].mxu0  ;;  %v5072_v34 = vadd.f32 %v5069_v24, %v4821_v8  ;;  %v3558_v58 = vpop.f32.mrb[5].mxu1  ;;  %v3681_v8 = vld [vmem:[#allocation2 + $0x40] sm:$0xff] (!%p4270_p2) }
 0x232   : > { %v4647_v10 = vadd.f32 %v4646_v54, %v4645_v46  ;;  %v4648_v33 = vpop.f32.mrb[134].mxu0  ;;  %v5082_v49 = vadd.f32 %v5079_v60, %v3558_v58  ;;  %v4822_v7 = vpop.f32.mrb[6].mxu1 }
 0x233   : > { %v4649_v15 = vpop.f32.mrb[135].mxu0  ;;  %3659 = vst [vmem:[#allocation2 + $0xb0] sm:$0xff] %v5072_v34  ;;  %v5092_v53 = vadd.f32 %v5089_v2, %v4822_v7  ;;  %v3561_v32 = vpop.f32.mrb[7].mxu1  ;;  %v3685_v7 = vld [vmem:[#allocation2 + $0x60] sm:$0xff] (!%p4270_p2) }
 0x234   : > { %v5109_v21 = vadd.f32 %v6959_v40, %v4647_v10  ;;  %v4650_v56 = vadd.f32 %v4649_v15, %v4648_v33  ;;  %3657 = vst [vmem:[#allocation2 + $0xa0] sm:$0xff] %v5082_v49  ;;  %v5102_v27 = vadd.f32 %v5099_v26, %v3561_v32  ;;  %v3682_v10 = vld [vmem:[#allocation2 + $0x48] sm:$0xff] (!%p4270_p2)  ;;  %v3683_v33 = vld [vmem:[#allocation2 + $0x50] sm:$0xff] (!%p4270_p2)  ;;  %v3684_v49 = vld [vmem:[#allocation2 + $0x58] sm:$0xff] (!%p4270_p2) }
 0x235   : > { %3660 = vst [vmem:[#allocation2 + $0xb8] sm:$0xff] %v5092_v53 }
 0x236   : > { %v5129_v37 = vadd.f32 %v6965_v62, %v4650_v56  ;;  %3658 = vst [vmem:[#allocation2 + $0xa8] sm:$0xff] %v5102_v27  ;;  %v3686_v56 = vld [vmem:[#allocation2 + $0x68] sm:$0xff] (!%p4270_p2) }
 0x238   : > { %v4651_v38 = vpop.f32.mrb[136].mxu0  ;;  %v4825_v35 = vpop.f32.mrb[8].mxu1 }
 0x239   : > { %v4652_v22 = vpop.f32.mrb[137].mxu0  ;;  %v5112_v39 = vadd.f32 %v5109_v21, %v4825_v35  ;;  %v3574_v12 = vpop.f32.mrb[9].mxu1 }
 0x23a   : > { %v4653_v28 = vadd.f32 %v4652_v22, %v4651_v38  ;;  %v4654_v6 = vpop.f32.mrb[138].mxu0  ;;  %v5122_v55 = vadd.f32 %v5119_v14, %v3574_v12  ;;  %v4826_v51 = vpop.f32.mrb[10].mxu1  ;;  %v3687_v38 = vld [vmem:[#allocation2 + $0x70] sm:$0xff] (!%p4270_p2)  ;;  %v3688_v22 = vld [vmem:[#allocation2 + $0x78] sm:$0xff] (!%p4270_p2)  ;;  %v3689_v12 = vld [vmem:[#allocation2 + $0x80] sm:$0xff] (!%p4270_p2) }
 0x23b   : > { %v4655_v40 = vpop.f32.mrb[139].mxu0  ;;  %3663 = vst [vmem:[#allocation2 + $0xd0] sm:$0xff] %v5112_v39  ;;  %v5132_v11 = vadd.f32 %v5129_v37, %v4826_v51  ;;  %v3577_v4 = vpop.f32.mrb[11].mxu1 }
 0x23c   : > { %v5159_v60 = vadd.f32 %v6981_v59, %v4653_v28  ;;  %v4656_v29 = vadd.f32 %v4655_v40, %v4654_v6  ;;  %3661 = vst [vmem:[#allocation2 + $0xc0] sm:$0xff] %v5122_v55  ;;  %v5142_v26 = vadd.f32 %v5139_v48, %v3577_v4  ;;  %v3690_v40 = vld [vmem:[#allocation2 + $0x88] sm:$0xff] (!%p4270_p2)  ;;  %v3692_v4 = vld [vmem:[#allocation2 + $0x98] sm:$0xff] (!%p4270_p2) }
 0x23d   : > { %3664 = vst [vmem:[#allocation2 + $0xd8] sm:$0xff] %v5132_v11  ;;  %v3691_v11 = vld [vmem:[#allocation2 + $0x90] sm:$0xff] (!%p4270_p2) }
 0x23e   : > { %v5179_v62 = vadd.f32 %v6987_v18, %v4656_v29  ;;  %3662 = vst [vmem:[#allocation2 + $0xc8] sm:$0xff] %v5142_v26 }
 0x240   : > { %v4657_v23 = vpop.f32.mrb[140].mxu0  ;;  %v4829_v0 = vpop.f32.mrb[12].mxu1 }
 0x241   : > { %v4658_v17 = vpop.f32.mrb[141].mxu0  ;;  %v3590_v9 = vpop.f32.mrb[13].mxu1 }
 0x242   : > { %v4659_v13 = vadd.f32 %v4658_v17, %v4657_v23  ;;  %v4660_v24 = vpop.f32.mrb[142].mxu0  ;;  %v5162_v3 = vadd.f32 %v5159_v60, %v3590_v9  ;;  %v4830_v45 = vpop.f32.mrb[14].mxu1 }
 0x243   : > { %v4661_v44 = vpop.f32.mrb[143].mxu0  ;;  %v3593_v2 = vpop.f32.mrb[15].mxu1 }
 0x244   : > { %v5149_v59 = vadd.f32 %v7003_v50, %v4659_v13  ;;  %v4662_v16 = vadd.f32 %v4661_v44, %v4660_v24  ;;  %3665 = vst [vmem:[#allocation2 + $0xe0] sm:$0xff] %v5162_v3  ;;  %v5182_v52 = vadd.f32 %v5179_v62, %v3593_v2  ;;  %3672 = sbr.rel (%p4270_p2) target bundleno = 602 (0x25a), region = 40  ;;  %v7088_v50 = vld [vmem:[%s7226_s2] ss:$0 sm:$0xff] (!%p4270_p2)  ;;  %v3694_v13 = vld [vmem:[#allocation2 + $0xa8] sm:$0xff] (!%p4270_p2)  ;;  %v3695_v24 = vld [vmem:[#allocation2 + $0xb0] sm:$0xff] (!%p4270_p2) }
 0x245   : > { %v3712_v42 = vadd.f32 (!%p4270_p2), %v7088_v50, %v3673_v47  ;;  %v3713_v1 = vadd.f32 (!%p4270_p2), %v7088_v50, %v3674_v36  ;;  %v3715_v5 = vadd.f32 (!%p4270_p2), %v7088_v50, %v3676_v57  ;;  %v3716_v25 = vadd.f32 (!%p4270_p2), %v7088_v50, %v3677_v61  ;;  %v3693_v62 = vld [vmem:[#allocation2 + $0xa0] sm:$0xff] (!%p4270_p2)  ;;  %v3700_v57 = vld [vmem:[#allocation2 + $0xd8] sm:$0xff] (!%p4270_p2) }
 0x246   : > { %v5152_v30 = vadd.f32 %v5149_v59, %v4829_v0  ;;  %v5169_v18 = vadd.f32 %v7006_v41, %v4662_v16  ;;  %3666 = vst [vmem:[#allocation2 + $0xe8] sm:$0xff] %v5182_v52  ;;  %v3675_v41 = vld [vmem:[#allocation2 + $0x10] sm:$0xff] (!%p4270_p2)  ;;  %v3717_v46 = vadd.f32 (!%p4270_p2), %v7088_v50, %v3678_v43  ;;  %v3718_v54 = vadd.f32 (!%p4270_p2), %v7088_v50, %v3679_v31  ;;  %v3697_v52 = vld [vmem:[#allocation2 + $0xc0] sm:$0xff] (!%p4270_p2) }
 0x247   : > { %v3714_v14 = vadd.f32 (!%p4270_p2), %v7088_v50, %v3675_v41  ;;  %v3744_v48 = vmax.f32 (!%p4270_p2), %v3712_v42, 0.0  ;;  %v3745_v20 = vmax.f32 (!%p4270_p2), %v3713_v1, 0.0  ;;  %v3747_v58 = vmax.f32 (!%p4270_p2), %v3715_v5, 0.0  ;;  %v3699_v41 = vld [vmem:[#allocation2 + $0xd0] sm:$0xff] (!%p4270_p2) }
 0x248   : > { %3667 = vst [vmem:[#allocation2 + $0xf0] sm:$0xff] %v5152_v30  ;;  %v5172_v63 = vadd.f32 %v5169_v18, %v4830_v45  ;;  %v3748_v15 = vmax.f32 (!%p4270_p2), %v3716_v25, 0.0  ;;  %v3719_v21 = vadd.f32 (!%p4270_p2), %v7088_v50, %v3680_v19  ;;  %v3749_v53 = vmax.f32 (!%p4270_p2), %v3717_v46, 0.0  ;;  %v3696_v45 = vld [vmem:[#allocation2 + $0xb8] sm:$0xff] (!%p4270_p2) }
 0x249   : > { %v3746_v34 = vmax.f32 (!%p4270_p2), %v3714_v14, 0.0  ;;  %3776 = vst [vmem:[%s5788_s26] sm:$0xff] (!%p4270_p2), %v3744_v48  ;;  %3777 = vst [vmem:[%s5788_s26 + $0x8] sm:$0xff] (!%p4270_p2), %v3745_v20  ;;  %v3750_v32 = vmax.f32 (!%p4270_p2), %v3718_v54, 0.0  ;;  %v3720_v37 = vadd.f32 (!%p4270_p2), %v7088_v50, %v3681_v8  ;;  %v3721_v27 = vadd.f32 (!%p4270_p2), %v7088_v50, %v3682_v10 }
 0x24a   : > { %3668 = vst [vmem:[#allocation2 + $0xf8] sm:$0xff] %v5172_v63  ;;  %3779 = vst [vmem:[%s5788_s26 + $0x18] sm:$0xff] (!%p4270_p2), %v3747_v58  ;;  %v3751_v35 = vmax.f32 (!%p4270_p2), %v3719_v21, 0.0  ;;  %v3722_v28 = vadd.f32 (!%p4270_p2), %v7088_v50, %v3683_v33  ;;  %v3723_v6 = vadd.f32 (!%p4270_p2), %v7088_v50, %v3684_v49  ;;  %v3724_v39 = vadd.f32 (!%p4270_p2), %v7088_v50, %v3685_v7  ;;  %v3698_v63 = vld [vmem:[#allocation2 + $0xc8] sm:$0xff] (!%p4270_p2) }
 0x24b   : > { %3778 = vst [vmem:[%s5788_s26 + $0x10] sm:$0xff] %v3746_v34  ;;  %3780 = vst [vmem:[%s5788_s26 + $0x20] sm:$0xff] %v3748_v15  ;;  %v3752_v60 = vmax.f32 %v3720_v37, 0.0  ;;  %v3753_v55 = vmax.f32 %v3721_v27, 0.0  ;;  %v3725_v51 = vadd.f32 %v7088_v50, %v3686_v56  ;;  %v3726_v29 = vadd.f32 %v7088_v50, %v3687_v38  ;;  %v3701_v61 = vld [vmem:[#allocation2 + $0xe0] sm:$0xff] }
 0x24c   : > { %3781 = vst [vmem:[%s5788_s26 + $0x28] sm:$0xff] %v3749_v53  ;;  %3782 = vst [vmem:[%s5788_s26 + $0x30] sm:$0xff] %v3750_v32  ;;  %v3754_v26 = vmax.f32 %v3722_v28, 0.0  ;;  %v3755_v23 = vmax.f32 %v3723_v6, 0.0  ;;  %v3756_v17 = vmax.f32 %v3724_v39, 0.0  ;;  %v3727_v0 = vadd.f32 %v7088_v50, %v3688_v22 }
 0x24d   : > { %3783 = vst [vmem:[%s5788_s26 + $0x38] sm:$0xff] %v3751_v35  ;;  %3784 = vst [vmem:[%s5788_s26 + $0x40] sm:$0xff] %v3752_v60  ;;  %v3757_v9 = vmax.f32 %v3725_v51, 0.0  ;;  %v3758_v44 = vmax.f32 %v3726_v29, 0.0  ;;  %v3728_v59 = vadd.f32 %v7088_v50, %v3689_v12  ;;  %v3729_v3 = vadd.f32 %v7088_v50, %v3690_v40  ;;  %v3702_v31 = vld [vmem:[#allocation2 + $0xe8] sm:$0xff] }
 0x24e   : > { %3785 = vst [vmem:[%s5788_s26 + $0x48] sm:$0xff] %v3753_v55  ;;  %3786 = vst [vmem:[%s5788_s26 + $0x50] sm:$0xff] %v3754_v26  ;;  %v3759_v16 = vmax.f32 %v3727_v0, 0.0  ;;  %v3730_v2 = vadd.f32 %v7088_v50, %v3691_v11  ;;  %v3731_v30 = vadd.f32 %v7088_v50, %v3692_v4  ;;  %v3732_v18 = vadd.f32 %v7088_v50, %v3693_v62 }
 0x24f   : > { %3787 = vst [vmem:[%s5788_s26 + $0x58] sm:$0xff] %v3755_v23  ;;  %3788 = vst [vmem:[%s5788_s26 + $0x60] sm:$0xff] %v3756_v17  ;;  %v3760_v47 = vmax.f32 %v3728_v59, 0.0  ;;  %v3761_v36 = vmax.f32 %v3729_v3, 0.0  ;;  %v3733_v42 = vadd.f32 %v7088_v50, %v3694_v13  ;;  %v3734_v1 = vadd.f32 %v7088_v50, %v3695_v24  ;;  %v3703_v19 = vld [vmem:[#allocation2 + $0xf0] sm:$0xff] }
 0x250   : > { %3789 = vst [vmem:[%s5788_s26 + $0x68] sm:$0xff] %v3757_v9  ;;  %3790 = vst [vmem:[%s5788_s26 + $0x70] sm:$0xff] %v3758_v44  ;;  %v3762_v14 = vmax.f32 %v3730_v2, 0.0  ;;  %v3763_v5 = vmax.f32 %v3731_v30, 0.0  ;;  %v3764_v25 = vmax.f32 %v3732_v18, 0.0  ;;  %v3735_v43 = vadd.f32 %v7088_v50, %v3696_v45 }
 0x251   : > { %3791 = vst [vmem:[%s5788_s26 + $0x78] sm:$0xff] %v3759_v16  ;;  %3792 = vst [vmem:[%s5788_s26 + $0x80] sm:$0xff] %v3760_v47  ;;  %v3765_v48 = vmax.f32 %v3733_v42, 0.0  ;;  %v3766_v20 = vmax.f32 %v3734_v1, 0.0  ;;  %v3736_v46 = vadd.f32 %v7088_v50, %v3697_v52  ;;  %v3737_v54 = vadd.f32 %v7088_v50, %v3698_v63  ;;  %v3704_v8 = vld [vmem:[#allocation2 + $0xf8] sm:$0xff] }
 0x252   : > { %3793 = vst [vmem:[%s5788_s26 + $0x88] sm:$0xff] %v3761_v36  ;;  %3794 = vst [vmem:[%s5788_s26 + $0x90] sm:$0xff] %v3762_v14  ;;  %v3767_v10 = vmax.f32 %v3735_v43, 0.0  ;;  %v3738_v33 = vadd.f32 %v7088_v50, %v3699_v41  ;;  %v3739_v34 = vadd.f32 %v7088_v50, %v3700_v57  ;;  %v3740_v58 = vadd.f32 %v7088_v50, %v3701_v61 }
 0x253   : > { %3795 = vst [vmem:[%s5788_s26 + $0x98] sm:$0xff] %v3763_v5  ;;  %3796 = vst [vmem:[%s5788_s26 + $0xa0] sm:$0xff] %v3764_v25  ;;  %v3768_v15 = vmax.f32 %v3736_v46, 0.0  ;;  %v3769_v21 = vmax.f32 %v3737_v54, 0.0  ;;  %v3741_v49 = vadd.f32 %v7088_v50, %v3702_v31  ;;  %v3742_v7 = vadd.f32 %v7088_v50, %v3703_v19 }
 0x254   : > { %3797 = vst [vmem:[%s5788_s26 + $0xa8] sm:$0xff] %v3765_v48  ;;  %3798 = vst [vmem:[%s5788_s26 + $0xb0] sm:$0xff] %v3766_v20  ;;  %v3770_v56 = vmax.f32 %v3738_v33, 0.0  ;;  %v3771_v53 = vmax.f32 %v3739_v34, 0.0  ;;  %v3772_v32 = vmax.f32 %v3740_v58, 0.0  ;;  %v3743_v37 = vadd.f32 %v7088_v50, %v3704_v8 }
 0x255   : > { %3799 = vst [vmem:[%s5788_s26 + $0xb8] sm:$0xff] %v3767_v10  ;;  %3800 = vst [vmem:[%s5788_s26 + $0xc0] sm:$0xff] %v3768_v15  ;;  %v3773_v27 = vmax.f32 %v3741_v49, 0.0  ;;  %v3774_v38 = vmax.f32 %v3742_v7, 0.0 }
 0x256   : > { %3801 = vst [vmem:[%s5788_s26 + $0xc8] sm:$0xff] %v3769_v21  ;;  %3802 = vst [vmem:[%s5788_s26 + $0xd0] sm:$0xff] %v3770_v56  ;;  %v3775_v22 = vmax.f32 %v3743_v37, 0.0 }
 0x257   : > { %3803 = vst [vmem:[%s5788_s26 + $0xd8] sm:$0xff] %v3771_v53  ;;  %3804 = vst [vmem:[%s5788_s26 + $0xe0] sm:$0xff] %v3772_v32 }
 0x258   : > { %3805 = vst [vmem:[%s5788_s26 + $0xe8] sm:$0xff] %v3773_v27  ;;  %3806 = vst [vmem:[%s5788_s26 + $0xf0] sm:$0xff] %v3774_v38 }
 0x259   : > { %3807 = vst [vmem:[%s5788_s26 + $0xf8] sm:$0xff] %v3775_v22 }
 0x25a PF: > { %s4273_s15 = sshll.u32 %s5645_s16, 5  ;;  %s4274_s29 = sshll.u32 %s5649_s17, 8 }
 0x25b   : > { %s3824_s30 = sshll.u32 %s5788_s26, 4  ;;  %s3821_s4 = sadd.s32 %s4274_s29, %s4273_s15  ;;  %s7157_s30 = int_to_ptr.vmem [resolvable:$true] %s3824_s30 }
 0x25c   : > { %s4275_s5 = sshll.u32 %s3821_s4, 7  ;;  %s7166_s11 = scalar_lea.sflag [#allocation4], %s197_s7 }
 0x25d   : > { %s7162_s10 = scalar_lea.hbm %s7227_s3, %s4275_s5  ;;  %s5555_s22 = scalar_lea.vmem %s7157_s30, 4096 }
 0x25e   : > { %p5556_p3 = scmp.ne.s32.totalorder %s7157_s30, %s5555_s22  ;;  %s5668_s16 = smov [#allocation3]  }
 0x25f   : > { %s5559_s17 = sshll.u32 %s5668_s16, 4  ;;  %s5560_s17 = int_to_ptr.vmem [resolvable:$false] %s5559_s17 }
 0x260   : > { %p5557_p4 = pnand %p5556_p3, %p5753_p6  ;;  %s5561_s26 = scalar_lea.vmem %s5560_s17, 8192 }
 0x261   : > { %p5562_p8 = scmp.lt.s32.totalorder %s7157_s30, %s5560_s17  ;;  %p5563_p9 = scmp.lt.s32.totalorder %s5561_s26, %s5555_s22 }
 0x262   : > { %p5558_p5 = pneg %p5557_p4 }
 0x263   : > { %p5564_p10 = por %p5563_p9, %p5562_p8 }
 0x265   : > { %p5565_p11 = pnand %p5564_p10, %p5558_p5 }
 0x267   : > { %5568 = shalt.err (!%p5565_p11)
}
 0x268   : > { %s5569_s7 = scalar_lea.hbm %s7162_s10, 4096  ;;  %s5573_s29 = scalar_lea.hbm %s7227_s3, 65536 }
 0x269   : > { %p5570_p12 = scmp.ne.s32.totalorder %s7162_s10, %s5569_s7  ;;  %p5574_p1 = scmp.lt.u32.totalorder %s7162_s10, %s7227_s3 }
 0x26a   : > { %p5575_p2 = scmp.lt.u32.totalorder %s5573_s29, %s5569_s7  ;;  %p5577_p4 = scmp.lt.u32.totalorder %s5569_s7, %s7162_s10 }
 0x26b   : > { %p5571_p13 = pnand %p5570_p12, %p5753_p6 }
 0x26c   : > { %p5576_p3 = por %p5575_p2, %p5574_p1 }
 0x26d   : > { %p5572_p0 = pneg %p5571_p13 }
 0x26e   : > { %p5578_p5 = por %p5577_p4, %p5576_p3 }
 0x270   : > { %p5579_p8 = pnand %p5578_p5, %p5572_p0 }
 0x272   : > { %5582 = shalt.err (!%p5579_p8)
}
 0x273   : > { %s5669_s8 = smov 128   ;;  %s5670_s9 = smov 8  }
 0x274   : > { %5233 = dma.vmem_to_hbm [thread:$0]  (%p5753_p6), %s7157_s30, 4096, %s7162_s10, %s7166_s11, %s5669_s8, %s5669_s8, %s5670_s9  }
 0x275 PF: > { %p5239_p9 = scmp.ge.s32.totalorder %s5665_s21, 2  ;;  %s3839_s22 = sand.u32 1, %s5629_s12  }
 0x276   : > { %s3840_s16 = scalar_lea.sflag [#allocation4], %s3839_s22 }
 0x277   : > { %p5236_p10 = pnand %p5239_p9, %p5760_p7 }
 0x279   : > { %5624 = dma.done.wait (!%p5236_p10), %s3840_s16, 4096  }
 0x27a   : > { %5626 = vsyncadd (!%p5236_p10), %s3840_s16, 4294963200  ;;  %s16_s21 = sadd.s32 1, %s5665_s21   ;;  %s7242_s27 = sld [smem:[#allocation6_spill]] }
 0x27b   : > { %p13_p11 = scmp.ge.s32.totalorder %s16_s21, 50   ;;  %s7243_s12 = smov %s5633_s13 }
 0x27c   : > { %s7244_s13 = smov %s5637_s14  ;;  %s7245_s14 = smov %s5774_s6 }
 0x27d   : > { %s7246_s15 = smov %s5653_s18  ;;  %s7247_s16 = smov %s5657_s19 }
 0x27e   : > { %s7248_s17 = smov %s5661_s20  ;;  %s7249_s18 = smov %s7253_s24 }
 0x27f   : > { %s7250_s19 = smov %s7257_s25  ;;  %15 = sbr.rel (!%p13_p11) target bundleno = 6 (0x6), region = 78 }
 0x280   : > { %s7251_s20 = smov %s7242_s27 }
 0x286   :  { %3845 = vsyncpa [#allocation4], 1 }
 0x287   :  { %3847 = vsyncpa [#allocation4 + $0x1], 1 }

</bundles_post_ra>
